<compile_context>
chip_gen: v6e
topology: v6e:2x2x1
jax: 0.10.0
libtpu: 0.0.40
codegen_flags: <defaults>
</compile_context>

<pallas_src>
import numpy as np
import jax
import jax.numpy as jnp
from jax.experimental import pallas as pl
from jax.experimental.pallas import tpu as pltpu

NB = 2              # batch
LATENT = 32         # latent dim
C_HID = 8           # base channels
C_MID = 2 * C_HID   # 16
C_OUT = 3           # image channels
OUT_LANES = 128     # lane-dense (padded) output width: C_OUT*32 = 96 -> 128
INV_SQRT2 = 0.7071067811865476


def _gelu(x):
    # exact (erf-based) GELU, matching torch.nn.GELU default
    return 0.5 * x * (1.0 + jax.lax.erf(x * INV_SQRT2))


# ----------------------------- fused Pallas kernel ---------------------------

def _decoder_kernel(z_ref, wlin_ref, blin_ref,
                    t1_ref, b1_ref, c2_ref, bc2_ref,
                    t3_ref, b3_ref, c4_ref, bc4_ref,
                    t5_ref, b5_ref,
                    out_ref,
                    r4, r8, r8b, r16, r16b):
    f32 = jnp.float32
    z = z_ref[...]                                              # (NB, LATENT)

    # ---- Linear + GELU -> 4x4 x C_MID image in padded layout (r4: (12, 96))
    r4[...] = jnp.zeros(r4.shape, f32)
    for h in range(4):
        row = jnp.dot(z, wlin_ref[h], preferred_element_type=f32) + blin_ref[h]
        r4[pl.ds((h + 1) * NB, NB), :] = _gelu(row)

    # ---- ConvTranspose2d 16->16, 4x4 -> 8x8 (2-phase sub-pixel) + GELU
    x0 = r4[pl.ds(NB, 4 * NB), :]
    x1 = r4[pl.ds(2 * NB, 4 * NB), :]
    b1 = b1_ref[...]
    o0 = _gelu(jnp.dot(x0, t1_ref[0], preferred_element_type=f32) + b1)
    o1 = _gelu(jnp.dot(x0, t1_ref[1], preferred_element_type=f32)
               + jnp.dot(x1, t1_ref[2], preferred_element_type=f32) + b1)
    r8[...] = jnp.zeros(r8.shape, f32)
    for p in range(4):                                          # row-parity interleave
        r8[pl.ds((1 + 2 * p) * NB, NB), :] = o0[p * NB:(p + 1) * NB, :]
        r8[pl.ds((2 + 2 * p) * NB, NB), :] = o1[p * NB:(p + 1) * NB, :]

    # ---- Conv2d 16->16, 8x8 + GELU
    acc = jnp.dot(r8[pl.ds(0, 8 * NB), :], c2_ref[0], preferred_element_type=f32)
    acc = acc + jnp.dot(r8[pl.ds(NB, 8 * NB), :], c2_ref[1], preferred_element_type=f32)
    acc = acc + jnp.dot(r8[pl.ds(2 * NB, 8 * NB), :], c2_ref[2], preferred_element_type=f32)
    y = _gelu(acc + bc2_ref[...])
    r8b[...] = jnp.zeros(r8b.shape, f32)
    r8b[pl.ds(NB, 8 * NB), :] = y

    # ---- ConvTranspose2d 16->8, 8x8 -> 16x16 + GELU
    x0 = r8b[pl.ds(NB, 8 * NB), :]
    x1 = r8b[pl.ds(2 * NB, 8 * NB), :]
    b3 = b3_ref[...]
    o0 = _gelu(jnp.dot(x0, t3_ref[0], preferred_element_type=f32) + b3)
    o1 = _gelu(jnp.dot(x0, t3_ref[1], preferred_element_type=f32)
               + jnp.dot(x1, t3_ref[2], preferred_element_type=f32) + b3)
    r16[...] = jnp.zeros(r16.shape, f32)
    for p in range(8):
        r16[pl.ds((1 + 2 * p) * NB, NB), :] = o0[p * NB:(p + 1) * NB, :]
        r16[pl.ds((2 + 2 * p) * NB, NB), :] = o1[p * NB:(p + 1) * NB, :]

    # ---- Conv2d 8->8, 16x16 + GELU
    acc = jnp.dot(r16[pl.ds(0, 16 * NB), :], c4_ref[0], preferred_element_type=f32)
    acc = acc + jnp.dot(r16[pl.ds(NB, 16 * NB), :], c4_ref[1], preferred_element_type=f32)
    acc = acc + jnp.dot(r16[pl.ds(2 * NB, 16 * NB), :], c4_ref[2], preferred_element_type=f32)
    y = _gelu(acc + bc4_ref[...])
    r16b[...] = jnp.zeros(r16b.shape, f32)
    r16b[pl.ds(NB, 16 * NB), :] = y

    # ---- ConvTranspose2d 8->3, 16x16 -> 32x32 + tanh
    # Output is written PARITY-SPLIT and lane-padded to 128:
    #   rows [0, 32)  = even image rows (ordered by p, batch)
    #   rows [32, 64) = odd  image rows
    # -> two full (32, 128) unmasked stores; wrapper de-interleaves (tiny).
    x0 = r16b[pl.ds(NB, 16 * NB), :]
    x1 = r16b[pl.ds(2 * NB, 16 * NB), :]
    b5 = b5_ref[...]
    even = jnp.tanh(jnp.dot(x0, t5_ref[0], preferred_element_type=f32) + b5)
    odd = jnp.tanh(jnp.dot(x0, t5_ref[1], preferred_element_type=f32)
                   + jnp.dot(x1, t5_ref[2], preferred_element_type=f32) + b5)
    out_ref[pl.ds(0, 16 * NB), :] = even
    out_ref[pl.ds(16 * NB, 16 * NB), :] = odd


# --------------------------- weight re-packing (init) ------------------------

def _pack_linear(w, b):
    """PyTorch Linear weight (256, LATENT), bias (256,) -> per-image-row weights
    producing lanes = (padded_width, channel) for the 4x4 x C_MID image."""
    L = w.shape[1]
    wp = 4 + 2
    wlin = np.zeros((4, L, wp * C_MID), np.float32)
    blin = np.zeros((4, 1, wp * C_MID), np.float32)
    for h in range(4):
        for wq in range(4):
            for c in range(C_MID):
                flat = c * 16 + h * 4 + wq          # torch reshape(B, C, 4, 4)
                lane = (wq + 1) * C_MID + c
                wlin[h, :, lane] = w[flat, :]
                blin[h, 0, lane] = b[flat]
    return wlin, blin


def _pack_conv(w, b, W):
    """Conv2d weight (Cout, Cin, 3, 3) -> 3 block-Toeplitz matrices (per kernel
    row), mapping padded-width input lanes to padded-width output lanes."""
    cout, cin = w.shape[0], w.shape[1]
    wp = W + 2
    T = np.zeros((3, wp * cin, wp * cout), np.float32)
    for dh in range(3):
        for wo in range(W):
            for kw in range(3):
                wi = wo + kw
                T[dh, wi * cin:(wi + 1) * cin, (wo + 1) * cout:(wo + 2) * cout] = \
                    np.transpose(w[:, :, dh, kw])
    bias = np.zeros((1, wp * cout), np.float32)
    for wo in range(W):
        bias[0, (wo + 1) * cout:(wo + 2) * cout] = b
    return T, bias


def _pack_convT(w, b, W, c_major_out=False, pad_to=None):
    """ConvTranspose2d(k=3, s=2, p=1, op=1) weight (Cin, Cout, 3, 3) -> 3
    matrices for the 2-phase sub-pixel form: slot 0 = (even rows, row-tap 0),
    slot 1 = (odd rows, row-tap 0), slot 2 = (odd rows, row-tap +1)."""
    cin, cout = w.shape[0], w.shape[1]
    wp_in = W + 2
    wout = 2 * W
    n_lanes = cout * wout if c_major_out else (wout + 2) * cout
    T = np.zeros((3, wp_in * cin, n_lanes), np.float32)
    # (a, b2) -> list of (dh, dwi, kh, kw): output (2p+a, 2q+b2) += x[p+dh, q+dwi] @ w[:,:,kh,kw]
    contribs = {
        (0, 0): [(0, 0, 1, 1)],
        (0, 1): [(0, 0, 1, 2), (0, 1, 1, 0)],
        (1, 0): [(0, 0, 2, 1), (1, 0, 0, 1)],
        (1, 1): [(0, 0, 2, 2), (0, 1, 2, 0), (1, 0, 0, 2), (1, 1, 0, 0)],
    }
    slot = {(0, 0): 0, (1, 0): 1, (1, 1): 2}
    for (a, b2), terms in contribs.items():
        for (dh, dwi, kh, kw) in terms:
            blk = w[:, :, kh, kw]                               # (Cin, Cout)
            s = slot[(a, dh)]
            for q in range(W):
                wi = q + dwi + 1
                wo = 2 * q + b2
                if c_major_out:
                    cols = slice(wo, wo + cout * wout, wout)
                else:
                    cols = slice((wo + 1) * cout, (wo + 2) * cout)
                T[s, wi * cin:(wi + 1) * cin, cols] += blk
    bias = np.zeros((1, n_lanes), np.float32)
    for wo in range(wout):
        for co in range(cout):
            lane = co * wout + wo if c_major_out else (wo + 1) * cout + co
            bias[0, lane] = b[co]
    if pad_to is not None and pad_to > n_lanes:
        pad = pad_to - n_lanes
        T = np.pad(T, ((0, 0), (0, 0), (0, pad)))
        bias = np.pad(bias, ((0, 0), (0, pad)))
    return T, bias


def init_decoder_params(key):
    def init(k, fan_in, shape):
        return jax.random.normal(k, shape, jnp.float32) / jnp.sqrt(float(fan_in))
    ks = jax.random.split(key, 12)
    p = {}
    p["lin_w"] = init(ks[0], LATENT, (2 * 16 * C_HID, LATENT))
    p["lin_b"] = init(ks[1], LATENT, (2 * 16 * C_HID,))
    p["tc1_w"] = init(ks[2], C_MID * 9, (C_MID, C_MID, 3, 3))
    p["tc1_b"] = init(ks[3], C_MID * 9, (C_MID,))
    p["c2_w"] = init(ks[4], C_MID * 9, (C_MID, C_MID, 3, 3))
    p["c2_b"] = init(ks[5], C_MID * 9, (C_MID,))
    p["tc3_w"] = init(ks[6], C_MID * 9, (C_MID, C_HID, 3, 3))
    p["tc3_b"] = init(ks[7], C_MID * 9, (C_HID,))
    p["c4_w"] = init(ks[8], C_HID * 9, (C_HID, C_HID, 3, 3))
    p["c4_b"] = init(ks[9], C_HID * 9, (C_HID,))
    p["tc5_w"] = init(ks[10], C_HID * 9, (C_HID, C_OUT, 3, 3))
    p["tc5_b"] = init(ks[11], C_HID * 9, (C_OUT,))
    return p


def build_fused_params(raw):
    npy = {k: np.asarray(v, np.float32) for k, v in raw.items()}
    wlin, blin = _pack_linear(npy["lin_w"], npy["lin_b"])
    t1, b1 = _pack_convT(npy["tc1_w"], npy["tc1_b"], W=4)
    c2, bc2 = _pack_conv(npy["c2_w"], npy["c2_b"], W=8)
    t3, b3 = _pack_convT(npy["tc3_w"], npy["tc3_b"], W=8)
    c4, bc4 = _pack_conv(npy["c4_w"], npy["c4_b"], W=16)
    t5, b5 = _pack_convT(npy["tc5_w"], npy["tc5_b"], W=16,
                         c_major_out=True, pad_to=OUT_LANES)
    packed = dict(wlin=wlin, blin=blin, t1=t1, b1=b1, c2=c2, bc2=bc2,
                  t3=t3, b3=b3, c4=c4, bc4=bc4, t5=t5, b5=b5)
    return {k: jnp.asarray(v, jnp.float32) for k, v in packed.items()}


# --------------------------------- wrapper -----------------------------------

def _full_spec(shape):
    nd = len(shape)
    return pl.BlockSpec(shape, lambda i, _nd=nd: (0,) * _nd)


def decoder_forward(fused, z):
    inputs = (z, fused["wlin"], fused["blin"],
              fused["t1"], fused["b1"], fused["c2"], fused["bc2"],
              fused["t3"], fused["b3"], fused["c4"], fused["bc4"],
              fused["t5"], fused["b5"])
    out_shape = (2 * 16 * NB, OUT_LANES)          # (64, 128) parity-split slab
    out2d = pl.pallas_call(
        _decoder_kernel,
        out_shape=jax.ShapeDtypeStruct(out_shape, jnp.float32),
        grid_spec=pltpu.PrefetchScalarGridSpec(
            num_scalar_prefetch=0,
            grid=(1,),
            in_specs=[_full_spec(a.shape) for a in inputs],
            out_specs=_full_spec(out_shape),
            scratch_shapes=[
                pltpu.VMEM((12, 96), jnp.float32),    # r4   : padded 4x4   x16
                pltpu.VMEM((20, 160), jnp.float32),   # r8   : padded 8x8   x16
                pltpu.VMEM((20, 160), jnp.float32),   # r8b
                pltpu.VMEM((36, 144), jnp.float32),   # r16  : padded 16x16 x8
                pltpu.VMEM((36, 144), jnp.float32),   # r16b
            ],
        ),
        compiler_params=pltpu.CompilerParams(dimension_semantics=("arbitrary",)),
    )(*inputs)
    # rows = (parity, p, batch), lanes = (channel, width) -> NCHW (tiny, free)
    valid = out2d[:, :C_OUT * 32]
    img = valid.reshape(2, 16, NB, C_OUT, 32)
    return img.transpose(2, 3, 1, 0, 4).reshape(NB, C_OUT, 32, 32)


# ----------------------- pure-JAX reference (validation) ---------------------

def _ref_patches3x3(xp, oh, ow):
    cols = []
    for dh in range(3):
        for dw in range(3):
            cols.append(xp[:, dh:dh + oh, dw:dw + ow, :])
    p = jnp.stack(cols, axis=3)
    return p.reshape(xp.shape[0] * oh * ow, 9 * xp.shape[3])


def _ref_conv3x3(x, w, b, act):
    B, H, W, cin = x.shape
    cout = w.shape[0]
    xp = jnp.pad(x, ((0, 0), (1, 1), (1, 1), (0, 0)))
    patches = _ref_patches3x3(xp, H, W)
    wmat = jnp.transpose(w, (2, 3, 1, 0)).reshape(9 * cin, cout)
    return act(patches @ wmat + b).reshape(B, H, W, cout)


def _ref_convT(x, w, b, act):
    B, H, W, cin = x.shape
    cout = w.shape[1]
    xd = jnp.zeros((B, 2 * H - 1, 2 * W - 1, cin), x.dtype).at[:, ::2, ::2, :].set(x)
    xp = jnp.pad(xd, ((0, 0), (1, 2), (1, 2), (0, 0)))
    patches = _ref_patches3x3(xp, 2 * H, 2 * W)
    wmat = jnp.flip(w, axis=(2, 3)).transpose(2, 3, 0, 1).reshape(9 * cin, cout)
    return act(patches @ wmat + b).reshape(B, 2 * H, 2 * W, cout)


def reference_forward(raw, z):
    gelu = _gelu
    y = gelu(z @ raw["lin_w"].T + raw["lin_b"])
    x = y.reshape(z.shape[0], C_MID, 4, 4).transpose(0, 2, 3, 1)
    x = _ref_convT(x, raw["tc1_w"], raw["tc1_b"], gelu)
    x = _ref_conv3x3(x, raw["c2_w"], raw["c2_b"], gelu)
    x = _ref_convT(x, raw["tc3_w"], raw["tc3_b"], gelu)
    x = _ref_conv3x3(x, raw["c4_w"], raw["c4_b"], gelu)
    x = _ref_convT(x, raw["tc5_w"], raw["tc5_b"], jnp.tanh)
    return x.transpose(0, 3, 1, 2)


# ----------------------------------- main -------------------------------------

if __name__ == "__main__":
    key = jax.random.PRNGKey(0)
    kp, kz = jax.random.split(key)

    raw = init_decoder_params(kp)
    fused = build_fused_params(raw)
    z = jax.random.normal(kz, (NB, LATENT), jnp.float32)

    fwd = jax.jit(decoder_forward)
    out = jax.block_until_ready(fwd(fused, z))

    assert out.shape == (NB, C_OUT, 32, 32), out.shape
    assert bool(jnp.all(jnp.isfinite(out)))
    assert bool(jnp.all(jnp.abs(out) <= 1.0))          # tanh output range

    # numerical check vs a pure-JAX (XLA) reference of the same module
    ref = jax.block_until_ready(jax.jit(reference_forward)(raw, z))
    max_err = float(jnp.max(jnp.abs(out - ref)))
    assert bool(jnp.allclose(out, ref, atol=1e-3, rtol=1e-3)), max_err

    print("KERNEL_OK")
</pallas_src>

<mosaic_0001>
module attributes {stable_mosaic.version = 11 : i64} {
  func.func @_decoder_kernel(%arg0: i32, %arg1: memref<2x32xf32, #tpu.memory_space<vmem>>, %arg2: memref<4x32x96xf32, #tpu.memory_space<vmem>>, %arg3: memref<4x1x96xf32, #tpu.memory_space<vmem>>, %arg4: memref<3x96x160xf32, #tpu.memory_space<vmem>>, %arg5: memref<1x160xf32, #tpu.memory_space<vmem>>, %arg6: memref<3x160x160xf32, #tpu.memory_space<vmem>>, %arg7: memref<1x160xf32, #tpu.memory_space<vmem>>, %arg8: memref<3x160x144xf32, #tpu.memory_space<vmem>>, %arg9: memref<1x144xf32, #tpu.memory_space<vmem>>, %arg10: memref<3x144x144xf32, #tpu.memory_space<vmem>>, %arg11: memref<1x144xf32, #tpu.memory_space<vmem>>, %arg12: memref<3x144x128xf32, #tpu.memory_space<vmem>>, %arg13: memref<1x128xf32, #tpu.memory_space<vmem>>, %arg14: memref<64x128xf32, #tpu.memory_space<vmem>>, %arg15: memref<12x96xf32, #tpu.memory_space<vmem>>, %arg16: memref<20x160xf32, #tpu.memory_space<vmem>>, %arg17: memref<20x160xf32, #tpu.memory_space<vmem>>, %arg18: memref<36x144xf32, #tpu.memory_space<vmem>>, %arg19: memref<36x144xf32, #tpu.memory_space<vmem>>) attributes {dimension_semantics = [#tpu.dimension_semantics<arbitrary>], iteration_bounds = array<i64: 1>, scalar_prefetch = 0 : i64, scratch_operands = 5 : i64, tpu.core_type = #tpu.core_type<tc>, window_params = [{pipeline_mode = #tpu.pipeline_mode<synchronous>, transform_indices = @transform_0, window_bounds = array<i64: 2, 32>}, {pipeline_mode = #tpu.pipeline_mode<synchronous>, transform_indices = @transform_1, window_bounds = array<i64: 4, 32, 96>}, {pipeline_mode = #tpu.pipeline_mode<synchronous>, transform_indices = @transform_2, window_bounds = array<i64: 4, 1, 96>}, {pipeline_mode = #tpu.pipeline_mode<synchronous>, transform_indices = @transform_3, window_bounds = array<i64: 3, 96, 160>}, {pipeline_mode = #tpu.pipeline_mode<synchronous>, transform_indices = @transform_4, window_bounds = array<i64: 1, 160>}, {pipeline_mode = #tpu.pipeline_mode<synchronous>, transform_indices = @transform_5, window_bounds = array<i64: 3, 160, 160>}, {pipeline_mode = #tpu.pipeline_mode<synchronous>, transform_indices = @transform_6, window_bounds = array<i64: 1, 160>}, {pipeline_mode = #tpu.pipeline_mode<synchronous>, transform_indices = @transform_7, window_bounds = array<i64: 3, 160, 144>}, {pipeline_mode = #tpu.pipeline_mode<synchronous>, transform_indices = @transform_8, window_bounds = array<i64: 1, 144>}, {pipeline_mode = #tpu.pipeline_mode<synchronous>, transform_indices = @transform_9, window_bounds = array<i64: 3, 144, 144>}, {pipeline_mode = #tpu.pipeline_mode<synchronous>, transform_indices = @transform_10, window_bounds = array<i64: 1, 144>}, {pipeline_mode = #tpu.pipeline_mode<synchronous>, transform_indices = @transform_11, window_bounds = array<i64: 3, 144, 128>}, {pipeline_mode = #tpu.pipeline_mode<synchronous>, transform_indices = @transform_12, window_bounds = array<i64: 1, 128>}, {pipeline_mode = #tpu.pipeline_mode<synchronous>, transform_indices = @transform_13, window_bounds = array<i64: 64, 128>}]} {
    %c0 = arith.constant 0 : index
    %c0_0 = arith.constant 0 : index
    %0 = vector.load %arg1[%c0, %c0_0] : memref<2x32xf32, #tpu.memory_space<vmem>>, vector<2x32xf32>
    %cst = arith.constant 0.000000e+00 : f32
    %1 = vector.broadcast %cst : f32 to vector<12x96xf32>
    %c0_1 = arith.constant 0 : index
    %c0_2 = arith.constant 0 : index
    %2 = vector.load %arg15[%c0_1, %c0_2] : memref<12x96xf32, #tpu.memory_space<vmem>>, vector<12x96xf32>
    tpu.vector_store %arg15[%c0_1, %c0_2], %1 {strides = array<i32>} : memref<12x96xf32, #tpu.memory_space<vmem>>, vector<12x96xf32>,
    %c0_3 = arith.constant 0 : index
    %c0_4 = arith.constant 0 : index
    %c0_5 = arith.constant 0 : index
    %3 = vector.load %arg2[%c0_3, %c0_4, %c0_5] : memref<4x32x96xf32, #tpu.memory_space<vmem>>, vector<1x32x96xf32>
    %4 = vector.shape_cast %3 : vector<1x32x96xf32> to vector<32x96xf32>
    %cst_6 = arith.constant dense<0.000000e+00> : vector<2x96xf32>
    %5 = tpu.matmul %0, %4, %cst_6 {dimension_numbers = #tpu.dot_dimension_numbers<[1], [0], [0], [1], [0, 0, 1, 1], [], []>} : vector<2x32xf32>, vector<32x96xf32>, vector<2x96xf32> -> vector<2x96xf32>
    %c0_7 = arith.constant 0 : index
    %c0_8 = arith.constant 0 : index
    %c0_9 = arith.constant 0 : index
    %6 = vector.load %arg3[%c0_7, %c0_8, %c0_9] : memref<4x1x96xf32, #tpu.memory_space<vmem>>, vector<1x1x96xf32>
    %7 = vector.shape_cast %6 : vector<1x1x96xf32> to vector<1x96xf32>
    %8 = vector.broadcast %7 : vector<1x96xf32> to vector<2x96xf32>
    %9 = arith.addf %5, %8 : vector<2x96xf32>
    %cst_10 = arith.constant 5.000000e-01 : f32
    %10 = vector.broadcast %cst_10 : f32 to vector<2x96xf32>
    %11 = arith.mulf %10, %9 : vector<2x96xf32>
    %cst_11 = arith.constant 0.707106769 : f32
    %12 = vector.broadcast %cst_11 : f32 to vector<2x96xf32>
    %13 = arith.mulf %9, %12 : vector<2x96xf32>
    %14 = math.erf %13 : vector<2x96xf32>
    %cst_12 = arith.constant 1.000000e+00 : f32
    %15 = vector.broadcast %cst_12 : f32 to vector<2x96xf32>
    %16 = arith.addf %15, %14 : vector<2x96xf32>
    %17 = arith.mulf %11, %16 : vector<2x96xf32>
    %c2 = arith.constant 2 : index
    %c0_13 = arith.constant 0 : index
    %18 = vector.load %arg15[%c2, %c0_13] : memref<12x96xf32, #tpu.memory_space<vmem>>, vector<2x96xf32>
    tpu.vector_store %arg15[%c2, %c0_13], %17 {strides = array<i32>} : memref<12x96xf32, #tpu.memory_space<vmem>>, vector<2x96xf32>,
    %c1 = arith.constant 1 : index
    %c0_14 = arith.constant 0 : index
    %c0_15 = arith.constant 0 : index
    %19 = vector.load %arg2[%c1, %c0_14, %c0_15] : memref<4x32x96xf32, #tpu.memory_space<vmem>>, vector<1x32x96xf32>
    %20 = vector.shape_cast %19 : vector<1x32x96xf32> to vector<32x96xf32>
    %cst_16 = arith.constant dense<0.000000e+00> : vector<2x96xf32>
    %21 = tpu.matmul %0, %20, %cst_16 {dimension_numbers = #tpu.dot_dimension_numbers<[1], [0], [0], [1], [0, 0, 1, 1], [], []>} : vector<2x32xf32>, vector<32x96xf32>, vector<2x96xf32> -> vector<2x96xf32>
    %c1_17 = arith.constant 1 : index
    %c0_18 = arith.constant 0 : index
    %c0_19 = arith.constant 0 : index
    %22 = vector.load %arg3[%c1_17, %c0_18, %c0_19] : memref<4x1x96xf32, #tpu.memory_space<vmem>>, vector<1x1x96xf32>
    %23 = vector.shape_cast %22 : vector<1x1x96xf32> to vector<1x96xf32>
    %24 = vector.broadcast %23 : vector<1x96xf32> to vector<2x96xf32>
    %25 = arith.addf %21, %24 : vector<2x96xf32>
    %cst_20 = arith.constant 5.000000e-01 : f32
    %26 = vector.broadcast %cst_20 : f32 to vector<2x96xf32>
    %27 = arith.mulf %26, %25 : vector<2x96xf32>
    %cst_21 = arith.constant 0.707106769 : f32
    %28 = vector.broadcast %cst_21 : f32 to vector<2x96xf32>
    %29 = arith.mulf %25, %28 : vector<2x96xf32>
    %30 = math.erf %29 : vector<2x96xf32>
    %cst_22 = arith.constant 1.000000e+00 : f32
    %31 = vector.broadcast %cst_22 : f32 to vector<2x96xf32>
    %32 = arith.addf %31, %30 : vector<2x96xf32>
    %33 = arith.mulf %27, %32 : vector<2x96xf32>
    %c4 = arith.constant 4 : index
    %c0_23 = arith.constant 0 : index
    %34 = vector.load %arg15[%c4, %c0_23] : memref<12x96xf32, #tpu.memory_space<vmem>>, vector<2x96xf32>
    tpu.vector_store %arg15[%c4, %c0_23], %33 {strides = array<i32>} : memref<12x96xf32, #tpu.memory_space<vmem>>, vector<2x96xf32>,
    %c2_24 = arith.constant 2 : index
    %c0_25 = arith.constant 0 : index
    %c0_26 = arith.constant 0 : index
    %35 = vector.load %arg2[%c2_24, %c0_25, %c0_26] : memref<4x32x96xf32, #tpu.memory_space<vmem>>, vector<1x32x96xf32>
    %36 = vector.shape_cast %35 : vector<1x32x96xf32> to vector<32x96xf32>
    %cst_27 = arith.constant dense<0.000000e+00> : vector<2x96xf32>
    %37 = tpu.matmul %0, %36, %cst_27 {dimension_numbers = #tpu.dot_dimension_numbers<[1], [0], [0], [1], [0, 0, 1, 1], [], []>} : vector<2x32xf32>, vector<32x96xf32>, vector<2x96xf32> -> vector<2x96xf32>
    %c2_28 = arith.constant 2 : index
    %c0_29 = arith.constant 0 : index
    %c0_30 = arith.constant 0 : index
    %38 = vector.load %arg3[%c2_28, %c0_29, %c0_30] : memref<4x1x96xf32, #tpu.memory_space<vmem>>, vector<1x1x96xf32>
    %39 = vector.shape_cast %38 : vector<1x1x96xf32> to vector<1x96xf32>
    %40 = vector.broadcast %39 : vector<1x96xf32> to vector<2x96xf32>
    %41 = arith.addf %37, %40 : vector<2x96xf32>
    %cst_31 = arith.constant 5.000000e-01 : f32
    %42 = vector.broadcast %cst_31 : f32 to vector<2x96xf32>
    %43 = arith.mulf %42, %41 : vector<2x96xf32>
    %cst_32 = arith.constant 0.707106769 : f32
    %44 = vector.broadcast %cst_32 : f32 to vector<2x96xf32>
    %45 = arith.mulf %41, %44 : vector<2x96xf32>
    %46 = math.erf %45 : vector<2x96xf32>
    %cst_33 = arith.constant 1.000000e+00 : f32
    %47 = vector.broadcast %cst_33 : f32 to vector<2x96xf32>
    %48 = arith.addf %47, %46 : vector<2x96xf32>
    %49 = arith.mulf %43, %48 : vector<2x96xf32>
    %c6 = arith.constant 6 : index
    %c0_34 = arith.constant 0 : index
    %50 = vector.load %arg15[%c6, %c0_34] : memref<12x96xf32, #tpu.memory_space<vmem>>, vector<2x96xf32>
    tpu.vector_store %arg15[%c6, %c0_34], %49 {strides = array<i32>} : memref<12x96xf32, #tpu.memory_space<vmem>>, vector<2x96xf32>,
    %c3 = arith.constant 3 : index
    %c0_35 = arith.constant 0 : index
    %c0_36 = arith.constant 0 : index
    %51 = vector.load %arg2[%c3, %c0_35, %c0_36] : memref<4x32x96xf32, #tpu.memory_space<vmem>>, vector<1x32x96xf32>
    %52 = vector.shape_cast %51 : vector<1x32x96xf32> to vector<32x96xf32>
    %cst_37 = arith.constant dense<0.000000e+00> : vector<2x96xf32>
    %53 = tpu.matmul %0, %52, %cst_37 {dimension_numbers = #tpu.dot_dimension_numbers<[1], [0], [0], [1], [0, 0, 1, 1], [], []>} : vector<2x32xf32>, vector<32x96xf32>, vector<2x96xf32> -> vector<2x96xf32>
    %c3_38 = arith.constant 3 : index
    %c0_39 = arith.constant 0 : index
    %c0_40 = arith.constant 0 : index
    %54 = vector.load %arg3[%c3_38, %c0_39, %c0_40] : memref<4x1x96xf32, #tpu.memory_space<vmem>>, vector<1x1x96xf32>
    %55 = vector.shape_cast %54 : vector<1x1x96xf32> to vector<1x96xf32>
    %56 = vector.broadcast %55 : vector<1x96xf32> to vector<2x96xf32>
    %57 = arith.addf %53, %56 : vector<2x96xf32>
    %cst_41 = arith.constant 5.000000e-01 : f32
    %58 = vector.broadcast %cst_41 : f32 to vector<2x96xf32>
    %59 = arith.mulf %58, %57 : vector<2x96xf32>
    %cst_42 = arith.constant 0.707106769 : f32
    %60 = vector.broadcast %cst_42 : f32 to vector<2x96xf32>
    %61 = arith.mulf %57, %60 : vector<2x96xf32>
    %62 = math.erf %61 : vector<2x96xf32>
    %cst_43 = arith.constant 1.000000e+00 : f32
    %63 = vector.broadcast %cst_43 : f32 to vector<2x96xf32>
    %64 = arith.addf %63, %62 : vector<2x96xf32>
    %65 = arith.mulf %59, %64 : vector<2x96xf32>
    %c8 = arith.constant 8 : index
    %c0_44 = arith.constant 0 : index
    %66 = vector.load %arg15[%c8, %c0_44] : memref<12x96xf32, #tpu.memory_space<vmem>>, vector<2x96xf32>
    tpu.vector_store %arg15[%c8, %c0_44], %65 {strides = array<i32>} : memref<12x96xf32, #tpu.memory_space<vmem>>, vector<2x96xf32>,
    %c2_45 = arith.constant 2 : index
    %c0_46 = arith.constant 0 : index
    %67 = vector.load %arg15[%c2_45, %c0_46] : memref<12x96xf32, #tpu.memory_space<vmem>>, vector<8x96xf32>
    %c4_47 = arith.constant 4 : index
    %c0_48 = arith.constant 0 : index
    %68 = vector.load %arg15[%c4_47, %c0_48] : memref<12x96xf32, #tpu.memory_space<vmem>>, vector<8x96xf32>
    %c0_49 = arith.constant 0 : index
    %c0_50 = arith.constant 0 : index
    %69 = vector.load %arg5[%c0_49, %c0_50] : memref<1x160xf32, #tpu.memory_space<vmem>>, vector<1x160xf32>
    %c0_51 = arith.constant 0 : index
    %c0_52 = arith.constant 0 : index
    %c0_53 = arith.constant 0 : index
    %70 = vector.load %arg4[%c0_51, %c0_52, %c0_53] : memref<3x96x160xf32, #tpu.memory_space<vmem>>, vector<1x96x160xf32>
    %71 = vector.shape_cast %70 : vector<1x96x160xf32> to vector<96x160xf32>
    %cst_54 = arith.constant dense<0.000000e+00> : vector<8x160xf32>
    %72 = tpu.matmul %67, %71, %cst_54 {dimension_numbers = #tpu.dot_dimension_numbers<[1], [0], [0], [1], [0, 0, 1, 1], [], []>} : vector<8x96xf32>, vector<96x160xf32>, vector<8x160xf32> -> vector<8x160xf32>
    %73 = vector.broadcast %69 : vector<1x160xf32> to vector<8x160xf32>
    %74 = arith.addf %72, %73 : vector<8x160xf32>
    %cst_55 = arith.constant 5.000000e-01 : f32
    %75 = vector.broadcast %cst_55 : f32 to vector<8x160xf32>
    %76 = arith.mulf %75, %74 : vector<8x160xf32>
    %cst_56 = arith.constant 0.707106769 : f32
    %77 = vector.broadcast %cst_56 : f32 to vector<8x160xf32>
    %78 = arith.mulf %74, %77 : vector<8x160xf32>
    %79 = math.erf %78 : vector<8x160xf32>
    %cst_57 = arith.constant 1.000000e+00 : f32
    %80 = vector.broadcast %cst_57 : f32 to vector<8x160xf32>
    %81 = arith.addf %80, %79 : vector<8x160xf32>
    %82 = arith.mulf %76, %81 : vector<8x160xf32>
    %c1_58 = arith.constant 1 : index
    %c0_59 = arith.constant 0 : index
    %c0_60 = arith.constant 0 : index
    %83 = vector.load %arg4[%c1_58, %c0_59, %c0_60] : memref<3x96x160xf32, #tpu.memory_space<vmem>>, vector<1x96x160xf32>
    %84 = vector.shape_cast %83 : vector<1x96x160xf32> to vector<96x160xf32>
    %cst_61 = arith.constant dense<0.000000e+00> : vector<8x160xf32>
    %85 = tpu.matmul %67, %84, %cst_61 {dimension_numbers = #tpu.dot_dimension_numbers<[1], [0], [0], [1], [0, 0, 1, 1], [], []>} : vector<8x96xf32>, vector<96x160xf32>, vector<8x160xf32> -> vector<8x160xf32>
    %c2_62 = arith.constant 2 : index
    %c0_63 = arith.constant 0 : index
    %c0_64 = arith.constant 0 : index
    %86 = vector.load %arg4[%c2_62, %c0_63, %c0_64] : memref<3x96x160xf32, #tpu.memory_space<vmem>>, vector<1x96x160xf32>
    %87 = vector.shape_cast %86 : vector<1x96x160xf32> to vector<96x160xf32>
    %cst_65 = arith.constant dense<0.000000e+00> : vector<8x160xf32>
    %88 = tpu.matmul %68, %87, %cst_65 {dimension_numbers = #tpu.dot_dimension_numbers<[1], [0], [0], [1], [0, 0, 1, 1], [], []>} : vector<8x96xf32>, vector<96x160xf32>, vector<8x160xf32> -> vector<8x160xf32>
    %89 = arith.addf %85, %88 : vector<8x160xf32>
    %90 = vector.broadcast %69 : vector<1x160xf32> to vector<8x160xf32>
    %91 = arith.addf %89, %90 : vector<8x160xf32>
    %cst_66 = arith.constant 5.000000e-01 : f32
    %92 = vector.broadcast %cst_66 : f32 to vector<8x160xf32>
    %93 = arith.mulf %92, %91 : vector<8x160xf32>
    %cst_67 = arith.constant 0.707106769 : f32
    %94 = vector.broadcast %cst_67 : f32 to vector<8x160xf32>
    %95 = arith.mulf %91, %94 : vector<8x160xf32>
    %96 = math.erf %95 : vector<8x160xf32>
    %cst_68 = arith.constant 1.000000e+00 : f32
    %97 = vector.broadcast %cst_68 : f32 to vector<8x160xf32>
    %98 = arith.addf %97, %96 : vector<8x160xf32>
    %99 = arith.mulf %93, %98 : vector<8x160xf32>
    %cst_69 = arith.constant 0.000000e+00 : f32
    %100 = vector.broadcast %cst_69 : f32 to vector<20x160xf32>
    %c0_70 = arith.constant 0 : index
    %c0_71 = arith.constant 0 : index
    %101 = vector.load %arg16[%c0_70, %c0_71] : memref<20x160xf32, #tpu.memory_space<vmem>>, vector<20x160xf32>
    tpu.vector_store %arg16[%c0_70, %c0_71], %100 {strides = array<i32>} : memref<20x160xf32, #tpu.memory_space<vmem>>, vector<20x160xf32>,
    %102 = vector.extract_strided_slice %82 {offsets = [0, 0], sizes = [2, 160], strides = [1, 1]} : vector<8x160xf32> to vector<2x160xf32>
    %c2_72 = arith.constant 2 : index
    %c0_73 = arith.constant 0 : index
    %103 = vector.load %arg16[%c2_72, %c0_73] : memref<20x160xf32, #tpu.memory_space<vmem>>, vector<2x160xf32>
    tpu.vector_store %arg16[%c2_72, %c0_73], %102 {strides = array<i32>} : memref<20x160xf32, #tpu.memory_space<vmem>>, vector<2x160xf32>,
    %104 = vector.extract_strided_slice %99 {offsets = [0, 0], sizes = [2, 160], strides = [1, 1]} : vector<8x160xf32> to vector<2x160xf32>
    %c4_74 = arith.constant 4 : index
    %c0_75 = arith.constant 0 : index
    %105 = vector.load %arg16[%c4_74, %c0_75] : memref<20x160xf32, #tpu.memory_space<vmem>>, vector<2x160xf32>
    tpu.vector_store %arg16[%c4_74, %c0_75], %104 {strides = array<i32>} : memref<20x160xf32, #tpu.memory_space<vmem>>, vector<2x160xf32>,
    %106 = vector.extract_strided_slice %82 {offsets = [2, 0], sizes = [2, 160], strides = [1, 1]} : vector<8x160xf32> to vector<2x160xf32>
    %c6_76 = arith.constant 6 : index
    %c0_77 = arith.constant 0 : index
    %107 = vector.load %arg16[%c6_76, %c0_77] : memref<20x160xf32, #tpu.memory_space<vmem>>, vector<2x160xf32>
    tpu.vector_store %arg16[%c6_76, %c0_77], %106 {strides = array<i32>} : memref<20x160xf32, #tpu.memory_space<vmem>>, vector<2x160xf32>,
    %108 = vector.extract_strided_slice %99 {offsets = [2, 0], sizes = [2, 160], strides = [1, 1]} : vector<8x160xf32> to vector<2x160xf32>
    %c8_78 = arith.constant 8 : index
    %c0_79 = arith.constant 0 : index
    %109 = vector.load %arg16[%c8_78, %c0_79] : memref<20x160xf32, #tpu.memory_space<vmem>>, vector<2x160xf32>
    tpu.vector_store %arg16[%c8_78, %c0_79], %108 {strides = array<i32>} : memref<20x160xf32, #tpu.memory_space<vmem>>, vector<2x160xf32>,
    %110 = vector.extract_strided_slice %82 {offsets = [4, 0], sizes = [2, 160], strides = [1, 1]} : vector<8x160xf32> to vector<2x160xf32>
    %c10 = arith.constant 10 : index
    %c0_80 = arith.constant 0 : index
    %111 = vector.load %arg16[%c10, %c0_80] : memref<20x160xf32, #tpu.memory_space<vmem>>, vector<2x160xf32>
    tpu.vector_store %arg16[%c10, %c0_80], %110 {strides = array<i32>} : memref<20x160xf32, #tpu.memory_space<vmem>>, vector<2x160xf32>,
    %112 = vector.extract_strided_slice %99 {offsets = [4, 0], sizes = [2, 160], strides = [1, 1]} : vector<8x160xf32> to vector<2x160xf32>
    %c12 = arith.constant 12 : index
    %c0_81 = arith.constant 0 : index
    %113 = vector.load %arg16[%c12, %c0_81] : memref<20x160xf32, #tpu.memory_space<vmem>>, vector<2x160xf32>
    tpu.vector_store %arg16[%c12, %c0_81], %112 {strides = array<i32>} : memref<20x160xf32, #tpu.memory_space<vmem>>, vector<2x160xf32>,
    %114 = vector.extract_strided_slice %82 {offsets = [6, 0], sizes = [2, 160], strides = [1, 1]} : vector<8x160xf32> to vector<2x160xf32>
    %c14 = arith.constant 14 : index
    %c0_82 = arith.constant 0 : index
    %115 = vector.load %arg16[%c14, %c0_82] : memref<20x160xf32, #tpu.memory_space<vmem>>, vector<2x160xf32>
    tpu.vector_store %arg16[%c14, %c0_82], %114 {strides = array<i32>} : memref<20x160xf32, #tpu.memory_space<vmem>>, vector<2x160xf32>,
    %116 = vector.extract_strided_slice %99 {offsets = [6, 0], sizes = [2, 160], strides = [1, 1]} : vector<8x160xf32> to vector<2x160xf32>
    %c16 = arith.constant 16 : index
    %c0_83 = arith.constant 0 : index
    %117 = vector.load %arg16[%c16, %c0_83] : memref<20x160xf32, #tpu.memory_space<vmem>>, vector<2x160xf32>
    tpu.vector_store %arg16[%c16, %c0_83], %116 {strides = array<i32>} : memref<20x160xf32, #tpu.memory_space<vmem>>, vector<2x160xf32>,
    %c0_84 = arith.constant 0 : index
    %c0_85 = arith.constant 0 : index
    %118 = vector.load %arg16[%c0_84, %c0_85] : memref<20x160xf32, #tpu.memory_space<vmem>>, vector<16x160xf32>
    %c0_86 = arith.constant 0 : index
    %c0_87 = arith.constant 0 : index
    %c0_88 = arith.constant 0 : index
    %119 = vector.load %arg6[%c0_86, %c0_87, %c0_88] : memref<3x160x160xf32, #tpu.memory_space<vmem>>, vector<1x160x160xf32>
    %120 = vector.shape_cast %119 : vector<1x160x160xf32> to vector<160x160xf32>
    %cst_89 = arith.constant dense<0.000000e+00> : vector<16x160xf32>
    %121 = tpu.matmul %118, %120, %cst_89 {dimension_numbers = #tpu.dot_dimension_numbers<[1], [0], [0], [1], [0, 0, 1, 1], [], []>} : vector<16x160xf32>, vector<160x160xf32>, vector<16x160xf32> -> vector<16x160xf32>
    %c2_90 = arith.constant 2 : index
    %c0_91 = arith.constant 0 : index
    %122 = vector.load %arg16[%c2_90, %c0_91] : memref<20x160xf32, #tpu.memory_space<vmem>>, vector<16x160xf32>
    %c1_92 = arith.constant 1 : index
    %c0_93 = arith.constant 0 : index
    %c0_94 = arith.constant 0 : index
    %123 = vector.load %arg6[%c1_92, %c0_93, %c0_94] : memref<3x160x160xf32, #tpu.memory_space<vmem>>, vector<1x160x160xf32>
    %124 = vector.shape_cast %123 : vector<1x160x160xf32> to vector<160x160xf32>
    %cst_95 = arith.constant dense<0.000000e+00> : vector<16x160xf32>
    %125 = tpu.matmul %122, %124, %cst_95 {dimension_numbers = #tpu.dot_dimension_numbers<[1], [0], [0], [1], [0, 0, 1, 1], [], []>} : vector<16x160xf32>, vector<160x160xf32>, vector<16x160xf32> -> vector<16x160xf32>
    %126 = arith.addf %121, %125 : vector<16x160xf32>
    %c4_96 = arith.constant 4 : index
    %c0_97 = arith.constant 0 : index
    %127 = vector.load %arg16[%c4_96, %c0_97] : memref<20x160xf32, #tpu.memory_space<vmem>>, vector<16x160xf32>
    %c2_98 = arith.constant 2 : index
    %c0_99 = arith.constant 0 : index
    %c0_100 = arith.constant 0 : index
    %128 = vector.load %arg6[%c2_98, %c0_99, %c0_100] : memref<3x160x160xf32, #tpu.memory_space<vmem>>, vector<1x160x160xf32>
    %129 = vector.shape_cast %128 : vector<1x160x160xf32> to vector<160x160xf32>
    %cst_101 = arith.constant dense<0.000000e+00> : vector<16x160xf32>
    %130 = tpu.matmul %127, %129, %cst_101 {dimension_numbers = #tpu.dot_dimension_numbers<[1], [0], [0], [1], [0, 0, 1, 1], [], []>} : vector<16x160xf32>, vector<160x160xf32>, vector<16x160xf32> -> vector<16x160xf32>
    %131 = arith.addf %126, %130 : vector<16x160xf32>
    %c0_102 = arith.constant 0 : index
    %c0_103 = arith.constant 0 : index
    %132 = vector.load %arg7[%c0_102, %c0_103] : memref<1x160xf32, #tpu.memory_space<vmem>>, vector<1x160xf32>
    %133 = vector.broadcast %132 : vector<1x160xf32> to vector<16x160xf32>
    %134 = arith.addf %131, %133 : vector<16x160xf32>
    %cst_104 = arith.constant 5.000000e-01 : f32
    %135 = vector.broadcast %cst_104 : f32 to vector<16x160xf32>
    %136 = arith.mulf %135, %134 : vector<16x160xf32>
    %cst_105 = arith.constant 0.707106769 : f32
    %137 = vector.broadcast %cst_105 : f32 to vector<16x160xf32>
    %138 = arith.mulf %134, %137 : vector<16x160xf32>
    %139 = math.erf %138 : vector<16x160xf32>
    %cst_106 = arith.constant 1.000000e+00 : f32
    %140 = vector.broadcast %cst_106 : f32 to vector<16x160xf32>
    %141 = arith.addf %140, %139 : vector<16x160xf32>
    %142 = arith.mulf %136, %141 : vector<16x160xf32>
    %cst_107 = arith.constant 0.000000e+00 : f32
    %143 = vector.broadcast %cst_107 : f32 to vector<20x160xf32>
    %c0_108 = arith.constant 0 : index
    %c0_109 = arith.constant 0 : index
    %144 = vector.load %arg17[%c0_108, %c0_109] : memref<20x160xf32, #tpu.memory_space<vmem>>, vector<20x160xf32>
    tpu.vector_store %arg17[%c0_108, %c0_109], %143 {strides = array<i32>} : memref<20x160xf32, #tpu.memory_space<vmem>>, vector<20x160xf32>,
    %c2_110 = arith.constant 2 : index
    %c0_111 = arith.constant 0 : index
    %145 = vector.load %arg17[%c2_110, %c0_111] : memref<20x160xf32, #tpu.memory_space<vmem>>, vector<16x160xf32>
    tpu.vector_store %arg17[%c2_110, %c0_111], %142 {strides = array<i32>} : memref<20x160xf32, #tpu.memory_space<vmem>>, vector<16x160xf32>,
    %c2_112 = arith.constant 2 : index
    %c0_113 = arith.constant 0 : index
    %146 = vector.load %arg17[%c2_112, %c0_113] : memref<20x160xf32, #tpu.memory_space<vmem>>, vector<16x160xf32>
    %c4_114 = arith.constant 4 : index
    %c0_115 = arith.constant 0 : index
    %147 = vector.load %arg17[%c4_114, %c0_115] : memref<20x160xf32, #tpu.memory_space<vmem>>, vector<16x160xf32>
    %c0_116 = arith.constant 0 : index
    %c0_117 = arith.constant 0 : index
    %148 = vector.load %arg9[%c0_116, %c0_117] : memref<1x144xf32, #tpu.memory_space<vmem>>, vector<1x144xf32>
    %c0_118 = arith.constant 0 : index
    %c0_119 = arith.constant 0 : index
    %c0_120 = arith.constant 0 : index
    %149 = vector.load %arg8[%c0_118, %c0_119, %c0_120] : memref<3x160x144xf32, #tpu.memory_space<vmem>>, vector<1x160x144xf32>
    %150 = vector.shape_cast %149 : vector<1x160x144xf32> to vector<160x144xf32>
    %cst_121 = arith.constant dense<0.000000e+00> : vector<16x144xf32>
    %151 = tpu.matmul %146, %150, %cst_121 {dimension_numbers = #tpu.dot_dimension_numbers<[1], [0], [0], [1], [0, 0, 1, 1], [], []>} : vector<16x160xf32>, vector<160x144xf32>, vector<16x144xf32> -> vector<16x144xf32>
    %152 = vector.broadcast %148 : vector<1x144xf32> to vector<16x144xf32>
    %153 = arith.addf %151, %152 : vector<16x144xf32>
    %cst_122 = arith.constant 5.000000e-01 : f32
    %154 = vector.broadcast %cst_122 : f32 to vector<16x144xf32>
    %155 = arith.mulf %154, %153 : vector<16x144xf32>
    %cst_123 = arith.constant 0.707106769 : f32
    %156 = vector.broadcast %cst_123 : f32 to vector<16x144xf32>
    %157 = arith.mulf %153, %156 : vector<16x144xf32>
    %158 = math.erf %157 : vector<16x144xf32>
    %cst_124 = arith.constant 1.000000e+00 : f32
    %159 = vector.broadcast %cst_124 : f32 to vector<16x144xf32>
    %160 = arith.addf %159, %158 : vector<16x144xf32>
    %161 = arith.mulf %155, %160 : vector<16x144xf32>
    %c1_125 = arith.constant 1 : index
    %c0_126 = arith.constant 0 : index
    %c0_127 = arith.constant 0 : index
    %162 = vector.load %arg8[%c1_125, %c0_126, %c0_127] : memref<3x160x144xf32, #tpu.memory_space<vmem>>, vector<1x160x144xf32>
    %163 = vector.shape_cast %162 : vector<1x160x144xf32> to vector<160x144xf32>
    %cst_128 = arith.constant dense<0.000000e+00> : vector<16x144xf32>
    %164 = tpu.matmul %146, %163, %cst_128 {dimension_numbers = #tpu.dot_dimension_numbers<[1], [0], [0], [1], [0, 0, 1, 1], [], []>} : vector<16x160xf32>, vector<160x144xf32>, vector<16x144xf32> -> vector<16x144xf32>
    %c2_129 = arith.constant 2 : index
    %c0_130 = arith.constant 0 : index
    %c0_131 = arith.constant 0 : index
    %165 = vector.load %arg8[%c2_129, %c0_130, %c0_131] : memref<3x160x144xf32, #tpu.memory_space<vmem>>, vector<1x160x144xf32>
    %166 = vector.shape_cast %165 : vector<1x160x144xf32> to vector<160x144xf32>
    %cst_132 = arith.constant dense<0.000000e+00> : vector<16x144xf32>
    %167 = tpu.matmul %147, %166, %cst_132 {dimension_numbers = #tpu.dot_dimension_numbers<[1], [0], [0], [1], [0, 0, 1, 1], [], []>} : vector<16x160xf32>, vector<160x144xf32>, vector<16x144xf32> -> vector<16x144xf32>
    %168 = arith.addf %164, %167 : vector<16x144xf32>
    %169 = vector.broadcast %148 : vector<1x144xf32> to vector<16x144xf32>
    %170 = arith.addf %168, %169 : vector<16x144xf32>
    %cst_133 = arith.constant 5.000000e-01 : f32
    %171 = vector.broadcast %cst_133 : f32 to vector<16x144xf32>
    %172 = arith.mulf %171, %170 : vector<16x144xf32>
    %cst_134 = arith.constant 0.707106769 : f32
    %173 = vector.broadcast %cst_134 : f32 to vector<16x144xf32>
    %174 = arith.mulf %170, %173 : vector<16x144xf32>
    %175 = math.erf %174 : vector<16x144xf32>
    %cst_135 = arith.constant 1.000000e+00 : f32
    %176 = vector.broadcast %cst_135 : f32 to vector<16x144xf32>
    %177 = arith.addf %176, %175 : vector<16x144xf32>
    %178 = arith.mulf %172, %177 : vector<16x144xf32>
    %cst_136 = arith.constant 0.000000e+00 : f32
    %179 = vector.broadcast %cst_136 : f32 to vector<36x144xf32>
    %c0_137 = arith.constant 0 : index
    %c0_138 = arith.constant 0 : index
    %180 = vector.load %arg18[%c0_137, %c0_138] : memref<36x144xf32, #tpu.memory_space<vmem>>, vector<36x144xf32>
    tpu.vector_store %arg18[%c0_137, %c0_138], %179 {strides = array<i32>} : memref<36x144xf32, #tpu.memory_space<vmem>>, vector<36x144xf32>,
    %181 = vector.extract_strided_slice %161 {offsets = [0, 0], sizes = [2, 144], strides = [1, 1]} : vector<16x144xf32> to vector<2x144xf32>
    %c2_139 = arith.constant 2 : index
    %c0_140 = arith.constant 0 : index
    %182 = vector.load %arg18[%c2_139, %c0_140] : memref<36x144xf32, #tpu.memory_space<vmem>>, vector<2x144xf32>
    tpu.vector_store %arg18[%c2_139, %c0_140], %181 {strides = array<i32>} : memref<36x144xf32, #tpu.memory_space<vmem>>, vector<2x144xf32>,
    %183 = vector.extract_strided_slice %178 {offsets = [0, 0], sizes = [2, 144], strides = [1, 1]} : vector<16x144xf32> to vector<2x144xf32>
    %c4_141 = arith.constant 4 : index
    %c0_142 = arith.constant 0 : index
    %184 = vector.load %arg18[%c4_141, %c0_142] : memref<36x144xf32, #tpu.memory_space<vmem>>, vector<2x144xf32>
    tpu.vector_store %arg18[%c4_141, %c0_142], %183 {strides = array<i32>} : memref<36x144xf32, #tpu.memory_space<vmem>>, vector<2x144xf32>,
    %185 = vector.extract_strided_slice %161 {offsets = [2, 0], sizes = [2, 144], strides = [1, 1]} : vector<16x144xf32> to vector<2x144xf32>
    %c6_143 = arith.constant 6 : index
    %c0_144 = arith.constant 0 : index
    %186 = vector.load %arg18[%c6_143, %c0_144] : memref<36x144xf32, #tpu.memory_space<vmem>>, vector<2x144xf32>
    tpu.vector_store %arg18[%c6_143, %c0_144], %185 {strides = array<i32>} : memref<36x144xf32, #tpu.memory_space<vmem>>, vector<2x144xf32>,
    %187 = vector.extract_strided_slice %178 {offsets = [2, 0], sizes = [2, 144], strides = [1, 1]} : vector<16x144xf32> to vector<2x144xf32>
    %c8_145 = arith.constant 8 : index
    %c0_146 = arith.constant 0 : index
    %188 = vector.load %arg18[%c8_145, %c0_146] : memref<36x144xf32, #tpu.memory_space<vmem>>, vector<2x144xf32>
    tpu.vector_store %arg18[%c8_145, %c0_146], %187 {strides = array<i32>} : memref<36x144xf32, #tpu.memory_space<vmem>>, vector<2x144xf32>,
    %189 = vector.extract_strided_slice %161 {offsets = [4, 0], sizes = [2, 144], strides = [1, 1]} : vector<16x144xf32> to vector<2x144xf32>
    %c10_147 = arith.constant 10 : index
    %c0_148 = arith.constant 0 : index
    %190 = vector.load %arg18[%c10_147, %c0_148] : memref<36x144xf32, #tpu.memory_space<vmem>>, vector<2x144xf32>
    tpu.vector_store %arg18[%c10_147, %c0_148], %189 {strides = array<i32>} : memref<36x144xf32, #tpu.memory_space<vmem>>, vector<2x144xf32>,
    %191 = vector.extract_strided_slice %178 {offsets = [4, 0], sizes = [2, 144], strides = [1, 1]} : vector<16x144xf32> to vector<2x144xf32>
    %c12_149 = arith.constant 12 : index
    %c0_150 = arith.constant 0 : index
    %192 = vector.load %arg18[%c12_149, %c0_150] : memref<36x144xf32, #tpu.memory_space<vmem>>, vector<2x144xf32>
    tpu.vector_store %arg18[%c12_149, %c0_150], %191 {strides = array<i32>} : memref<36x144xf32, #tpu.memory_space<vmem>>, vector<2x144xf32>,
    %193 = vector.extract_strided_slice %161 {offsets = [6, 0], sizes = [2, 144], strides = [1, 1]} : vector<16x144xf32> to vector<2x144xf32>
    %c14_151 = arith.constant 14 : index
    %c0_152 = arith.constant 0 : index
    %194 = vector.load %arg18[%c14_151, %c0_152] : memref<36x144xf32, #tpu.memory_space<vmem>>, vector<2x144xf32>
    tpu.vector_store %arg18[%c14_151, %c0_152], %193 {strides = array<i32>} : memref<36x144xf32, #tpu.memory_space<vmem>>, vector<2x144xf32>,
    %195 = vector.extract_strided_slice %178 {offsets = [6, 0], sizes = [2, 144], strides = [1, 1]} : vector<16x144xf32> to vector<2x144xf32>
    %c16_153 = arith.constant 16 : index
    %c0_154 = arith.constant 0 : index
    %196 = vector.load %arg18[%c16_153, %c0_154] : memref<36x144xf32, #tpu.memory_space<vmem>>, vector<2x144xf32>
    tpu.vector_store %arg18[%c16_153, %c0_154], %195 {strides = array<i32>} : memref<36x144xf32, #tpu.memory_space<vmem>>, vector<2x144xf32>,
    %197 = vector.extract_strided_slice %161 {offsets = [8, 0], sizes = [2, 144], strides = [1, 1]} : vector<16x144xf32> to vector<2x144xf32>
    %c18 = arith.constant 18 : index
    %c0_155 = arith.constant 0 : index
    %198 = vector.load %arg18[%c18, %c0_155] : memref<36x144xf32, #tpu.memory_space<vmem>>, vector<2x144xf32>
    tpu.vector_store %arg18[%c18, %c0_155], %197 {strides = array<i32>} : memref<36x144xf32, #tpu.memory_space<vmem>>, vector<2x144xf32>,
    %199 = vector.extract_strided_slice %178 {offsets = [8, 0], sizes = [2, 144], strides = [1, 1]} : vector<16x144xf32> to vector<2x144xf32>
    %c20 = arith.constant 20 : index
    %c0_156 = arith.constant 0 : index
    %200 = vector.load %arg18[%c20, %c0_156] : memref<36x144xf32, #tpu.memory_space<vmem>>, vector<2x144xf32>
    tpu.vector_store %arg18[%c20, %c0_156], %199 {strides = array<i32>} : memref<36x144xf32, #tpu.memory_space<vmem>>, vector<2x144xf32>,
    %201 = vector.extract_strided_slice %161 {offsets = [10, 0], sizes = [2, 144], strides = [1, 1]} : vector<16x144xf32> to vector<2x144xf32>
    %c22 = arith.constant 22 : index
    %c0_157 = arith.constant 0 : index
    %202 = vector.load %arg18[%c22, %c0_157] : memref<36x144xf32, #tpu.memory_space<vmem>>, vector<2x144xf32>
    tpu.vector_store %arg18[%c22, %c0_157], %201 {strides = array<i32>} : memref<36x144xf32, #tpu.memory_space<vmem>>, vector<2x144xf32>,
    %203 = vector.extract_strided_slice %178 {offsets = [10, 0], sizes = [2, 144], strides = [1, 1]} : vector<16x144xf32> to vector<2x144xf32>
    %c24 = arith.constant 24 : index
    %c0_158 = arith.constant 0 : index
    %204 = vector.load %arg18[%c24, %c0_158] : memref<36x144xf32, #tpu.memory_space<vmem>>, vector<2x144xf32>
    tpu.vector_store %arg18[%c24, %c0_158], %203 {strides = array<i32>} : memref<36x144xf32, #tpu.memory_space<vmem>>, vector<2x144xf32>,
    %205 = vector.extract_strided_slice %161 {offsets = [12, 0], sizes = [2, 144], strides = [1, 1]} : vector<16x144xf32> to vector<2x144xf32>
    %c26 = arith.constant 26 : index
    %c0_159 = arith.constant 0 : index
    %206 = vector.load %arg18[%c26, %c0_159] : memref<36x144xf32, #tpu.memory_space<vmem>>, vector<2x144xf32>
    tpu.vector_store %arg18[%c26, %c0_159], %205 {strides = array<i32>} : memref<36x144xf32, #tpu.memory_space<vmem>>, vector<2x144xf32>,
    %207 = vector.extract_strided_slice %178 {offsets = [12, 0], sizes = [2, 144], strides = [1, 1]} : vector<16x144xf32> to vector<2x144xf32>
    %c28 = arith.constant 28 : index
    %c0_160 = arith.constant 0 : index
    %208 = vector.load %arg18[%c28, %c0_160] : memref<36x144xf32, #tpu.memory_space<vmem>>, vector<2x144xf32>
    tpu.vector_store %arg18[%c28, %c0_160], %207 {strides = array<i32>} : memref<36x144xf32, #tpu.memory_space<vmem>>, vector<2x144xf32>,
    %209 = vector.extract_strided_slice %161 {offsets = [14, 0], sizes = [2, 144], strides = [1, 1]} : vector<16x144xf32> to vector<2x144xf32>
    %c30 = arith.constant 30 : index
    %c0_161 = arith.constant 0 : index
    %210 = vector.load %arg18[%c30, %c0_161] : memref<36x144xf32, #tpu.memory_space<vmem>>, vector<2x144xf32>
    tpu.vector_store %arg18[%c30, %c0_161], %209 {strides = array<i32>} : memref<36x144xf32, #tpu.memory_space<vmem>>, vector<2x144xf32>,
    %211 = vector.extract_strided_slice %178 {offsets = [14, 0], sizes = [2, 144], strides = [1, 1]} : vector<16x144xf32> to vector<2x144xf32>
    %c32 = arith.constant 32 : index
    %c0_162 = arith.constant 0 : index
    %212 = vector.load %arg18[%c32, %c0_162] : memref<36x144xf32, #tpu.memory_space<vmem>>, vector<2x144xf32>
    tpu.vector_store %arg18[%c32, %c0_162], %211 {strides = array<i32>} : memref<36x144xf32, #tpu.memory_space<vmem>>, vector<2x144xf32>,
    %c0_163 = arith.constant 0 : index
    %c0_164 = arith.constant 0 : index
    %213 = vector.load %arg18[%c0_163, %c0_164] : memref<36x144xf32, #tpu.memory_space<vmem>>, vector<32x144xf32>
    %c0_165 = arith.constant 0 : index
    %c0_166 = arith.constant 0 : index
    %c0_167 = arith.constant 0 : index
    %214 = vector.load %arg10[%c0_165, %c0_166, %c0_167] : memref<3x144x144xf32, #tpu.memory_space<vmem>>, vector<1x144x144xf32>
    %215 = vector.shape_cast %214 : vector<1x144x144xf32> to vector<144x144xf32>
    %cst_168 = arith.constant dense<0.000000e+00> : vector<32x144xf32>
    %216 = tpu.matmul %213, %215, %cst_168 {dimension_numbers = #tpu.dot_dimension_numbers<[1], [0], [0], [1], [0, 0, 1, 1], [], []>} : vector<32x144xf32>, vector<144x144xf32>, vector<32x144xf32> -> vector<32x144xf32>
    %c2_169 = arith.constant 2 : index
    %c0_170 = arith.constant 0 : index
    %217 = vector.load %arg18[%c2_169, %c0_170] : memref<36x144xf32, #tpu.memory_space<vmem>>, vector<32x144xf32>
    %c1_171 = arith.constant 1 : index
    %c0_172 = arith.constant 0 : index
    %c0_173 = arith.constant 0 : index
    %218 = vector.load %arg10[%c1_171, %c0_172, %c0_173] : memref<3x144x144xf32, #tpu.memory_space<vmem>>, vector<1x144x144xf32>
    %219 = vector.shape_cast %218 : vector<1x144x144xf32> to vector<144x144xf32>
    %cst_174 = arith.constant dense<0.000000e+00> : vector<32x144xf32>
    %220 = tpu.matmul %217, %219, %cst_174 {dimension_numbers = #tpu.dot_dimension_numbers<[1], [0], [0], [1], [0, 0, 1, 1], [], []>} : vector<32x144xf32>, vector<144x144xf32>, vector<32x144xf32> -> vector<32x144xf32>
    %221 = arith.addf %216, %220 : vector<32x144xf32>
    %c4_175 = arith.constant 4 : index
    %c0_176 = arith.constant 0 : index
    %222 = vector.load %arg18[%c4_175, %c0_176] : memref<36x144xf32, #tpu.memory_space<vmem>>, vector<32x144xf32>
    %c2_177 = arith.constant 2 : index
    %c0_178 = arith.constant 0 : index
    %c0_179 = arith.constant 0 : index
    %223 = vector.load %arg10[%c2_177, %c0_178, %c0_179] : memref<3x144x144xf32, #tpu.memory_space<vmem>>, vector<1x144x144xf32>
    %224 = vector.shape_cast %223 : vector<1x144x144xf32> to vector<144x144xf32>
    %cst_180 = arith.constant dense<0.000000e+00> : vector<32x144xf32>
    %225 = tpu.matmul %222, %224, %cst_180 {dimension_numbers = #tpu.dot_dimension_numbers<[1], [0], [0], [1], [0, 0, 1, 1], [], []>} : vector<32x144xf32>, vector<144x144xf32>, vector<32x144xf32> -> vector<32x144xf32>
    %226 = arith.addf %221, %225 : vector<32x144xf32>
    %c0_181 = arith.constant 0 : index
    %c0_182 = arith.constant 0 : index
    %227 = vector.load %arg11[%c0_181, %c0_182] : memref<1x144xf32, #tpu.memory_space<vmem>>, vector<1x144xf32>
    %228 = vector.broadcast %227 : vector<1x144xf32> to vector<32x144xf32>
    %229 = arith.addf %226, %228 : vector<32x144xf32>
    %cst_183 = arith.constant 5.000000e-01 : f32
    %230 = vector.broadcast %cst_183 : f32 to vector<32x144xf32>
    %231 = arith.mulf %230, %229 : vector<32x144xf32>
    %cst_184 = arith.constant 0.707106769 : f32
    %232 = vector.broadcast %cst_184 : f32 to vector<32x144xf32>
    %233 = arith.mulf %229, %232 : vector<32x144xf32>
    %234 = math.erf %233 : vector<32x144xf32>
    %cst_185 = arith.constant 1.000000e+00 : f32
    %235 = vector.broadcast %cst_185 : f32 to vector<32x144xf32>
    %236 = arith.addf %235, %234 : vector<32x144xf32>
    %237 = arith.mulf %231, %236 : vector<32x144xf32>
    %cst_186 = arith.constant 0.000000e+00 : f32
    %238 = vector.broadcast %cst_186 : f32 to vector<36x144xf32>
    %c0_187 = arith.constant 0 : index
    %c0_188 = arith.constant 0 : index
    %239 = vector.load %arg19[%c0_187, %c0_188] : memref<36x144xf32, #tpu.memory_space<vmem>>, vector<36x144xf32>
    tpu.vector_store %arg19[%c0_187, %c0_188], %238 {strides = array<i32>} : memref<36x144xf32, #tpu.memory_space<vmem>>, vector<36x144xf32>,
    %c2_189 = arith.constant 2 : index
    %c0_190 = arith.constant 0 : index
    %240 = vector.load %arg19[%c2_189, %c0_190] : memref<36x144xf32, #tpu.memory_space<vmem>>, vector<32x144xf32>
    tpu.vector_store %arg19[%c2_189, %c0_190], %237 {strides = array<i32>} : memref<36x144xf32, #tpu.memory_space<vmem>>, vector<32x144xf32>,
    %c2_191 = arith.constant 2 : index
    %c0_192 = arith.constant 0 : index
    %241 = vector.load %arg19[%c2_191, %c0_192] : memref<36x144xf32, #tpu.memory_space<vmem>>, vector<32x144xf32>
    %c4_193 = arith.constant 4 : index
    %c0_194 = arith.constant 0 : index
    %242 = vector.load %arg19[%c4_193, %c0_194] : memref<36x144xf32, #tpu.memory_space<vmem>>, vector<32x144xf32>
    %c0_195 = arith.constant 0 : index
    %c0_196 = arith.constant 0 : index
    %243 = vector.load %arg13[%c0_195, %c0_196] : memref<1x128xf32, #tpu.memory_space<vmem>>, vector<1x128xf32>
    %c0_197 = arith.constant 0 : index
    %c0_198 = arith.constant 0 : index
    %c0_199 = arith.constant 0 : index
    %244 = vector.load %arg12[%c0_197, %c0_198, %c0_199] : memref<3x144x128xf32, #tpu.memory_space<vmem>>, vector<1x144x128xf32>
    %245 = vector.shape_cast %244 : vector<1x144x128xf32> to vector<144x128xf32>
    %cst_200 = arith.constant dense<0.000000e+00> : vector<32x128xf32>
    %246 = tpu.matmul %241, %245, %cst_200 {dimension_numbers = #tpu.dot_dimension_numbers<[1], [0], [0], [1], [0, 0, 1, 1], [], []>} : vector<32x144xf32>, vector<144x128xf32>, vector<32x128xf32> -> vector<32x128xf32>
    %247 = vector.broadcast %243 : vector<1x128xf32> to vector<32x128xf32>
    %248 = arith.addf %246, %247 : vector<32x128xf32>
    %249 = math.tanh %248 : vector<32x128xf32>
    %c1_201 = arith.constant 1 : index
    %c0_202 = arith.constant 0 : index
    %c0_203 = arith.constant 0 : index
    %250 = vector.load %arg12[%c1_201, %c0_202, %c0_203] : memref<3x144x128xf32, #tpu.memory_space<vmem>>, vector<1x144x128xf32>
    %251 = vector.shape_cast %250 : vector<1x144x128xf32> to vector<144x128xf32>
    %cst_204 = arith.constant dense<0.000000e+00> : vector<32x128xf32>
    %252 = tpu.matmul %241, %251, %cst_204 {dimension_numbers = #tpu.dot_dimension_numbers<[1], [0], [0], [1], [0, 0, 1, 1], [], []>} : vector<32x144xf32>, vector<144x128xf32>, vector<32x128xf32> -> vector<32x128xf32>
    %c2_205 = arith.constant 2 : index
    %c0_206 = arith.constant 0 : index
    %c0_207 = arith.constant 0 : index
    %253 = vector.load %arg12[%c2_205, %c0_206, %c0_207] : memref<3x144x128xf32, #tpu.memory_space<vmem>>, vector<1x144x128xf32>
    %254 = vector.shape_cast %253 : vector<1x144x128xf32> to vector<144x128xf32>
    %cst_208 = arith.constant dense<0.000000e+00> : vector<32x128xf32>
    %255 = tpu.matmul %242, %254, %cst_208 {dimension_numbers = #tpu.dot_dimension_numbers<[1], [0], [0], [1], [0, 0, 1, 1], [], []>} : vector<32x144xf32>, vector<144x128xf32>, vector<32x128xf32> -> vector<32x128xf32>
    %256 = arith.addf %252, %255 : vector<32x128xf32>
    %257 = vector.broadcast %243 : vector<1x128xf32> to vector<32x128xf32>
    %258 = arith.addf %256, %257 : vector<32x128xf32>
    %259 = math.tanh %258 : vector<32x128xf32>
    %c0_209 = arith.constant 0 : index
    %c0_210 = arith.constant 0 : index
    %260 = vector.load %arg14[%c0_209, %c0_210] : memref<64x128xf32, #tpu.memory_space<vmem>>, vector<32x128xf32>
    tpu.vector_store %arg14[%c0_209, %c0_210], %249 {strides = array<i32>} : memref<64x128xf32, #tpu.memory_space<vmem>>, vector<32x128xf32>,
    %c32_211 = arith.constant 32 : index
    %c0_212 = arith.constant 0 : index
    %261 = vector.load %arg14[%c32_211, %c0_212] : memref<64x128xf32, #tpu.memory_space<vmem>>, vector<32x128xf32>
    tpu.vector_store %arg14[%c32_211, %c0_212], %259 {strides = array<i32>} : memref<64x128xf32, #tpu.memory_space<vmem>>, vector<32x128xf32>,
    return
  }
  func.func @transform_0(%arg0: i32) -> (i32, i32) {
    %c0_i32 = arith.constant 0 : i32
    %c0_i32_0 = arith.constant 0 : i32
    %c0_i32_1 = arith.constant 0 : i32
    return %c0_i32, %c0_i32_0 : i32, i32
  }
  func.func @transform_1(%arg0: i32) -> (i32, i32, i32) {
    %c0_i32 = arith.constant 0 : i32
    %c0_i32_0 = arith.constant 0 : i32
    %c0_i32_1 = arith.constant 0 : i32
    %c0_i32_2 = arith.constant 0 : i32
    return %c0_i32, %c0_i32_0, %c0_i32_1 : i32, i32, i32
  }
  func.func @transform_2(%arg0: i32) -> (i32, i32, i32) {
    %c0_i32 = arith.constant 0 : i32
    %c0_i32_0 = arith.constant 0 : i32
    %c0_i32_1 = arith.constant 0 : i32
    %c0_i32_2 = arith.constant 0 : i32
    return %c0_i32, %c0_i32_0, %c0_i32_1 : i32, i32, i32
  }
  func.func @transform_3(%arg0: i32) -> (i32, i32, i32) {
    %c0_i32 = arith.constant 0 : i32
    %c0_i32_0 = arith.constant 0 : i32
    %c0_i32_1 = arith.constant 0 : i32
    %c0_i32_2 = arith.constant 0 : i32
    return %c0_i32, %c0_i32_0, %c0_i32_1 : i32, i32, i32
  }
  func.func @transform_4(%arg0: i32) -> (i32, i32) {
    %c0_i32 = arith.constant 0 : i32
    %c0_i32_0 = arith.constant 0 : i32
    %c0_i32_1 = arith.constant 0 : i32
    return %c0_i32, %c0_i32_0 : i32, i32
  }
  func.func @transform_5(%arg0: i32) -> (i32, i32, i32) {
    %c0_i32 = arith.constant 0 : i32
    %c0_i32_0 = arith.constant 0 : i32
    %c0_i32_1 = arith.constant 0 : i32
    %c0_i32_2 = arith.constant 0 : i32
    return %c0_i32, %c0_i32_0, %c0_i32_1 : i32, i32, i32
  }
  func.func @transform_6(%arg0: i32) -> (i32, i32) {
    %c0_i32 = arith.constant 0 : i32
    %c0_i32_0 = arith.constant 0 : i32
    %c0_i32_1 = arith.constant 0 : i32
    return %c0_i32, %c0_i32_0 : i32, i32
  }
  func.func @transform_7(%arg0: i32) -> (i32, i32, i32) {
    %c0_i32 = arith.constant 0 : i32
    %c0_i32_0 = arith.constant 0 : i32
    %c0_i32_1 = arith.constant 0 : i32
    %c0_i32_2 = arith.constant 0 : i32
    return %c0_i32, %c0_i32_0, %c0_i32_1 : i32, i32, i32
  }
  func.func @transform_8(%arg0: i32) -> (i32, i32) {
    %c0_i32 = arith.constant 0 : i32
    %c0_i32_0 = arith.constant 0 : i32
    %c0_i32_1 = arith.constant 0 : i32
    return %c0_i32, %c0_i32_0 : i32, i32
  }
  func.func @transform_9(%arg0: i32) -> (i32, i32, i32) {
    %c0_i32 = arith.constant 0 : i32
    %c0_i32_0 = arith.constant 0 : i32
    %c0_i32_1 = arith.constant 0 : i32
    %c0_i32_2 = arith.constant 0 : i32
    return %c0_i32, %c0_i32_0, %c0_i32_1 : i32, i32, i32
  }
  func.func @transform_10(%arg0: i32) -> (i32, i32) {
    %c0_i32 = arith.constant 0 : i32
    %c0_i32_0 = arith.constant 0 : i32
    %c0_i32_1 = arith.constant 0 : i32
    return %c0_i32, %c0_i32_0 : i32, i32
  }
  func.func @transform_11(%arg0: i32) -> (i32, i32, i32) {
    %c0_i32 = arith.constant 0 : i32
    %c0_i32_0 = arith.constant 0 : i32
    %c0_i32_1 = arith.constant 0 : i32
    %c0_i32_2 = arith.constant 0 : i32
    return %c0_i32, %c0_i32_0, %c0_i32_1 : i32, i32, i32
  }
  func.func @transform_12(%arg0: i32) -> (i32, i32) {
    %c0_i32 = arith.constant 0 : i32
    %c0_i32_0 = arith.constant 0 : i32
    %c0_i32_1 = arith.constant 0 : i32
    return %c0_i32, %c0_i32_0 : i32, i32
  }
  func.func @transform_13(%arg0: i32) -> (i32, i32) {
    %c0_i32 = arith.constant 0 : i32
    %c0_i32_0 = arith.constant 0 : i32
    %c0_i32_1 = arith.constant 0 : i32
    return %c0_i32, %c0_i32_0 : i32, i32
  }
}

</mosaic_0001>

<bundles_post_ra>
// kernel: decoder_forward.1
= control target key start
LH: loop header
LB: loop body
LE: loop exit
PB: predicated region body
PF: predicated region fallthrough
CT: control target
= control target key end

     0   :  { %18 = vsyncpa [#allocation8], 0  ;;  %s3391_s25 = smov [#allocation7]   ;;  %s5200_s0 = inlined_call_operand.vmem [shape: f32[2,32], index: 0, kind: input, shape index: {}]   ;;  %s5201_s1 = inlined_call_operand.vmem [shape: f32[4,32,96], index: 1, kind: input, shape index: {}]   ;;  %s5202_s2 = inlined_call_operand.vmem [shape: f32[4,1,96], index: 2, kind: input, shape index: {}]   ;;  %s5203_s3 = inlined_call_operand.vmem [shape: f32[3,96,160], index: 3, kind: input, shape index: {}]   ;;  %s5204_s4 = inlined_call_operand.vmem [shape: f32[1,160], index: 4, kind: input, shape index: {}]   ;;  %s5205_s5 = inlined_call_operand.vmem [shape: f32[3,160,160], index: 5, kind: input, shape index: {}]   ;;  %s5206_s6 = inlined_call_operand.vmem [shape: f32[1,160], index: 6, kind: input, shape index: {}]   ;;  %s5207_s7 = inlined_call_operand.vmem [shape: f32[3,160,144], index: 7, kind: input, shape index: {}]   ;;  %s5208_s8 = inlined_call_operand.vmem [shape: f32[1,144], index: 8, kind: input, shape index: {}]   ;;  %s5209_s9 = inlined_call_operand.vmem [shape: f32[3,144,144], index: 9, kind: input, shape index: {}]   ;;  %s5210_s10 = inlined_call_operand.vmem [shape: f32[1,144], index: 10, kind: input, shape index: {}]   ;;  %s5211_s11 = inlined_call_operand.hbm [shape: f32[3,144,128], index: 11, kind: input, shape index: {}]   ;;  %s5212_s12 = inlined_call_operand.vmem [shape: f32[1,128], index: 12, kind: input, shape index: {}]   ;;  %s5213_s13 = inlined_call_operand.vmem [shape: f32[64,128], index: 13, kind: output, shape index: {}]  }
   0x1   :  { %s46_s26 = sshll.u32 %s3391_s25, 4  ;;  %s47_s26 = int_to_ptr.vmem [resolvable:$true] %s46_s26 }
   0x2   :  { %s3377_s27 = scalar_lea.vmem %s47_s26, 6912  ;;  %p3382_p1 = scmp.lt.s32.totalorder %s47_s26, %s47_s26 }
   0x3   :  { %p3378_p0 = scmp.ne.s32.totalorder %s47_s26, %s3377_s27  ;;  %p3383_p2 = scmp.lt.s32.totalorder %s3377_s27, %s3377_s27 }
   0x5   :  { %p3384_p3 = por %p3383_p2, %p3382_p1 }
   0x7   :  { %p3385_p4 = pnand %p3384_p3, %p3378_p0 }
   0x9   :  { %3388 = shalt.err (!%p3385_p4)
}
   0xa   :  { %s3392_s28 = smov 128   ;;  %s3393_s29 = smov 8  }
   0xb   :  { %52 = dma.hbm_to_vmem [thread:$0]  %s5211_s11, 6912, %s47_s26, [#allocation8], %s3392_s28, %s3392_s28, %s3393_s29  }
   0xc   :  { %3389 = dma.done.wait [#allocation8], 6912  }
   0xd   :  { %3390 = vsyncadd [#allocation8], 4294960384  ;;  %vm74_vm0 = vcmask 261120   ;;  %v3394_v0 = vmov 0.0   ;;  %vm3395_vm1 = vmmov 0   ;;  %v66_v1 = vld [vmem:[%s5201_s1 + $0x18] sm:$0xff] }
   0xe   :  { %3246 = vmatprep.subr.mxu1 %v3394_v0  ;;  %751 = vst [vmem:[#allocation3] sm:$0xff] %v3394_v0  ;;  %753 = vst [vmem:[#allocation3 + $0x10] sm:$0xff] %v3394_v0  ;;  %3268 = vmatprep.subr.mxu0 %v3394_v0  ;;  %v2895_v2 = vld [vmem:[%s5201_s1 + $0x58] sm:$0xff]  ;;  %v65_v3 = vld [vmem:[%s5201_s1 + $0x10] sm:$0xff]  ;;  %vm59_vm2 = vcmask 785408   ;;  %vm61_vm3 = vcmask 781312  }
   0xf   :  { %755 = vst [vmem:[#allocation3 + $0x20] sm:$0xf] %v3394_v0  ;;  %1260 = vst [vmem:[#allocation4] sm:$0xff] %v3394_v0  ;;  %3254 = vmatprep.mubr.msk.f32.mxu1 %vm3395_vm1, %v3394_v0  ;;  %3276 = vmatprep.mubr.msk.f32.mxu0 %vm3395_vm1, %v3394_v0  ;;  %v2894_v4 = vld [vmem:[%s5201_s1 + $0x50] sm:$0xff]  ;;  %v64_v5 = vld [vmem:[%s5201_s1 + $0x8] sm:$0xff]  ;;  %vm153_vm4 = vcmask 779264  }
  0x10   :  { %1264 = vst [vmem:[#allocation4 + $0x20] sm:$0xf] %v3394_v0  ;;  %1751 = vst [vmem:[#allocation5] sm:$0xff] %v3394_v0  ;;  %3247 = vmatpush3.msra.mxu1 %v66_v1  ;;  %3269 = vmatpush3.msra.mxu0 %v2895_v2  ;;  %v2893_v6 = vld [vmem:[%s5201_s1 + $0x48] sm:$0xff]  ;;  %v63_v7 = vld [vmem:[%s5201_s1] sm:$0xff]  ;;  %vm756_vm5 = vcmask 257024  }
  0x11   :  { %1754 = vst [vmem:[#allocation5 + $0x10] sm:$0xff] %v3394_v0  ;;  %1756 = vst [vmem:[#allocation5 + $0x20] sm:$0xff] %v3394_v0  ;;  %3248 = vmatprep.subr.mxu1 %v3394_v0  ;;  %3270 = vmatprep.subr.mxu0 %v3394_v0  ;;  %v2892_v8 = vld [vmem:[%s5201_s1 + $0x40] sm:$0xff]  ;;  %v2888_v10 = vld [vmem:[%s5201_s1 + $0x38] sm:$0xff]  ;;  %vm781_vm6 = vcmask 261126   ;;  %vm765_vm7 = vcmask 257026  }
  0x12   :  { %1758 = vst [vmem:[#allocation5 + $0x30] sm:$0xff] %v3394_v0  ;;  %1760 = vst [vmem:[#allocation5 + $0x40] sm:$0xf] %v3394_v0  ;;  %3249 = vmatpush3.msra.mxu1 %v65_v3  ;;  %3271 = vmatpush3.msra.mxu0 %v2894_v4  ;;  %v58_v9 = vld [vmem:[%s5200_s0] sm:$0x3]  ;;  %v2887_v11 = vld [vmem:[%s5201_s1 + $0x30] sm:$0xff] }
  0x13   :  { %2399 = vst [vmem:[#allocation6] sm:$0xff] %v3394_v0  ;;  %2407 = vst [vmem:[#allocation6 + $0x40] sm:$0xf] %v3394_v0  ;;  %3250 = vmatprep.subr.mxu1 %v3394_v0  ;;  %3272 = vmatprep.subr.mxu0 %v3394_v0  ;;  %v2886_v12 = vld [vmem:[%s5201_s1 + $0x28] sm:$0xff]  ;;  %v2885_v13 = vld [vmem:[%s5201_s1 + $0x20] sm:$0xff]  ;;  %vm774_vm8 = vcmask 259076  }
  0x14   :  { %752 = vst.msk [vmem:[#allocation3 + $0x8] sm:$0xff] %vm74_vm0, %v3394_v0  ;;  %754 = vst.msk [vmem:[#allocation3 + $0x18] sm:$0xff] %vm74_vm0, %v3394_v0  ;;  %3251 = vmatpush3.msra.mxu1 %v64_v5  ;;  %3273 = vmatpush3.msra.mxu0 %v2893_v6  ;;  %v2902_v14 = vld [vmem:[%s5201_s1 + $0x78] sm:$0xff]  ;;  %v2901_v15 = vld [vmem:[%s5201_s1 + $0x70] sm:$0xff]  ;;  %vm788_vm9 = vcmask 254976   ;;  %vm901_vm10 = vcmask 1045504  }
  0x15   :  { %1261 = vst.msk [vmem:[#allocation4 + $0x8] sm:$0xff] %vm74_vm0, %v3394_v0  ;;  %1263 = vst.msk [vmem:[#allocation4 + $0x18] sm:$0xff] %vm74_vm0, %v3394_v0  ;;  %3252 = vmatprep.subr.mxu1 %v3394_v0  ;;  %3274 = vmatprep.subr.mxu0 %v3394_v0  ;;  %v2900_v16 = vld [vmem:[%s5201_s1 + $0x68] sm:$0xff]  ;;  %v2899_v17 = vld [vmem:[%s5201_s1 + $0x60] sm:$0xff]  ;;  %vm1126_vm11 = vcmask 1043456   ;;  %vm1284_vm12 = vcmask 261122  }
  0x16   :  { %3253 = vmatpush3.msra.mxu1 %v63_v7  ;;  %3275 = vmatpush3.msra.mxu0 %v2892_v8  ;;  %v448_v18 = vld [vmem:[%s5203_s3 + $0xb8] sm:$0xff]  ;;  %v447_v19 = vld [vmem:[%s5203_s3 + $0xb0] sm:$0xff]  ;;  %60 = vst.msk [vmem:[#allocation2] sm:$0xff] %vm59_vm2, %v3394_v0  ;;  %v446_v21 = vld [vmem:[%s5203_s3 + $0xa8] sm:$0xff]  ;;  %vm1270_vm13 = vcmask 1041408   ;;  %vm1752_vm14 = vcmask 130048  }
  0x17   :  { %3255 = vmatmul.mubr.msk.f32.vlgmr.msra.gmra.mxu1 %vm74_vm0, %v58_v9  ;;  %3257 = vmatprep.subr.mxu1 %v3394_v0  ;;  %v2954_v20 = vld [vmem:[%s5203_s3 + $0x238] sm:$0xff]  ;;  %v2953_v22 = vld [vmem:[%s5203_s3 + $0x230] sm:$0xff]  ;;  %v445_v23 = vld [vmem:[%s5203_s3 + $0xa0] sm:$0xff]  ;;  %62 = vst.msk [vmem:[#allocation2 + $0x8] sm:$0xf] %vm61_vm3, %v3394_v0  ;;  %vm1761_vm15 = vcmask 125952  }
  0x18   :  { %3277 = vmatmul.mubr.msk.f32.vlgmr.msra.gmra.mxu0 %vm74_vm0, %v58_v9  ;;  %3258 = vmatpush3.msra.mxu1 %v2888_v10  ;;  %v2952_v24 = vld [vmem:[%s5203_s3 + $0x228] sm:$0xff]  ;;  %v444_v25 = vld [vmem:[%s5203_s3 + $0x98] sm:$0xff]  ;;  %v2951_v26 = vld [vmem:[%s5203_s3 + $0x220] sm:$0xff]  ;;  %757 = vst.msk [vmem:[#allocation3 + $0x28] sm:$0xf] %vm756_vm5, %v3394_v0  ;;  %vm1793_vm3 = vcmask 123904  }
  0x19   :  { %3259 = vmatprep.subr.mxu1 %v3394_v0  ;;  %3265 = vmatprep.mubr.msk.f32.mxu1 %vm3395_vm1, %v3394_v0  ;;  %v443_v27 = vld [vmem:[%s5203_s3 + $0x90] sm:$0xff]  ;;  %v2950_v28 = vld [vmem:[%s5203_s3 + $0x218] sm:$0xff]  ;;  %v442_v29 = vld [vmem:[%s5203_s3 + $0x88] sm:$0xff]  ;;  %1265 = vst.msk [vmem:[#allocation4 + $0x28] sm:$0xf] %vm756_vm5, %v3394_v0 }
  0x1a   :  { %3260 = vmatpush3.msra.mxu1 %v2887_v11  ;;  %527 = vmatprep.mubr.f32.mxu0 %v3394_v0  ;;  %v2949_v30 = vld [vmem:[%s5203_s3 + $0x210] sm:$0xff]  ;;  %v441_v31 = vld [vmem:[%s5203_s3 + $0x80] sm:$0xff]  ;;  %v2948_v32 = vld [vmem:[%s5203_s3 + $0x208] sm:$0xff] }
  0x1b   :  { %3261 = vmatprep.subr.mxu1 %v3394_v0  ;;  %471 = vmatprep.subr.mxu0 %v448_v18  ;;  %v440_v33 = vld [vmem:[%s5203_s3 + $0x78] sm:$0xff]  ;;  %v2947_v34 = vld [vmem:[%s5203_s3 + $0x200] sm:$0xff]  ;;  %v439_v35 = vld [vmem:[%s5203_s3 + $0x70] sm:$0xff] }
  0x1c   :  { %3262 = vmatpush3.msra.mxu1 %v2886_v12  ;;  %472 = vmatpush1.msra.mxu0 %v447_v19  ;;  %v2946_v36 = vld [vmem:[%s5203_s3 + $0x1f8] sm:$0xff]  ;;  %v438_v37 = vld [vmem:[%s5203_s3 + $0x68] sm:$0xff]  ;;  %v2945_v38 = vld [vmem:[%s5203_s3 + $0x1f0] sm:$0xff] }
  0x1d   :  { %3263 = vmatprep.subr.mxu1 %v3394_v0  ;;  %473 = vmatprep.subr.mxu0 %v446_v21  ;;  %v437_v39 = vld [vmem:[%s5203_s3 + $0x60] sm:$0xff]  ;;  %v2944_v40 = vld [vmem:[%s5203_s3 + $0x1e8] sm:$0xff]  ;;  %v436_v41 = vld [vmem:[%s5203_s3 + $0x58] sm:$0xff] }
  0x1e   :  { %3264 = vmatpush3.msra.mxu1 %v2885_v13  ;;  %474 = vmatpush1.msra.mxu0 %v445_v23  ;;  %v2943_v42 = vld [vmem:[%s5203_s3 + $0x1e0] sm:$0xff]  ;;  %v435_v43 = vld [vmem:[%s5203_s3 + $0x50] sm:$0xff]  ;;  %v2942_v44 = vld [vmem:[%s5203_s3 + $0x1d8] sm:$0xff] }
  0x1f   :  { %3266 = vmatmul.mubr.msk.f32.vlgmr.msra.gmra.mxu1 %vm74_vm0, %v58_v9  ;;  %3279 = vmatprep.subr.mxu1 %v3394_v0  ;;  %v434_v45 = vld [vmem:[%s5203_s3 + $0x48] sm:$0xff]  ;;  %v2941_v46 = vld [vmem:[%s5203_s3 + $0x1d0] sm:$0xff]  ;;  %v433_v47 = vld [vmem:[%s5203_s3 + $0x40] sm:$0xff] }
  0x20   :  { %3280 = vmatpush3.msra.mxu1 %v2902_v14  ;;  %3287 = vmatprep.mubr.msk.f32.mxu1 %vm3395_vm1, %v3394_v0  ;;  %v2940_v48 = vld [vmem:[%s5203_s3 + $0x1c8] sm:$0xff]  ;;  %v432_v49 = vld [vmem:[%s5203_s3 + $0x38] sm:$0xff]  ;;  %v2939_v50 = vld [vmem:[%s5203_s3 + $0x1c0] sm:$0xff]  ;;  %vm1770_vm1 = vcmask 125954  }
  0x21   :  { %3281 = vmatprep.subr.mxu1 %v3394_v0  ;;  %475 = vmatprep.subr.mxu0 %v444_v25  ;;  %v431_v51 = vld [vmem:[%s5203_s3 + $0x30] sm:$0xff]  ;;  %v2938_v52 = vld [vmem:[%s5203_s3 + $0x1b8] sm:$0xff]  ;;  %v430_v53 = vld [vmem:[%s5203_s3 + $0x28] sm:$0xff] }
  0x22   :  { %3282 = vmatpush3.msra.mxu1 %v2901_v15  ;;  %476 = vmatpush1.msra.mxu0 %v443_v27  ;;  %v2937_v54 = vld [vmem:[%s5203_s3 + $0x1b0] sm:$0xff]  ;;  %v429_v55 = vld [vmem:[%s5203_s3 + $0x20] sm:$0xff]  ;;  %v2936_v56 = vld [vmem:[%s5203_s3 + $0x1a8] sm:$0xff] }
  0x23   :  { %3283 = vmatprep.subr.mxu1 %v3394_v0  ;;  %477 = vmatprep.subr.mxu0 %v442_v29  ;;  %v428_v57 = vld [vmem:[%s5203_s3 + $0x18] sm:$0xff]  ;;  %v2935_v58 = vld [vmem:[%s5203_s3 + $0x1a0] sm:$0xff]  ;;  %v427_v59 = vld [vmem:[%s5203_s3 + $0x10] sm:$0xff] }
  0x24   :  { %3284 = vmatpush3.msra.mxu1 %v2900_v16  ;;  %478 = vmatpush1.msra.mxu0 %v441_v31  ;;  %v2934_v60 = vld [vmem:[%s5203_s3 + $0x198] sm:$0xff]  ;;  %v426_v61 = vld [vmem:[%s5203_s3 + $0x8] sm:$0xff]  ;;  %v2933_v62 = vld [vmem:[%s5203_s3 + $0x190] sm:$0xff] }
  0x25   :  { %3285 = vmatprep.subr.mxu1 %v3394_v0  ;;  %479 = vmatprep.subr.mxu0 %v440_v33  ;;  %v425_v63 = vld [vmem:[%s5203_s3] sm:$0xff]  ;;  %v2932_v1 = vld [vmem:[%s5203_s3 + $0x188] sm:$0xff]  ;;  %v2930_v3 = vld [vmem:[%s5203_s3 + $0x178] sm:$0xff] }
  0x26   :  { %3286 = vmatpush3.msra.mxu1 %v2899_v17  ;;  %480 = vmatpush1.msra.mxu0 %v439_v35  ;;  %v2931_v2 = vld [vmem:[%s5203_s3 + $0x180] sm:$0xff] }
  0x27   :  { %3288 = vmatmul.mubr.msk.f32.vlgmr.msra.gmra.mxu1 %vm74_vm0, %v58_v9  ;;  %605 = vmatprep.subr.mxu1 %v2954_v20  ;;  %v2883_v4 = vld [vmem:[%s5202_s2] ss:$0 sm:$0xff]  ;;  %v2897_v5 = vld [vmem:[%s5202_s2 + $0x2] ss:$0 sm:$0xff]  ;;  %v2890_v14 = vld [vmem:[%s5202_s2 + $0x1] ss:$0 sm:$0xff] }
  0x28   :  { %661 = vmatprep.mubr.f32.mxu1 %v3394_v0  ;;  %606 = vmatpush1.msra.mxu1 %v2953_v22  ;;  %v2904_v19 = vld [vmem:[%s5202_s2 + $0x3] ss:$0 sm:$0xff] }
  0x29   :  { %607 = vmatprep.subr.mxu1 %v2952_v24  ;;  %481 = vmatprep.subr.mxu0 %v438_v37 }
  0x2a   :  { %608 = vmatpush1.msra.mxu1 %v2951_v26  ;;  %482 = vmatpush1.msra.mxu0 %v437_v39 }
  0x2b   :  { %609 = vmatprep.subr.mxu1 %v2950_v28  ;;  %483 = vmatprep.subr.mxu0 %v436_v41 }
  0x2c   :  { %610 = vmatpush1.msra.mxu1 %v2949_v30  ;;  %484 = vmatpush1.msra.mxu0 %v435_v43  ;;  %v2928_v43 = vld [vmem:[%s5203_s3 + $0x168] sm:$0xff] }
  0x2d   :  { %611 = vmatprep.subr.mxu1 %v2948_v32  ;;  %485 = vmatprep.subr.mxu0 %v434_v45  ;;  %v2926_v45 = vld [vmem:[%s5203_s3 + $0x158] sm:$0xff] }
  0x2e   :  { %612 = vmatpush1.msra.mxu1 %v2947_v34  ;;  %486 = vmatpush1.msra.mxu0 %v433_v47  ;;  %v2924_v47 = vld [vmem:[%s5203_s3 + $0x148] sm:$0xff] }
  0x2f   :  { %613 = vmatprep.subr.mxu1 %v2946_v36  ;;  %487 = vmatprep.subr.mxu0 %v432_v49  ;;  %v2922_v49 = vld [vmem:[%s5203_s3 + $0x138] sm:$0xff] }
  0x30   :  { %614 = vmatpush1.msra.mxu1 %v2945_v38  ;;  %488 = vmatpush1.msra.mxu0 %v431_v51  ;;  %v2920_v51 = vld [vmem:[%s5203_s3 + $0x128] sm:$0xff] }
  0x31   :  { %615 = vmatprep.subr.mxu1 %v2944_v40  ;;  %489 = vmatprep.subr.mxu0 %v430_v53  ;;  %v2929_v40 = vld [vmem:[%s5203_s3 + $0x170] sm:$0xff]  ;;  %v2918_v53 = vld [vmem:[%s5203_s3 + $0x118] sm:$0xff] }
  0x32   :  { %616 = vmatpush1.msra.mxu1 %v2943_v42  ;;  %490 = vmatpush1.msra.mxu0 %v429_v55  ;;  %v2916_v55 = vld [vmem:[%s5203_s3 + $0x108] sm:$0xff] }
  0x33   :  { %617 = vmatprep.subr.mxu1 %v2942_v44  ;;  %491 = vmatprep.subr.mxu0 %v428_v57  ;;  %v2927_v44 = vld [vmem:[%s5203_s3 + $0x160] sm:$0xff]  ;;  %v2914_v57 = vld [vmem:[%s5203_s3 + $0xf8] sm:$0xff] }
  0x34   :  { %618 = vmatpush1.msra.mxu1 %v2941_v46  ;;  %492 = vmatpush1.msra.mxu0 %v427_v59  ;;  %v2925_v46 = vld [vmem:[%s5203_s3 + $0x150] sm:$0xff]  ;;  %v2912_v59 = vld [vmem:[%s5203_s3 + $0xe8] sm:$0xff] }
  0x35   :  { %619 = vmatprep.subr.mxu1 %v2940_v48  ;;  %493 = vmatprep.subr.mxu0 %v426_v61  ;;  %v2923_v48 = vld [vmem:[%s5203_s3 + $0x140] sm:$0xff]  ;;  %v2910_v61 = vld [vmem:[%s5203_s3 + $0xd8] sm:$0xff] }
  0x36   :  { %620 = vmatpush1.msra.mxu1 %v2939_v50  ;;  %494 = vmatpush1.msra.mxu0 %v425_v63  ;;  %v2921_v50 = vld [vmem:[%s5203_s3 + $0x130] sm:$0xff]  ;;  %v2908_v63 = vld [vmem:[%s5203_s3 + $0xc8] sm:$0xff] }
  0x37   :  { %621 = vmatprep.subr.mxu1 %v2938_v52  ;;  %676 = vmatprep.subr.mxu0 %v2930_v3  ;;  %v2919_v52 = vld [vmem:[%s5203_s3 + $0x120] sm:$0xff]  ;;  %v840_v3 = vld [vmem:[%s5205_s5 + $0xf0] sm:$0xff] }
  0x38   :  { %622 = vmatpush1.msra.mxu1 %v2937_v54  ;;  %v2917_v54 = vld [vmem:[%s5203_s3 + $0x110] sm:$0xff] }
  0x39   :  { %623 = vmatprep.subr.mxu1 %v2936_v56  ;;  %v2915_v56 = vld [vmem:[%s5203_s3 + $0x100] sm:$0xff] }
  0x3a   :  { %624 = vmatpush1.msra.mxu1 %v2935_v58  ;;  %v2913_v58 = vld [vmem:[%s5203_s3 + $0xf0] sm:$0xff] }
  0x3b   :  { %625 = vmatprep.subr.mxu1 %v2934_v60  ;;  %v2911_v60 = vld [vmem:[%s5203_s3 + $0xe0] sm:$0xff] }
  0x3c   :  { %626 = vmatpush1.msra.mxu1 %v2933_v62  ;;  %v2909_v62 = vld [vmem:[%s5203_s3 + $0xd0] sm:$0xff] }
  0x3d   :  { %627 = vmatprep.subr.mxu1 %v2932_v1  ;;  %v2907_v1 = vld [vmem:[%s5203_s3 + $0xc0] sm:$0xff] }
  0x3e   :  { %628 = vmatpush1.msra.mxu1 %v2931_v2  ;;  %v841_v2 = vld [vmem:[%s5205_s5 + $0xf8] sm:$0xff] }
  0xd7   :  { %v144_v6 = vpop.f32.mrf.mxu1 }
  0xd8   :  { %v145_v7 = vadd.f32 %v2883_v4, %v144_v6  ;;  %v323_v8 = vpop.f32.mrf.mxu0  ;;  %v2988_v4 = vld [vmem:[%s5205_s5 + $0x238] sm:$0xff]  ;;  %v2987_v6 = vld [vmem:[%s5205_s5 + $0x230] sm:$0xff] }
  0xd9   :  { %v324_v9 = vadd.f32 %v2897_v5, %v323_v8  ;;  %v3256_v10 = vpop.f32.mrf.mxu1  ;;  %v839_v5 = vld [vmem:[%s5205_s5 + $0xe8] sm:$0xff]  ;;  %918 = vmatprep.subr.mxu1 %v2988_v4  ;;  %v2996_v4 = vld [vmem:[%s5205_s5 + $0x278] sm:$0xff] }
  0xda   :  { %v149_v11 = vmul.f32 0.70710677, %v145_v7  ;;  %v3278_v12 = vpop.f32.mrf.mxu0  ;;  %v148_v26 = vmul.f32 0.5, %v145_v7  ;;  %v838_v7 = vld [vmem:[%s5205_s5 + $0xe0] sm:$0xff]  ;;  %v2986_v8 = vld [vmem:[%s5205_s5 + $0x228] sm:$0xff] }
  0xdb   :  { %v328_v13 = vmul.f32 0.70710677, %v324_v9  ;;  %v327_v23 = vmul.f32 0.5, %v324_v9  ;;  %v837_v9 = vld [vmem:[%s5205_s5 + $0xd8] sm:$0xff]  ;;  %v2985_v10 = vld [vmem:[%s5205_s5 + $0x220] sm:$0xff] }
  0xdc   :  { %3295 = verf.f32 %v149_v11  ;;  %v836_v11 = vld [vmem:[%s5205_s5 + $0xd0] sm:$0xff]  ;;  %v2984_v12 = vld [vmem:[%s5205_s5 + $0x218] sm:$0xff] }
  0xdd   :  { %3297 = verf.f32 %v328_v13  ;;  %v835_v13 = vld [vmem:[%s5205_s5 + $0xc8] sm:$0xff] }
  0xdf   :  { %v234_v15 = vpop.f32.mrf.mxu1 }
  0xe0   :  { %v235_v16 = vadd.f32 %v2890_v14, %v234_v15  ;;  %v2983_v14 = vld [vmem:[%s5205_s5 + $0x210] sm:$0xff]  ;;  %v834_v15 = vld [vmem:[%s5205_s5 + $0xc0] sm:$0xff] }
  0xe1   :  { %v3267_v17 = vpop.f32.mrf.mxu1 }
  0xe2   :  { %v239_v18 = vmul.f32 0.70710677, %v235_v16  ;;  %v238_v33 = vmul.f32 0.5, %v235_v16  ;;  %v2982_v16 = vld [vmem:[%s5205_s5 + $0x208] sm:$0xff]  ;;  %v833_v17 = vld [vmem:[%s5205_s5 + $0xb8] sm:$0xff] }
  0xe4   :  { %3299 = verf.f32 %v239_v18  ;;  %v2981_v18 = vld [vmem:[%s5205_s5 + $0x200] sm:$0xff] }
  0xe7   :  { %v412_v20 = vpop.f32.mrf.mxu1 }
  0xe8   :  { %v413_v21 = vadd.f32 %v2904_v19, %v412_v20  ;;  %v832_v19 = vld [vmem:[%s5205_s5 + $0xb0] sm:$0xff]  ;;  %v2980_v20 = vld [vmem:[%s5205_s5 + $0x1f8] sm:$0xff] }
  0xe9   :  { %v3296_v22 = vpop.eup %3295  ;;  %v3289_v24 = vpop.f32.mrf.mxu1 }
  0xea   :  { %v3298_v25 = vpop.eup %3297  ;;  %v151_v27 = vadd.f32 1.0, %v3296_v22  ;;  %v417_v28 = vmul.f32 0.70710677, %v413_v21  ;;  %v416_v37 = vmul.f32 0.5, %v413_v21  ;;  %v831_v21 = vld [vmem:[%s5205_s5 + $0xa8] sm:$0xff]  ;;  %v2979_v22 = vld [vmem:[%s5205_s5 + $0x1f0] sm:$0xff] }
  0xeb   :  { %v330_v29 = vadd.f32 1.0, %v3298_v25  ;;  %v2978_v24 = vld [vmem:[%s5205_s5 + $0x1e8] sm:$0xff]  ;;  %v829_v25 = vld [vmem:[%s5205_s5 + $0x98] sm:$0xff] }
  0xec   :  { %v152_v30 = vmul.f32 %v151_v27, %v148_v26  ;;  %3301 = verf.f32 %v417_v28  ;;  %v2977_v26 = vld [vmem:[%s5205_s5 + $0x1e0] sm:$0xff]  ;;  %v828_v27 = vld [vmem:[%s5205_s5 + $0x90] sm:$0xff]  ;;  %v2976_v28 = vld [vmem:[%s5205_s5 + $0x1d8] sm:$0xff] }
  0xed   :  { %v331_v31 = vmul.f32 %v330_v29, %v327_v23  ;;  %v830_v23 = vld [vmem:[%s5205_s5 + $0xa0] sm:$0xff]  ;;  %v827_v29 = vld [vmem:[%s5205_s5 + $0x88] sm:$0xff] }
  0xee   :  { %154 = vst.msk [vmem:[#allocation2 + $0x2] sm:$0x3] %vm153_vm4, %v152_v30  ;;  %v2975_v30 = vld [vmem:[%s5205_s5 + $0x1d0] sm:$0xff] }
  0xef   :  { %332 = vst.msk [vmem:[#allocation2 + $0x6] sm:$0x3] %vm153_vm4, %v331_v31  ;;  %v826_v31 = vld [vmem:[%s5205_s5 + $0x80] sm:$0xff] }
  0xf1   :  { %v3300_v32 = vpop.eup %3299 }
  0xf2   :  { %v241_v34 = vadd.f32 1.0, %v3300_v32  ;;  %v2974_v32 = vld [vmem:[%s5205_s5 + $0x1c8] sm:$0xff] }
  0xf4   :  { %v242_v35 = vmul.f32 %v241_v34, %v238_v33  ;;  %v825_v33 = vld [vmem:[%s5205_s5 + $0x78] sm:$0xff]  ;;  %v2973_v34 = vld [vmem:[%s5205_s5 + $0x1c0] sm:$0xff] }
  0xf6   :  { %243 = vst.msk [vmem:[#allocation2 + $0x4] sm:$0x3] %vm153_vm4, %v242_v35  ;;  %v824_v35 = vld [vmem:[%s5205_s5 + $0x70] sm:$0xff] }
  0xf9   :  { %v3302_v36 = vpop.eup %3301 }
  0xfa   :  { %v419_v38 = vadd.f32 1.0, %v3302_v36  ;;  %v2972_v36 = vld [vmem:[%s5205_s5 + $0x1b8] sm:$0xff] }
  0xfc   :  { %v420_v39 = vmul.f32 %v419_v38, %v416_v37  ;;  %v823_v37 = vld [vmem:[%s5205_s5 + $0x68] sm:$0xff]  ;;  %v2971_v38 = vld [vmem:[%s5205_s5 + $0x1b0] sm:$0xff] }
  0xfe   :  { %421 = vst.msk [vmem:[#allocation2 + $0x8] sm:$0x3] %vm153_vm4, %v420_v39  ;;  %v822_v39 = vld [vmem:[%s5205_s5 + $0x60] sm:$0xff]  ;;  %vm2442_vm4 = vcmask 130050  }
 0x105   :  { %v422_v41 = vld [vmem:[#allocation2 + $0x2] sm:$0xff] }
 0x106   :  { %v423_v42 = vld [vmem:[#allocation2 + $0x4] sm:$0xff]  ;;  %2906 = vmatmul.mubr.msk.f32.vlgmr.msra.gmra.mxu0 %vm59_vm2, %v422_v41 }
 0x107   :  { %2955 = vmatmul.mubr.msk.f32.vlgmr.msra.gmra.mxu1 %vm59_vm2, %v423_v42  ;;  %677 = vmatpush1.msra.mxu0 %v2929_v40  ;;  %v2970_v40 = vld [vmem:[%s5205_s5 + $0x1a8] sm:$0xff]  ;;  %v2969_v42 = vld [vmem:[%s5205_s5 + $0x1a0] sm:$0xff] }
 0x108   :  { %732 = vmatprep.mubr.f32.mxu0 %v3394_v0  ;;  %678 = vmatprep.subr.mxu0 %v2928_v43  ;;  %v820_v43 = vld [vmem:[%s5205_s5 + $0x50] sm:$0xff]  ;;  %v849_v0 = vld [vmem:[%s5205_s5 + $0x138] sm:$0xff] }
 0x109   :  { %679 = vmatpush1.msra.mxu0 %v2927_v44  ;;  %919 = vmatpush1.msra.mxu1 %v2987_v6  ;;  %v2968_v44 = vld [vmem:[%s5205_s5 + $0x198] sm:$0xff]  ;;  %v2995_v6 = vld [vmem:[%s5205_s5 + $0x270] sm:$0xff] }
 0x10a   :  { %680 = vmatprep.subr.mxu0 %v2926_v45  ;;  %920 = vmatprep.subr.mxu1 %v2986_v8  ;;  %v819_v45 = vld [vmem:[%s5205_s5 + $0x48] sm:$0xff] }
 0x10b   :  { %681 = vmatpush1.msra.mxu0 %v2925_v46  ;;  %921 = vmatpush1.msra.mxu1 %v2985_v10  ;;  %v2967_v46 = vld [vmem:[%s5205_s5 + $0x190] sm:$0xff]  ;;  %v2994_v8 = vld [vmem:[%s5205_s5 + $0x268] sm:$0xff]  ;;  %v2993_v10 = vld [vmem:[%s5205_s5 + $0x260] sm:$0xff] }
 0x10c   :  { %682 = vmatprep.subr.mxu0 %v2924_v47  ;;  %922 = vmatprep.subr.mxu1 %v2984_v12  ;;  %v818_v47 = vld [vmem:[%s5205_s5 + $0x40] sm:$0xff]  ;;  %v2992_v12 = vld [vmem:[%s5205_s5 + $0x258] sm:$0xff] }
 0x10d   :  { %683 = vmatpush1.msra.mxu0 %v2923_v48  ;;  %923 = vmatpush1.msra.mxu1 %v2983_v14  ;;  %v2966_v48 = vld [vmem:[%s5205_s5 + $0x188] sm:$0xff]  ;;  %v2991_v14 = vld [vmem:[%s5205_s5 + $0x250] sm:$0xff] }
 0x10e   :  { %684 = vmatprep.subr.mxu0 %v2922_v49  ;;  %924 = vmatprep.subr.mxu1 %v2982_v16  ;;  %v817_v49 = vld [vmem:[%s5205_s5 + $0x38] sm:$0xff]  ;;  %v2990_v16 = vld [vmem:[%s5205_s5 + $0x248] sm:$0xff] }
 0x10f   :  { %685 = vmatpush1.msra.mxu0 %v2921_v50  ;;  %925 = vmatpush1.msra.mxu1 %v2981_v18  ;;  %v2965_v50 = vld [vmem:[%s5205_s5 + $0x180] sm:$0xff]  ;;  %v3032_v18 = vld [vmem:[%s5205_s5 + $0x378] sm:$0xff] }
 0x110   :  { %686 = vmatprep.subr.mxu0 %v2920_v51  ;;  %926 = vmatprep.subr.mxu1 %v2980_v20  ;;  %v816_v51 = vld [vmem:[%s5205_s5 + $0x30] sm:$0xff] }
 0x111   :  { %687 = vmatpush1.msra.mxu0 %v2919_v52  ;;  %927 = vmatpush1.msra.mxu1 %v2979_v22  ;;  %v2964_v52 = vld [vmem:[%s5205_s5 + $0x178] sm:$0xff]  ;;  %v424_v22 = vld [vmem:[%s5204_s4] sm:$0x3] }
 0x112   :  { %688 = vmatprep.subr.mxu0 %v2918_v53  ;;  %928 = vmatprep.subr.mxu1 %v2978_v24  ;;  %v815_v53 = vld [vmem:[%s5205_s5 + $0x28] sm:$0xff] }
 0x113   :  { %689 = vmatpush1.msra.mxu0 %v2917_v54  ;;  %929 = vmatpush1.msra.mxu1 %v2977_v26  ;;  %v2963_v54 = vld [vmem:[%s5205_s5 + $0x170] sm:$0xff] }
 0x114   :  { %690 = vmatprep.subr.mxu0 %v2916_v55  ;;  %930 = vmatprep.subr.mxu1 %v2976_v28  ;;  %v814_v55 = vld [vmem:[%s5205_s5 + $0x20] sm:$0xff] }
 0x115   :  { %691 = vmatpush1.msra.mxu0 %v2915_v56  ;;  %931 = vmatpush1.msra.mxu1 %v2975_v30  ;;  %v2962_v56 = vld [vmem:[%s5205_s5 + $0x168] sm:$0xff] }
 0x116   :  { %692 = vmatprep.subr.mxu0 %v2914_v57  ;;  %932 = vmatprep.subr.mxu1 %v2974_v32  ;;  %v813_v57 = vld [vmem:[%s5205_s5 + $0x18] sm:$0xff] }
 0x117   :  { %693 = vmatpush1.msra.mxu0 %v2913_v58  ;;  %933 = vmatpush1.msra.mxu1 %v2973_v34  ;;  %v2961_v58 = vld [vmem:[%s5205_s5 + $0x160] sm:$0xff] }
 0x118   :  { %694 = vmatprep.subr.mxu0 %v2912_v59  ;;  %934 = vmatprep.subr.mxu1 %v2972_v36  ;;  %v812_v59 = vld [vmem:[%s5205_s5 + $0x10] sm:$0xff] }
 0x119   :  { %695 = vmatpush1.msra.mxu0 %v2911_v60  ;;  %935 = vmatpush1.msra.mxu1 %v2971_v38  ;;  %v2960_v60 = vld [vmem:[%s5205_s5 + $0x158] sm:$0xff] }
 0x11a   :  { %696 = vmatprep.subr.mxu0 %v2910_v61  ;;  %936 = vmatprep.subr.mxu1 %v2970_v40  ;;  %v811_v61 = vld [vmem:[%s5205_s5 + $0x8] sm:$0xff] }
 0x11b   :  { %697 = vmatpush1.msra.mxu0 %v2909_v62  ;;  %937 = vmatpush1.msra.mxu1 %v2969_v42  ;;  %v2959_v62 = vld [vmem:[%s5205_s5 + $0x150] sm:$0xff] }
 0x11c   :  { %698 = vmatprep.subr.mxu0 %v2908_v63  ;;  %938 = vmatprep.subr.mxu1 %v2968_v44  ;;  %v810_v63 = vld [vmem:[%s5205_s5] sm:$0xff] }
 0x11d   :  { %699 = vmatpush1.msra.mxu0 %v2907_v1  ;;  %939 = vmatpush1.msra.mxu1 %v2967_v46  ;;  %v2958_v1 = vld [vmem:[%s5205_s5 + $0x148] sm:$0xff] }
 0x11e   :  { %2956 = vmatmul.mubr.msk.f32.vlgmr.msra.gmra.mxu0 %vm59_vm2, %v422_v41  ;;  %1000 = vmatprep.subr.mxu0 %v841_v2  ;;  %v821_v41 = vld [vmem:[%s5205_s5 + $0x58] sm:$0xff]  ;;  %v2957_v2 = vld [vmem:[%s5205_s5 + $0x140] sm:$0xff]  ;;  %vm1779_vm2 = vcmask 128004  }
 0x11f   :  { %1001 = vmatpush1.msra.mxu0 %v840_v3  ;;  %940 = vmatprep.subr.mxu1 %v2966_v48  ;;  %v848_v3 = vld [vmem:[%s5205_s5 + $0x130] sm:$0xff] }
 0x120   :  { %1002 = vmatprep.subr.mxu0 %v839_v5  ;;  %941 = vmatpush1.msra.mxu1 %v2965_v50  ;;  %v847_v5 = vld [vmem:[%s5205_s5 + $0x128] sm:$0xff] }
 0x121   :  { %1003 = vmatpush1.msra.mxu0 %v838_v7  ;;  %942 = vmatprep.subr.mxu1 %v2964_v52  ;;  %v846_v7 = vld [vmem:[%s5205_s5 + $0x120] sm:$0xff] }
 0x122   :  { %1004 = vmatprep.subr.mxu0 %v837_v9  ;;  %943 = vmatpush1.msra.mxu1 %v2963_v54  ;;  %v845_v9 = vld [vmem:[%s5205_s5 + $0x118] sm:$0xff] }
 0x123   :  { %1005 = vmatpush1.msra.mxu0 %v836_v11  ;;  %944 = vmatprep.subr.mxu1 %v2962_v56  ;;  %v844_v11 = vld [vmem:[%s5205_s5 + $0x110] sm:$0xff] }
 0x124   :  { %1006 = vmatprep.subr.mxu0 %v835_v13  ;;  %945 = vmatpush1.msra.mxu1 %v2961_v58  ;;  %v843_v13 = vld [vmem:[%s5205_s5 + $0x108] sm:$0xff] }
 0x125   :  { %1007 = vmatpush1.msra.mxu0 %v834_v15  ;;  %946 = vmatprep.subr.mxu1 %v2960_v60  ;;  %v842_v15 = vld [vmem:[%s5205_s5 + $0x100] sm:$0xff] }
 0x126   :  { %1008 = vmatprep.subr.mxu0 %v833_v17  ;;  %947 = vmatpush1.msra.mxu1 %v2959_v62  ;;  %v2989_v17 = vld [vmem:[%s5205_s5 + $0x240] sm:$0xff] }
 0x127   :  { %1009 = vmatpush1.msra.mxu0 %v832_v19  ;;  %948 = vmatprep.subr.mxu1 %v2958_v1  ;;  %v450_v19 = vlaneseq }
 0x128   :  { %1010 = vmatprep.subr.mxu0 %v831_v21  ;;  %949 = vmatpush1.msra.mxu1 %v2957_v2 }
 0x129   :  { %1011 = vmatpush1.msra.mxu0 %v830_v23  ;;  %974 = vmatprep.subr.mxu1 %v2996_v4  ;;  %v451_v20 = vshrl.u32 %v450_v19, 7 }
 0x12a   :  { %1012 = vmatprep.subr.mxu0 %v829_v25  ;;  %975 = vmatpush2.msra.mxu1 %v2995_v6 }
 0x12b   :  { %1013 = vmatpush1.msra.mxu0 %v828_v27  ;;  %976 = vmatprep.subr.mxu1 %v2994_v8  ;;  %v4050_v21 = vsub.s32 0, %v451_v20  ;;  %v4055_v23 = vsub.s32 1, %v451_v20 }
 0x12c   :  { %1014 = vmatprep.subr.mxu0 %v827_v29  ;;  %977 = vmatpush2.msra.mxu1 %v2993_v10 }
 0x12d   :  { %1015 = vmatpush1.msra.mxu0 %v826_v31  ;;  %978 = vmatprep.subr.mxu1 %v2992_v12  ;;  %v453_v24 = vrot.slane %v424_v22, %v4050_v21  ;;  %v457_v25 = vrot.slane %v424_v22, %v4055_v23  ;;  %v3031_v22 = vld [vmem:[%s5205_s5 + $0x370] sm:$0xff] }
 0x12e   :  { %1016 = vmatprep.subr.mxu0 %v825_v33  ;;  %979 = vmatpush2.msra.mxu1 %v2991_v14 }
 0x12f   :  { %1017 = vmatpush1.msra.mxu0 %v824_v35  ;;  %980 = vmatprep.subr.mxu1 %v2990_v16 }
 0x130   :  { %1018 = vmatprep.subr.mxu0 %v823_v37  ;;  %981 = vmatpush2.msra.mxu1 %v2989_v17 }
 0x131   :  { %1019 = vmatpush1.msra.mxu0 %v822_v39  ;;  %1143 = vmatprep.subr.mxu1 %v3032_v18 }
 0x132   :  { %1020 = vmatprep.subr.mxu0 %v821_v41 }
 0x133   :  { %1021 = vmatpush1.msra.mxu0 %v820_v43 }
 0x134   :  { %1022 = vmatprep.subr.mxu0 %v819_v45 }
 0x135   :  { %1023 = vmatpush1.msra.mxu0 %v818_v47 }
 0x136   :  { %1024 = vmatprep.subr.mxu0 %v817_v49 }
 0x137   :  { %1025 = vmatpush1.msra.mxu0 %v816_v51 }
 0x138   :  { %1026 = vmatprep.subr.mxu0 %v815_v53 }
 0x139   :  { %1027 = vmatpush1.msra.mxu0 %v814_v55 }
 0x13a   :  { %1028 = vmatprep.subr.mxu0 %v813_v57 }
 0x13b   :  { %1029 = vmatpush1.msra.mxu0 %v812_v59 }
 0x13c   :  { %1030 = vmatprep.subr.mxu0 %v811_v61 }
 0x13d   :  { %1031 = vmatpush1.msra.mxu0 %v810_v63 }
 0x13e   :  { %1056 = vmatprep.subr.mxu0 %v849_v0 }
 0x13f   :  { %1057 = vmatpush2.msra.mxu0 %v848_v3 }
 0x140   :  { %1058 = vmatprep.subr.mxu0 %v847_v5 }
 0x141   :  { %1059 = vmatpush2.msra.mxu0 %v846_v7 }
 0x142   :  { %1060 = vmatprep.subr.mxu0 %v845_v9 }
 0x143   :  { %1061 = vmatpush2.msra.mxu0 %v844_v11 }
 0x144   :  { %1062 = vmatprep.subr.mxu0 %v843_v13 }
 0x145   :  { %1063 = vmatpush2.msra.mxu0 %v842_v15 }
 0x1c6   :  { %v529_v26 = vpop.f32.mrf.mxu0 }
 0x1c7   :  { %v530_v27 = vadd.f32 %v529_v26, %v453_v24  ;;  %v663_v39 = vpop.f32.mrf.mxu1 }
 0x1c8   :  { %v531_v28 = vpop.f32.mrf.mxu0 }
 0x1c9   :  { %v536_v29 = vmul.f32 0.70710677, %v530_v27  ;;  %v532_v30 = vadd.f32 %v531_v28, %v457_v25  ;;  %v534_v33 = vmul.f32 0.5, %v530_v27  ;;  %v665_v49 = vpop.f32.mrf.mxu1 }
 0x1cb   :  { %3303 = verf.f32 %v536_v29  ;;  %v537_v31 = vmul.f32 0.70710677, %v532_v30  ;;  %v535_v37 = vmul.f32 0.5, %v532_v30  ;;  %v3029_v29 = vld [vmem:[%s5205_s5 + $0x360] sm:$0xff] }
 0x1cd   :  { %3305 = verf.f32 %v537_v31  ;;  %v3028_v31 = vld [vmem:[%s5205_s5 + $0x358] sm:$0xff] }
 0x1d8   :  { %v3304_v32 = vpop.eup %3303 }
 0x1d9   :  { %v540_v34 = vadd.f32 1.0, %v3304_v32  ;;  %v3027_v32 = vld [vmem:[%s5205_s5 + $0x350] sm:$0xff] }
 0x1da   :  { %v3306_v35 = vpop.eup %3305 }
 0x1db   :  { %v542_v36 = vmul.f32 %v540_v34, %v534_v33  ;;  %v541_v38 = vadd.f32 1.0, %v3306_v35  ;;  %v3026_v34 = vld [vmem:[%s5205_s5 + $0x348] sm:$0xff] }
 0x1dd   :  { %v760_v40 = vrot.slane %v542_v36, 6  ;;  %v776_v41 = vrot.slane %v542_v36, 4  ;;  %v790_v42 = vrot.slane %v542_v36, 2  ;;  %798 = vst [vmem:[#allocation3 + $0x10] sm:$0xc0] %v542_v36  ;;  %v543_v43 = vmul.f32 %v541_v38, %v535_v37  ;;  %v3025_v36 = vld [vmem:[%s5205_s5 + $0x340] sm:$0xff] }
 0x1de   :  { %v734_v44 = vpop.f32.mrf.mxu0  ;;  %v3024_v37 = vld [vmem:[%s5205_s5 + $0x338] sm:$0xff]  ;;  %v3023_v38 = vld [vmem:[%s5205_s5 + $0x330] sm:$0xff] }
 0x1df   :  { %764 = vst [vmem:[#allocation3] sm:$0xc] %v760_v40  ;;  %780 = vst [vmem:[#allocation3] sm:$0xc0] %v776_v41  ;;  %v761_v45 = vrot.slane %v543_v43, 6  ;;  %v777_v46 = vrot.slane %v543_v43, 4  ;;  %v735_v48 = vadd.f32 %v734_v44, %v663_v39 }
 0x1e0   :  { %794 = vst [vmem:[#allocation3 + $0x10] sm:$0xc] %v790_v42  ;;  %v791_v47 = vrot.slane %v543_v43, 2  ;;  %799 = vst.msk [vmem:[#allocation3 + $0x18] sm:$0xc0] %vm781_vm6, %v543_v43  ;;  %v736_v50 = vpop.f32.mrf.mxu0  ;;  %v3022_v39 = vld [vmem:[%s5205_s5 + $0x328] sm:$0xff] }
 0x1e1   :  { %766 = vst.msk [vmem:[#allocation3 + $0x8] sm:$0xc] %vm765_vm7, %v761_v45  ;;  %v739_v51 = vadd.f32 %v735_v48, %v453_v24  ;;  %v737_v52 = vadd.f32 %v736_v50, %v665_v49  ;;  %v3021_v40 = vld [vmem:[%s5205_s5 + $0x320] sm:$0xff]  ;;  %v3020_v41 = vld [vmem:[%s5205_s5 + $0x318] sm:$0xff]  ;;  %v3019_v42 = vld [vmem:[%s5205_s5 + $0x310] sm:$0xff] }
 0x1e2   :  { %782 = vst.msk [vmem:[#allocation3 + $0x8] sm:$0xc0] %vm781_vm6, %v777_v46  ;;  %v3018_v43 = vld [vmem:[%s5205_s5 + $0x308] sm:$0xff]  ;;  %v3017_v44 = vld [vmem:[%s5205_s5 + $0x300] sm:$0xff]  ;;  %v3016_v45 = vld [vmem:[%s5205_s5 + $0x2f8] sm:$0xff] }
 0x1e3   :  { %795 = vst.msk [vmem:[#allocation3 + $0x18] sm:$0xc] %vm765_vm7, %v791_v47  ;;  %v743_v53 = vmul.f32 0.70710677, %v739_v51  ;;  %v740_v54 = vadd.f32 %v737_v52, %v457_v25  ;;  %v741_v57 = vmul.f32 0.5, %v739_v51  ;;  %v3030_v25 = vld [vmem:[%s5205_s5 + $0x368] sm:$0xff] }
 0x1e4   :  { %v3015_v46 = vld [vmem:[%s5205_s5 + $0x2f0] sm:$0xff]  ;;  %v3014_v47 = vld [vmem:[%s5205_s5 + $0x2e8] sm:$0xff]  ;;  %v3013_v48 = vld [vmem:[%s5205_s5 + $0x2e0] sm:$0xff] }
 0x1e5   :  { %3307 = verf.f32 %v743_v53  ;;  %v744_v55 = vmul.f32 0.70710677, %v740_v54  ;;  %v742_v61 = vmul.f32 0.5, %v740_v54  ;;  %v3012_v49 = vld [vmem:[%s5205_s5 + $0x2d8] sm:$0xff]  ;;  %v3011_v50 = vld [vmem:[%s5205_s5 + $0x2d0] sm:$0xff]  ;;  %v3010_v51 = vld [vmem:[%s5205_s5 + $0x2c8] sm:$0xff] }
 0x1e6   :  { %v3009_v52 = vld [vmem:[%s5205_s5 + $0x2c0] sm:$0xff]  ;;  %v3008_v53 = vld [vmem:[%s5205_s5 + $0x2b8] sm:$0xff]  ;;  %v3007_v54 = vld [vmem:[%s5205_s5 + $0x2b0] sm:$0xff] }
 0x1e7   :  { %3309 = verf.f32 %v744_v55  ;;  %v3006_v55 = vld [vmem:[%s5205_s5 + $0x2a8] sm:$0xff] }
 0x1f2   :  { %v3308_v56 = vpop.eup %3307 }
 0x1f3   :  { %v747_v58 = vadd.f32 1.0, %v3308_v56  ;;  %v3005_v56 = vld [vmem:[%s5205_s5 + $0x2a0] sm:$0xff] }
 0x1f4   :  { %v3310_v59 = vpop.eup %3309 }
 0x1f5   :  { %v749_v60 = vmul.f32 %v747_v58, %v741_v57  ;;  %v748_v62 = vadd.f32 1.0, %v3310_v59  ;;  %v3004_v57 = vld [vmem:[%s5205_s5 + $0x298] sm:$0xff]  ;;  %v3003_v58 = vld [vmem:[%s5205_s5 + $0x290] sm:$0xff]  ;;  %v3002_v59 = vld [vmem:[%s5205_s5 + $0x288] sm:$0xff] }
 0x1f7   :  { %v769_v63 = vrot.slane %v749_v60, 4  ;;  %v783_v1 = vrot.slane %v749_v60, 2  ;;  %796 = vst [vmem:[#allocation3 + $0x10] sm:$0x30] %v749_v60  ;;  %v800_v0 = vrot.slane %v749_v60, 6  ;;  %v750_v2 = vmul.f32 %v748_v62, %v742_v61  ;;  %v3001_v60 = vld [vmem:[%s5205_s5 + $0x280] sm:$0xff] }
 0x1f8   :  { %v3040_v61 = vld [vmem:[%s5205_s5 + $0x3b8] sm:$0xff]  ;;  %v3039_v62 = vld [vmem:[%s5205_s5 + $0x3b0] sm:$0xff] }
 0x1f9   :  { %773 = vst [vmem:[#allocation3] sm:$0x30] %v769_v63  ;;  %787 = vst [vmem:[#allocation3 + $0x10] sm:$0x3] %v783_v1  ;;  %v770_v3 = vrot.slane %v750_v2, 4  ;;  %v784_v4 = vrot.slane %v750_v2, 2 }
 0x1fa   :  { %804 = vst [vmem:[#allocation3 + $0x20] sm:$0x3] %v800_v0  ;;  %797 = vst.msk [vmem:[#allocation3 + $0x18] sm:$0x30] %vm774_vm8, %v750_v2  ;;  %v801_v5 = vrot.slane %v750_v2, 6  ;;  %v3038_v63 = vld [vmem:[%s5205_s5 + $0x3a8] sm:$0xff] }
 0x1fb   :  { %775 = vst.msk [vmem:[#allocation3 + $0x8] sm:$0x30] %vm774_vm8, %v770_v3  ;;  %v3037_v1 = vld [vmem:[%s5205_s5 + $0x3a0] sm:$0xff]  ;;  %v3036_v2 = vld [vmem:[%s5205_s5 + $0x398] sm:$0xff] }
 0x1fc   :  { %789 = vst.msk [vmem:[#allocation3 + $0x18] sm:$0x3] %vm788_vm9, %v784_v4  ;;  %805 = vst.msk [vmem:[#allocation3 + $0x28] sm:$0x3] %vm788_vm9, %v801_v5  ;;  %v3035_v4 = vld [vmem:[%s5205_s5 + $0x390] sm:$0xff]  ;;  %v3034_v5 = vld [vmem:[%s5205_s5 + $0x388] sm:$0xff] }
 0x200   :  { %v4063_v6 = vld [vmem:[#allocation3 + $0x10] sm:$0xff]  ;;  %v850_v7 = vld [vmem:[#allocation3] sm:$0xfc] }
 0x201   :  { %v806_v8 = vld [vmem:[#allocation3] sm:$0xff]  ;;  %v902_v12 = vrot.slane %v850_v7, 2  ;;  %v903_v13 = vrot.slane %v4063_v6, 2 }
 0x202   :  { %v807_v9 = vld [vmem:[#allocation3 + $0x8] sm:$0xff]  ;;  %v852_v17 = vld [vmem:[#allocation3 + $0x20] sm:$0x3]  ;;  %v1077_v0 = vld [vmem:[#allocation3] sm:$0xf0] }
 0x203   :  { %v4065_v10 = vld [vmem:[#allocation3 + $0x18] sm:$0xff]  ;;  %v851_v11 = vld [vmem:[#allocation3 + $0x8] sm:$0xfc]  ;;  %2999 = vmatprep.mubr.msk.f32.mxu0 %vm74_vm0, %v807_v9  ;;  %v853_v16 = vld [vmem:[#allocation3 + $0x28] sm:$0x3]  ;;  %v904_v24 = vsel %vm901_vm10, %v902_v12, %v903_v13  ;;  %v908_v26 = vrot.slane %v852_v17, 2 }
 0x204   :  { %v906_v14 = vrot.slane %v4065_v10, 2  ;;  %v905_v15 = vrot.slane %v851_v11, 2  ;;  %1065 = vmatmul.mubr.f32.vlgmr.msra.gmra.mxu0 %v806_v8  ;;  %v910_v18 = vrot.slane %v853_v16, 2  ;;  %v1078_v19 = vld [vmem:[#allocation3 + $0x8] sm:$0xf0]  ;;  %v1131_v27 = vrot.slane %v4065_v10, 4 }
 0x205   :  { %3000 = vmatprep.mubr.msk.f32.mxu0 %vm74_vm0, %v4065_v10  ;;  %v1130_v30 = vrot.slane %v1078_v19, 4  ;;  %v909_v33 = vsel %vm901_vm10, %v903_v13, %v908_v26  ;;  %v1080_v3 = vld [vmem:[#allocation3 + $0x28] sm:$0xf]  ;;  %v1127_v7 = vrot.slane %v1077_v0, 4  ;;  %v1128_v8 = vrot.slane %v4063_v6, 4  ;;  %v3033_v9 = vld [vmem:[%s5205_s5 + $0x380] sm:$0xff] }
 0x206   :  { %v907_v20 = vsel %vm901_vm10, %v905_v15, %v906_v14  ;;  %v911_v28 = vsel %vm901_vm10, %v906_v14, %v910_v18  ;;  %v1135_v11 = vrot.slane %v1080_v3, 4  ;;  %v1079_v12 = vld [vmem:[#allocation3 + $0x20] sm:$0xf]  ;;  %v1332_v16 = vld [vmem:[%s5207_s7 + $0xf8] sm:$0xff]  ;;  %v1330_v18 = vld [vmem:[%s5207_s7 + $0xe8] sm:$0xff] }
 0x207   :  { %2997 = vmatprep.mubr.msk.f32.mxu1 %vm74_vm0, %v907_v20  ;;  %v1132_v35 = vsel %vm1126_vm11, %v1130_v30, %v1131_v27  ;;  %v1129_v13 = vsel %vm1126_vm11, %v1127_v7, %v1128_v8  ;;  %v1133_v14 = vrot.slane %v1079_v12, 4  ;;  %1374 = vmatprep.subr.mxu0 %v1332_v16  ;;  %v1331_v17 = vld [vmem:[%s5207_s7 + $0xf0] sm:$0xff]  ;;  %v3116_v10 = vld [vmem:[%s5207_s7 + $0x378] sm:$0xff]  ;;  %v1329_v20 = vld [vmem:[%s5207_s7 + $0xe0] sm:$0xff] }
 0x208   :  { %983 = vmatmul.mubr.f32.vlgmr.msra.gmra.mxu1 %v904_v24  ;;  %1071 = vmatmul.mubr.f32.gmra.mxu0 %v4063_v6  ;;  %v1136_v15 = vsel %vm1126_vm11, %v1131_v27, %v1135_v11  ;;  %v3115_v19 = vld [vmem:[%s5207_s7 + $0x370] sm:$0xff]  ;;  %v1328_v24 = vld [vmem:[%s5207_s7 + $0xd8] sm:$0xff]  ;;  %v1325_v30 = vld [vmem:[%s5207_s7 + $0xc0] sm:$0xff] }
 0x209   :  { %1144 = vmatpush1.msra.mxu1 %v3031_v22  ;;  %2998 = vmatprep.mubr.msk.f32.mxu1 %vm74_vm0, %v911_v28  ;;  %v1134_v6 = vsel %vm1126_vm11, %v1128_v8, %v1133_v14  ;;  %v3114_v22 = vld [vmem:[%s5207_s7 + $0x368] sm:$0xff]  ;;  %v1327_v26 = vld [vmem:[%s5207_s7 + $0xd0] sm:$0xff]  ;;  %v3112_v27 = vld [vmem:[%s5207_s7 + $0x358] sm:$0xff] }
 0x20a   :  { %1145 = vmatprep.subr.mxu1 %v3030_v25  ;;  %1375 = vmatpush1.msra.mxu0 %v1331_v17  ;;  %v3113_v25 = vld [vmem:[%s5207_s7 + $0x360] sm:$0xff]  ;;  %v1326_v28 = vld [vmem:[%s5207_s7 + $0xc8] sm:$0xff]  ;;  %v3092_v3 = vld [vmem:[%s5207_s7 + $0x2b8] sm:$0xff] }
 0x20b   :  { %1146 = vmatpush1.msra.mxu1 %v3029_v29  ;;  %1376 = vmatprep.subr.mxu0 %v1330_v18  ;;  %v3111_v29 = vld [vmem:[%s5207_s7 + $0x350] sm:$0xff]  ;;  %v3093_v0 = vld [vmem:[%s5207_s7 + $0x2c0] sm:$0xff]  ;;  %v3090_v8 = vld [vmem:[%s5207_s7 + $0x2a8] sm:$0xff] }
 0x20c   :  { %1147 = vmatprep.subr.mxu1 %v3028_v31  ;;  %989 = vmatmul.mubr.f32.gmra.mxu1 %v909_v33  ;;  %v3110_v31 = vld [vmem:[%s5207_s7 + $0x348] sm:$0xff]  ;;  %v3109_v33 = vld [vmem:[%s5207_s7 + $0x340] sm:$0xff]  ;;  %v1303_v12 = vld [vmem:[%s5207_s7 + $0x10] sm:$0xff] }
 0x20d   :  { %1148 = vmatpush1.msra.mxu1 %v3027_v32  ;;  %3041 = vmatprep.mubr.msk.f32.mxu1 %vm74_vm0, %v1132_v35  ;;  %v1324_v32 = vld [vmem:[%s5207_s7 + $0xb8] sm:$0xff]  ;;  %v1305_v7 = vld [vmem:[%s5207_s7 + $0x20] sm:$0xff]  ;;  %v1302_v14 = vld [vmem:[%s5207_s7 + $0x8] sm:$0xff] }
 0x20e   :  { %1149 = vmatprep.subr.mxu1 %v3026_v34  ;;  %1377 = vmatpush1.msra.mxu0 %v1329_v20  ;;  %v1323_v34 = vld [vmem:[%s5207_s7 + $0xb0] sm:$0xff]  ;;  %v3108_v35 = vld [vmem:[%s5207_s7 + $0x338] sm:$0xff]  ;;  %v3089_v11 = vld [vmem:[%s5207_s7 + $0x2a0] sm:$0xff] }
 0x20f   :  { %1150 = vmatpush1.msra.mxu1 %v3025_v36  ;;  %1378 = vmatprep.subr.mxu0 %v1328_v24  ;;  %v1322_v36 = vld [vmem:[%s5207_s7 + $0xa8] sm:$0xff]  ;;  %v1340_v17 = vld [vmem:[%s5207_s7 + $0x138] sm:$0xff]  ;;  %v1339_v18 = vld [vmem:[%s5207_s7 + $0x130] sm:$0xff] }
 0x210   :  { %1151 = vmatprep.subr.mxu1 %v3024_v37  ;;  %1379 = vmatpush1.msra.mxu0 %v1327_v26  ;;  %v3107_v37 = vld [vmem:[%s5207_s7 + $0x330] sm:$0xff]  ;;  %v3086_v16 = vld [vmem:[%s5207_s7 + $0x288] sm:$0xff]  ;;  %v1337_v24 = vld [vmem:[%s5207_s7 + $0x120] sm:$0xff] }
 0x211   :  { %1152 = vmatpush1.msra.mxu1 %v3023_v38  ;;  %1380 = vmatprep.subr.mxu0 %v1326_v28  ;;  %v1321_v38 = vld [vmem:[%s5207_s7 + $0xa0] sm:$0xff]  ;;  %v1338_v20 = vld [vmem:[%s5207_s7 + $0x128] sm:$0xff]  ;;  %v1336_v26 = vld [vmem:[%s5207_s7 + $0x118] sm:$0xff] }
 0x212   :  { %1153 = vmatprep.subr.mxu1 %v3022_v39  ;;  %1381 = vmatpush1.msra.mxu0 %v1325_v30  ;;  %v3106_v39 = vld [vmem:[%s5207_s7 + $0x328] sm:$0xff]  ;;  %v1335_v28 = vld [vmem:[%s5207_s7 + $0x110] sm:$0xff] }
 0x213   :  { %1154 = vmatpush1.msra.mxu1 %v3021_v40  ;;  %1382 = vmatprep.subr.mxu0 %v1324_v32  ;;  %v1320_v40 = vld [vmem:[%s5207_s7 + $0x98] sm:$0xff]  ;;  %v1334_v30 = vld [vmem:[%s5207_s7 + $0x108] sm:$0xff]  ;;  %v1333_v32 = vld [vmem:[%s5207_s7 + $0x100] sm:$0xff] }
 0x214   :  { %1155 = vmatprep.subr.mxu1 %v3020_v41  ;;  %1383 = vmatpush1.msra.mxu0 %v1323_v34  ;;  %v3105_v41 = vld [vmem:[%s5207_s7 + $0x320] sm:$0xff] }
 0x215   :  { %1156 = vmatpush1.msra.mxu1 %v3019_v42  ;;  %1384 = vmatprep.subr.mxu0 %v1322_v36  ;;  %v1319_v42 = vld [vmem:[%s5207_s7 + $0x90] sm:$0xff]  ;;  %v3117_v34 = vld [vmem:[%s5207_s7 + $0x380] sm:$0xff] }
 0x216   :  { %1157 = vmatprep.subr.mxu1 %v3018_v43  ;;  %1385 = vmatpush1.msra.mxu0 %v1321_v38  ;;  %v3104_v43 = vld [vmem:[%s5207_s7 + $0x318] sm:$0xff] }
 0x217   :  { %1158 = vmatpush1.msra.mxu1 %v3017_v44  ;;  %1386 = vmatprep.subr.mxu0 %v1320_v40  ;;  %v1318_v44 = vld [vmem:[%s5207_s7 + $0x88] sm:$0xff]  ;;  %v1224_v40 = vld [vmem:[%s5206_s6] sm:$0x3] }
 0x218   :  { %1159 = vmatprep.subr.mxu1 %v3016_v45  ;;  %1387 = vmatpush1.msra.mxu0 %v1319_v42  ;;  %v3103_v45 = vld [vmem:[%s5207_s7 + $0x310] sm:$0xff] }
 0x219   :  { %1160 = vmatpush1.msra.mxu1 %v3015_v46  ;;  %1388 = vmatprep.subr.mxu0 %v1318_v44  ;;  %v1317_v46 = vld [vmem:[%s5207_s7 + $0x80] sm:$0xff]  ;;  %v1229_v44 = vrot.slane %v1224_v40, %v4050_v21 }
 0x21a   :  { %1161 = vmatprep.subr.mxu1 %v3014_v47  ;;  %v3102_v47 = vld [vmem:[%s5207_s7 + $0x308] sm:$0xff]  ;;  %1389 = vmatpush1.msra.mxu0 %v1317_v46 }
 0x21b   :  { %1162 = vmatpush1.msra.mxu1 %v3013_v48  ;;  %v1316_v48 = vld [vmem:[%s5207_s7 + $0x78] sm:$0xff] }
 0x21c   :  { %1163 = vmatprep.subr.mxu1 %v3012_v49  ;;  %v3101_v49 = vld [vmem:[%s5207_s7 + $0x300] sm:$0xff]  ;;  %1390 = vmatprep.subr.mxu0 %v1316_v48 }
 0x21d   :  { %1164 = vmatpush1.msra.mxu1 %v3011_v50  ;;  %v1315_v50 = vld [vmem:[%s5207_s7 + $0x70] sm:$0xff] }
 0x21e   :  { %1165 = vmatprep.subr.mxu1 %v3010_v51  ;;  %v3100_v51 = vld [vmem:[%s5207_s7 + $0x2f8] sm:$0xff]  ;;  %1391 = vmatpush1.msra.mxu0 %v1315_v50 }
 0x21f   :  { %1166 = vmatpush1.msra.mxu1 %v3009_v52  ;;  %v1314_v52 = vld [vmem:[%s5207_s7 + $0x68] sm:$0xff] }
 0x220   :  { %1167 = vmatprep.subr.mxu1 %v3008_v53  ;;  %v3099_v53 = vld [vmem:[%s5207_s7 + $0x2f0] sm:$0xff]  ;;  %1392 = vmatprep.subr.mxu0 %v1314_v52 }
 0x221   :  { %1168 = vmatpush1.msra.mxu1 %v3007_v54  ;;  %v1313_v54 = vld [vmem:[%s5207_s7 + $0x60] sm:$0xff] }
 0x222   :  { %1169 = vmatprep.subr.mxu1 %v3006_v55  ;;  %v3098_v55 = vld [vmem:[%s5207_s7 + $0x2e8] sm:$0xff]  ;;  %1393 = vmatpush1.msra.mxu0 %v1313_v54 }
 0x223   :  { %1170 = vmatpush1.msra.mxu1 %v3005_v56  ;;  %v1312_v56 = vld [vmem:[%s5207_s7 + $0x58] sm:$0xff] }
 0x224   :  { %1171 = vmatprep.subr.mxu1 %v3004_v57  ;;  %v3097_v57 = vld [vmem:[%s5207_s7 + $0x2e0] sm:$0xff]  ;;  %1394 = vmatprep.subr.mxu0 %v1312_v56 }
 0x225   :  { %1172 = vmatpush1.msra.mxu1 %v3003_v58  ;;  %v1311_v58 = vld [vmem:[%s5207_s7 + $0x50] sm:$0xff] }
 0x226   :  { %1173 = vmatprep.subr.mxu1 %v3002_v59  ;;  %v3096_v59 = vld [vmem:[%s5207_s7 + $0x2d8] sm:$0xff]  ;;  %1395 = vmatpush1.msra.mxu0 %v1311_v58 }
 0x227   :  { %1174 = vmatpush1.msra.mxu1 %v3001_v60  ;;  %v1310_v60 = vld [vmem:[%s5207_s7 + $0x48] sm:$0xff] }
 0x228   :  { %1199 = vmatprep.subr.mxu1 %v3040_v61  ;;  %v3095_v61 = vld [vmem:[%s5207_s7 + $0x2d0] sm:$0xff]  ;;  %1396 = vmatprep.subr.mxu0 %v1310_v60 }
 0x229   :  { %1200 = vmatpush2.msra.mxu1 %v3039_v62  ;;  %v1309_v62 = vld [vmem:[%s5207_s7 + $0x40] sm:$0xff] }
 0x22a   :  { %1201 = vmatprep.subr.mxu1 %v3038_v63  ;;  %v3094_v63 = vld [vmem:[%s5207_s7 + $0x2c8] sm:$0xff]  ;;  %1397 = vmatpush1.msra.mxu0 %v1309_v62 }
 0x22b   :  { %1202 = vmatpush2.msra.mxu1 %v3037_v1  ;;  %v1308_v1 = vld [vmem:[%s5207_s7 + $0x38] sm:$0xff] }
 0x22c   :  { %1203 = vmatprep.subr.mxu1 %v3036_v2  ;;  %1398 = vmatprep.subr.mxu0 %v1308_v1  ;;  %v1307_v2 = vld [vmem:[%s5207_s7 + $0x30] sm:$0xff] }
 0x22d   :  { %1204 = vmatpush2.msra.mxu1 %v3035_v4  ;;  %1399 = vmatpush1.msra.mxu0 %v1307_v2  ;;  %v1306_v4 = vld [vmem:[%s5207_s7 + $0x28] sm:$0xff] }
 0x22e   :  { %1205 = vmatprep.subr.mxu1 %v3034_v5  ;;  %v3091_v5 = vld [vmem:[%s5207_s7 + $0x2b0] sm:$0xff]  ;;  %1400 = vmatprep.subr.mxu0 %v1306_v4 }
 0x22f   :  { %1206 = vmatpush2.msra.mxu1 %v3033_v9  ;;  %v1304_v9 = vld [vmem:[%s5207_s7 + $0x18] sm:$0xff]  ;;  %1401 = vmatpush1.msra.mxu0 %v1305_v7 }
 0x230   :  { %1208 = vmatmul.mubr.f32.vlgmr.msra.gmra.mxu1 %v1129_v13  ;;  %1573 = vmatprep.subr.mxu1 %v3116_v10  ;;  %v3088_v13 = vld [vmem:[%s5207_s7 + $0x298] sm:$0xff]  ;;  %v3085_v10 = vld [vmem:[%s5207_s7 + $0x280] sm:$0xff] }
 0x231   :  { %3042 = vmatprep.mubr.msk.f32.mxu1 %vm74_vm0, %v1136_v15  ;;  %1574 = vmatpush1.msra.mxu1 %v3115_v19  ;;  %v3087_v15 = vld [vmem:[%s5207_s7 + $0x290] sm:$0xff]  ;;  %v3124_v19 = vld [vmem:[%s5207_s7 + $0x3b8] sm:$0xff] }
 0x232   :  { %1575 = vmatprep.subr.mxu1 %v3114_v22  ;;  %1402 = vmatprep.subr.mxu0 %v1304_v9  ;;  %v3123_v22 = vld [vmem:[%s5207_s7 + $0x3b0] sm:$0xff] }
 0x233   :  { %1576 = vmatpush1.msra.mxu1 %v3113_v25  ;;  %1403 = vmatpush1.msra.mxu0 %v1303_v12  ;;  %v3122_v25 = vld [vmem:[%s5207_s7 + $0x3a8] sm:$0xff] }
 0x234   :  { %1214 = vmatmul.mubr.f32.gmra.mxu1 %v1134_v6  ;;  %1577 = vmatprep.subr.mxu1 %v3112_v27  ;;  %v1301_v6 = vld [vmem:[%s5207_s7] sm:$0xff] }
 0x235   :  { %1578 = vmatpush1.msra.mxu1 %v3111_v29  ;;  %1404 = vmatprep.subr.mxu0 %v1302_v14  ;;  %v3121_v27 = vld [vmem:[%s5207_s7 + $0x3a0] sm:$0xff]  ;;  %v3120_v29 = vld [vmem:[%s5207_s7 + $0x398] sm:$0xff] }
 0x236   :  { %1579 = vmatprep.subr.mxu1 %v3110_v31  ;;  %1405 = vmatpush1.msra.mxu0 %v1301_v6  ;;  %v3119_v31 = vld [vmem:[%s5207_s7 + $0x390] sm:$0xff] }
 0x237   :  { %1580 = vmatpush1.msra.mxu1 %v3109_v33  ;;  %1430 = vmatprep.subr.mxu0 %v1340_v17  ;;  %v3118_v33 = vld [vmem:[%s5207_s7 + $0x388] sm:$0xff] }
 0x238   :  { %1581 = vmatprep.subr.mxu1 %v3108_v35  ;;  %1431 = vmatpush2.msra.mxu0 %v1339_v18  ;;  %v3076_v35 = vld [vmem:[%s5207_s7 + $0x238] sm:$0xff] }
 0x239   :  { %1582 = vmatpush1.msra.mxu1 %v3107_v37  ;;  %1432 = vmatprep.subr.mxu0 %v1338_v20 }
 0x23a   :  { %1583 = vmatprep.subr.mxu1 %v3106_v39  ;;  %1433 = vmatpush2.msra.mxu0 %v1337_v24 }
 0x23b   :  { %1584 = vmatpush1.msra.mxu1 %v3105_v41  ;;  %1434 = vmatprep.subr.mxu0 %v1336_v26 }
 0x23c   :  { %1585 = vmatprep.subr.mxu1 %v3104_v43  ;;  %1435 = vmatpush2.msra.mxu0 %v1335_v28 }
 0x23d   :  { %1586 = vmatpush1.msra.mxu1 %v3103_v45  ;;  %1436 = vmatprep.subr.mxu0 %v1334_v30 }
 0x23e   :  { %1587 = vmatprep.subr.mxu1 %v3102_v47  ;;  %1437 = vmatpush2.msra.mxu0 %v1333_v32 }
 0x23f   :  { %1588 = vmatpush1.msra.mxu1 %v3101_v49  ;;  %1650 = vmatprep.subr.mxu0 %v3076_v35  ;;  %v1233_v49 = vrot.slane %v1224_v40, %v4055_v23 }
 0x240   :  { %1589 = vmatprep.subr.mxu1 %v3100_v51 }
 0x241   :  { %1590 = vmatpush1.msra.mxu1 %v3099_v53 }
 0x242   :  { %1591 = vmatprep.subr.mxu1 %v3098_v55 }
 0x243   :  { %1592 = vmatpush1.msra.mxu1 %v3097_v57 }
 0x244   :  { %1593 = vmatprep.subr.mxu1 %v3096_v59 }
 0x245   :  { %1594 = vmatpush1.msra.mxu1 %v3095_v61 }
 0x246   :  { %1595 = vmatprep.subr.mxu1 %v3094_v63 }
 0x247   :  { %1596 = vmatpush1.msra.mxu1 %v3093_v0 }
 0x248   :  { %1597 = vmatprep.subr.mxu1 %v3092_v3 }
 0x249   :  { %1598 = vmatpush1.msra.mxu1 %v3091_v5 }
 0x24a   :  { %1599 = vmatprep.subr.mxu1 %v3090_v8 }
 0x24b   :  { %1600 = vmatpush1.msra.mxu1 %v3089_v11 }
 0x24c   :  { %1601 = vmatprep.subr.mxu1 %v3088_v13 }
 0x24d   :  { %1602 = vmatpush1.msra.mxu1 %v3087_v15 }
 0x24e   :  { %1603 = vmatprep.subr.mxu1 %v3086_v16 }
 0x24f   :  { %1604 = vmatpush1.msra.mxu1 %v3085_v10 }
 0x250   :  { %1629 = vmatprep.subr.mxu1 %v3124_v19 }
 0x251   :  { %1630 = vmatpush2.msra.mxu1 %v3123_v22 }
 0x252   :  { %1631 = vmatprep.subr.mxu1 %v3122_v25 }
 0x253   :  { %1632 = vmatpush2.msra.mxu1 %v3121_v27 }
 0x254   :  { %1633 = vmatprep.subr.mxu1 %v3120_v29 }
 0x255   :  { %1634 = vmatpush2.msra.mxu1 %v3119_v31 }
 0x256   :  { %1635 = vmatprep.subr.mxu1 %v3118_v33 }
 0x257   :  { %1636 = vmatpush2.msra.mxu1 %v3117_v34 }
 0x2c4   :  { %v1066_v38 = vpop.f32.mrf.mxu0 }
 0x2c6   :  { %v1068_v41 = vpop.f32.mrf.mxu0 }
 0x2c8   :  { %v984_v36 = vpop.f32.mrf.mxu1  ;;  %v1072_v46 = vpop.f32.mrf.mxu0 }
 0x2c9   :  { %v1067_v43 = vadd.f32 %v1066_v38, %v984_v36 }
 0x2ca   :  { %v986_v37 = vpop.f32.mrf.mxu1  ;;  %v1074_v55 = vpop.f32.mrf.mxu0 }
 0x2cb   :  { %v1069_v47 = vadd.f32 %v1068_v41, %v986_v37 }
 0x2cc   :  { %v990_v39 = vpop.f32.mrf.mxu1 }
 0x2cd   :  { %v1073_v51 = vadd.f32 %v1072_v46, %v990_v39 }
 0x2ce   :  { %v992_v42 = vpop.f32.mrf.mxu1 }
 0x2cf   :  { %v1075_v59 = vadd.f32 %v1074_v55, %v992_v42 }
 0x2f0   :  { %v1209_v45 = vpop.f32.mrf.mxu1 }
 0x2f1   :  { %v1220_v48 = vadd.f32 %v1209_v45, %v1067_v43 }
 0x2f2   :  { %v1211_v50 = vpop.f32.mrf.mxu1 }
 0x2f3   :  { %v1236_v52 = vadd.f32 %v1229_v44, %v1220_v48  ;;  %v1221_v53 = vadd.f32 %v1211_v50, %v1069_v47  ;;  %v3075_v48 = vld [vmem:[%s5207_s7 + $0x230] sm:$0xff] }
 0x2f4   :  { %v1215_v54 = vpop.f32.mrf.mxu1 }
 0x2f5   :  { %v1244_v56 = vmul.f32 0.70710677, %v1236_v52  ;;  %v1237_v57 = vadd.f32 %v1233_v49, %v1221_v53  ;;  %v1222_v58 = vadd.f32 %v1215_v54, %v1073_v51  ;;  %v1240_v4 = vmul.f32 0.5, %v1236_v52  ;;  %v3074_v51 = vld [vmem:[%s5207_s7 + $0x228] sm:$0xff]  ;;  %v3073_v54 = vld [vmem:[%s5207_s7 + $0x220] sm:$0xff] }
 0x2f6   :  { %v1217_v60 = vpop.f32.mrf.mxu1 }
 0x2f7   :  { %3311 = verf.f32 %v1244_v56  ;;  %v1245_v61 = vmul.f32 0.70710677, %v1237_v57  ;;  %v1238_v62 = vadd.f32 %v1229_v44, %v1222_v58  ;;  %v1223_v63 = vadd.f32 %v1217_v60, %v1075_v59  ;;  %v3071_v58 = vld [vmem:[%s5207_s7 + $0x210] sm:$0xff]  ;;  %v3070_v60 = vld [vmem:[%s5207_s7 + $0x208] sm:$0xff] }
 0x2f8   :  { %v1241_v9 = vmul.f32 0.5, %v1237_v57  ;;  %v3072_v57 = vld [vmem:[%s5207_s7 + $0x218] sm:$0xff] }
 0x2f9   :  { %3313 = verf.f32 %v1245_v61  ;;  %v1246_v1 = vmul.f32 0.70710677, %v1238_v62  ;;  %v1239_v0 = vadd.f32 %v1233_v49, %v1223_v63  ;;  %v1242_v15 = vmul.f32 0.5, %v1238_v62  ;;  %v3069_v62 = vld [vmem:[%s5207_s7 + $0x200] sm:$0xff]  ;;  %v3068_v63 = vld [vmem:[%s5207_s7 + $0x1f8] sm:$0xff] }
 0x2fb   :  { %3315 = verf.f32 %v1246_v1  ;;  %v1247_v2 = vmul.f32 0.70710677, %v1239_v0  ;;  %v1243_v18 = vmul.f32 0.5, %v1239_v0  ;;  %v3067_v1 = vld [vmem:[%s5207_s7 + $0x1f0] sm:$0xff]  ;;  %v3066_v0 = vld [vmem:[%s5207_s7 + $0x1e8] sm:$0xff] }
 0x2fd   :  { %3317 = verf.f32 %v1247_v2  ;;  %v3065_v2 = vld [vmem:[%s5207_s7 + $0x1e0] sm:$0xff] }
 0x304   :  { %v3312_v3 = vpop.eup %3311 }
 0x305   :  { %v1252_v5 = vadd.f32 1.0, %v3312_v3  ;;  %v3064_v3 = vld [vmem:[%s5207_s7 + $0x1d8] sm:$0xff] }
 0x306   :  { %v3314_v7 = vpop.eup %3313 }
 0x307   :  { %v1256_v8 = vmul.f32 %v1252_v5, %v1240_v4  ;;  %v1253_v11 = vadd.f32 1.0, %v3314_v7  ;;  %v3063_v4 = vld [vmem:[%s5207_s7 + $0x1d0] sm:$0xff]  ;;  %v3062_v5 = vld [vmem:[%s5207_s7 + $0x1c8] sm:$0xff]  ;;  %v3061_v7 = vld [vmem:[%s5207_s7 + $0x1c0] sm:$0xff] }
 0x308   :  { %v3316_v12 = vpop.eup %3315 }
 0x309   :  { %v1271_v13 = vrot.slane %v1256_v8, 6  ;;  %v1257_v14 = vmul.f32 %v1253_v11, %v1241_v9  ;;  %v1254_v6 = vadd.f32 1.0, %v3316_v12  ;;  %v3060_v8 = vld [vmem:[%s5207_s7 + $0x1b8] sm:$0xff]  ;;  %v3059_v9 = vld [vmem:[%s5207_s7 + $0x1b0] sm:$0xff]  ;;  %v3058_v11 = vld [vmem:[%s5207_s7 + $0x1a8] sm:$0xff] }
 0x30a   :  { %v3318_v16 = vpop.eup %3317  ;;  %v3057_v12 = vld [vmem:[%s5207_s7 + $0x1a0] sm:$0xff] }
 0x30b   :  { %1283 = vst [vmem:[#allocation4] sm:$0xfc] %v1271_v13  ;;  %v1272_v17 = vrot.slane %v1257_v14, 6  ;;  %v1258_v10 = vmul.f32 %v1254_v6, %v1242_v15  ;;  %v1255_v19 = vadd.f32 1.0, %v3318_v16  ;;  %v3055_v14 = vld [vmem:[%s5207_s7 + $0x190] sm:$0xff]  ;;  %v3054_v15 = vld [vmem:[%s5207_s7 + $0x188] sm:$0xff] }
 0x30c   :  { %v3053_v6 = vld [vmem:[%s5207_s7 + $0x180] sm:$0xff]  ;;  %v3052_v16 = vld [vmem:[%s5207_s7 + $0x178] sm:$0xff] }
 0x30d   :  { %1285 = vst.msk [vmem:[#allocation4 + $0x8] sm:$0xfc] %vm1284_vm12, %v1272_v17  ;;  %v1273_v20 = vrot.slane %v1258_v10, 6  ;;  %v1259_v22 = vmul.f32 %v1255_v19, %v1243_v18  ;;  %v3050_v10 = vld [vmem:[%s5207_s7 + $0x168] sm:$0xff]  ;;  %v3049_v18 = vld [vmem:[%s5207_s7 + $0x160] sm:$0xff]  ;;  %v3048_v19 = vld [vmem:[%s5207_s7 + $0x158] sm:$0xff] }
 0x30f   :  { %v1274_v24 = vsel %vm1270_vm13, %v1271_v13, %v1273_v20  ;;  %1288 = vst [vmem:[#allocation4 + $0x20] sm:$0x3] %v1273_v20  ;;  %v1275_v25 = vrot.slane %v1259_v22, 6  ;;  %v3056_v13 = vld [vmem:[%s5207_s7 + $0x198] sm:$0xff]  ;;  %v3047_v20 = vld [vmem:[%s5207_s7 + $0x150] sm:$0xff]  ;;  %v3046_v22 = vld [vmem:[%s5207_s7 + $0x148] sm:$0xff] }
 0x310   :  { %v1359_v42 = vrot.slane %v1274_v24, 2  ;;  %v1558_v43 = vrot.slane %v1274_v24, 4  ;;  %v3045_v24 = vld [vmem:[%s5207_s7 + $0x140] sm:$0xff] }
 0x311   :  { %v1276_v26 = vsel %vm1270_vm13, %v1272_v17, %v1275_v25  ;;  %1289 = vst.msk [vmem:[#allocation4 + $0x28] sm:$0x3] %vm788_vm9, %v1275_v25  ;;  %v3051_v17 = vld [vmem:[%s5207_s7 + $0x170] sm:$0xff]  ;;  %v3084_v25 = vld [vmem:[%s5207_s7 + $0x278] sm:$0xff] }
 0x312   :  { %1287 = vst.msk [vmem:[#allocation4 + $0x18] sm:$0xff] %vm74_vm0, %v1276_v26  ;;  %v1290_v28 = vld [vmem:[#allocation4] sm:$0xfc]  ;;  %v3083_v26 = vld [vmem:[%s5207_s7 + $0x270] sm:$0xff] }
 0x313   :  { %v1296_v29 = vld [vmem:[#allocation4] sm:$0xf0]  ;;  %v1358_v35 = vrot.slane %v1290_v28, 2 }
 0x314   :  { %v1291_v27 = vld [vmem:[#allocation4 + $0x8] sm:$0xfc]  ;;  %v1557_v36 = vrot.slane %v1296_v29, 4  ;;  %v3081_v28 = vld [vmem:[%s5207_s7 + $0x260] sm:$0xff]  ;;  %v3080_v29 = vld [vmem:[%s5207_s7 + $0x258] sm:$0xff] }
 0x315   :  { %v1297_v30 = vld [vmem:[#allocation4 + $0x8] sm:$0xf0]  ;;  %v1361_v34 = vrot.slane %v1291_v27, 2  ;;  %v4468_v49 = vsel %vm901_vm10, %v1358_v35, %v1359_v42  ;;  %v1893_v35 = vld [vmem:[%s5209_s9 + $0xf0] sm:$0xff] }
 0x316   :  { %v1560_v38 = vrot.slane %v1297_v30, 4  ;;  %v1294_v41 = vld [vmem:[#allocation4 + $0x20] sm:$0x3]  ;;  %v1559_v50 = vsel %vm1126_vm11, %v1557_v36, %v1558_v43  ;;  %v3082_v27 = vld [vmem:[%s5207_s7 + $0x268] sm:$0xff]  ;;  %v3079_v30 = vld [vmem:[%s5207_s7 + $0x250] sm:$0xff] }
 0x317   :  { %v1298_v45 = vld [vmem:[#allocation4 + $0x20] sm:$0xf]  ;;  %v1364_v52 = vrot.slane %v1294_v41, 2  ;;  %v3160_v36 = vld [vmem:[%s5209_s9 + $0x218] sm:$0xff] }
 0x318   :  { %v1295_v31 = vld [vmem:[#allocation4 + $0x28] sm:$0x3]  ;;  %v1563_v55 = vrot.slane %v1298_v45, 4  ;;  %1980 = vmatprep.subr.mxu1 %v3160_v36  ;;  %v1890_v41 = vld [vmem:[%s5209_s9 + $0xd8] sm:$0xff] }
 0x319   :  { %v1299_v32 = vld [vmem:[#allocation4 + $0x28] sm:$0xf]  ;;  %v1293_v33 = vld [vmem:[#allocation4 + $0x18] sm:$0xff]  ;;  %v1366_v40 = vrot.slane %v1295_v31, 2  ;;  %v4492_v59 = vsel %vm901_vm10, %v1359_v42, %v1364_v52  ;;  %v3157_v42 = vld [vmem:[%s5209_s9 + $0x200] sm:$0xff] }
 0x31a   :  { %v1362_v37 = vrot.slane %v1293_v33, 2  ;;  %v1561_v39 = vrot.slane %v1293_v33, 4  ;;  %v1565_v44 = vrot.slane %v1299_v32, 4  ;;  %v1564_v61 = vsel %vm1126_vm11, %v1558_v43, %v1563_v55  ;;  %v3078_v31 = vld [vmem:[%s5207_s7 + $0x248] sm:$0xff]  ;;  %v3077_v32 = vld [vmem:[%s5207_s7 + $0x240] sm:$0xff]  ;;  %v4603_v33 = vld [vmem:[#allocation5] sm:$0xff] }
 0x31b   :  { %1753 = vst.msk [vmem:[#allocation5 + $0x8] sm:$0xff] %vm1752_vm14, %v4603_v33  ;;  %1755 = vst.msk [vmem:[#allocation5 + $0x18] sm:$0xff] %vm1752_vm14, %v4603_v33  ;;  %v1889_v43 = vld [vmem:[%s5209_s9 + $0xd0] sm:$0xff]  ;;  %v1888_v45 = vld [vmem:[%s5209_s9 + $0xc8] sm:$0xff] }
 0x31c   :  { %v1363_v46 = vsel %vm901_vm10, %v1361_v34, %v1362_v37  ;;  %v1562_v47 = vsel %vm1126_vm11, %v1560_v38, %v1561_v39  ;;  %v4476_v53 = vsel %vm901_vm10, %v1362_v37, %v1366_v40  ;;  %v1566_v56 = vsel %vm1126_vm11, %v1561_v39, %v1565_v44  ;;  %1757 = vst.msk [vmem:[#allocation5 + $0x28] sm:$0xff] %vm1752_vm14, %v4603_v33  ;;  %v1894_v34 = vld [vmem:[%s5209_s9 + $0xf8] sm:$0xff]  ;;  %v1892_v37 = vld [vmem:[%s5209_s9 + $0xe8] sm:$0xff]  ;;  %v3159_v38 = vld [vmem:[%s5209_s9 + $0x210] sm:$0xff] }
 0x31d   :  { %3043 = vmatprep.mubr.msk.f32.mxu0 %vm74_vm0, %v1363_v46  ;;  %3125 = vmatprep.mubr.msk.f32.mxu1 %vm74_vm0, %v1562_v47  ;;  %1759 = vst.msk [vmem:[#allocation5 + $0x38] sm:$0xff] %vm1752_vm14, %v4603_v33  ;;  %2400 = vst.msk [vmem:[#allocation6 + $0x8] sm:$0xff] %vm1752_vm14, %v4603_v33  ;;  %v1891_v39 = vld [vmem:[%s5209_s9 + $0xe0] sm:$0xff]  ;;  %v3158_v40 = vld [vmem:[%s5209_s9 + $0x208] sm:$0xff] }
 0x31e   :  { %1439 = vmatmul.mubr.f32.vlgmr.msra.gmra.mxu0 %v4468_v49  ;;  %1638 = vmatmul.mubr.f32.vlgmr.msra.gmra.mxu1 %v1559_v50  ;;  %2402 = vst.msk [vmem:[#allocation6 + $0x18] sm:$0xff] %vm1752_vm14, %v4603_v33  ;;  %2404 = vst.msk [vmem:[#allocation6 + $0x28] sm:$0xff] %vm1752_vm14, %v4603_v33  ;;  %v3156_v44 = vld [vmem:[%s5209_s9 + $0x1f8] sm:$0xff]  ;;  %v1887_v47 = vld [vmem:[%s5209_s9 + $0xc0] sm:$0xff] }
 0x31f   :  { %1651 = vmatpush1.msra.mxu0 %v3075_v48  ;;  %3044 = vmatprep.mubr.msk.f32.mxu0 %vm74_vm0, %v4476_v53  ;;  %2406 = vst.msk [vmem:[#allocation6 + $0x38] sm:$0xff] %vm1752_vm14, %v4603_v33  ;;  %v3154_v48 = vld [vmem:[%s5209_s9 + $0x1e8] sm:$0xff]  ;;  %v3153_v50 = vld [vmem:[%s5209_s9 + $0x1e0] sm:$0xff]  ;;  %v3152_v52 = vld [vmem:[%s5209_s9 + $0x1d8] sm:$0xff] }
 0x320   :  { %3126 = vmatprep.mubr.msk.f32.mxu1 %vm74_vm0, %v1566_v56  ;;  %1652 = vmatprep.subr.mxu0 %v3074_v51  ;;  %v1885_v51 = vld [vmem:[%s5209_s9 + $0xb0] sm:$0xff]  ;;  %v1883_v55 = vld [vmem:[%s5209_s9 + $0xa0] sm:$0xff]  ;;  %v3150_v56 = vld [vmem:[%s5209_s9 + $0x1c8] sm:$0xff]  ;;  %1762 = vst.msk [vmem:[#allocation5 + $0x48] sm:$0xf] %vm1761_vm15, %v4603_v33 }
 0x321   :  { %1653 = vmatpush1.msra.mxu0 %v3073_v54  ;;  %1981 = vmatpush1.msra.mxu1 %v3159_v38  ;;  %v3151_v54 = vld [vmem:[%s5209_s9 + $0x1d0] sm:$0xff]  ;;  %2408 = vst.msk [vmem:[#allocation6 + $0x48] sm:$0xf] %vm1761_vm15, %v4603_v33  ;;  %v1898_v36 = vld [vmem:[%s5209_s9 + $0x118] sm:$0xff] }
 0x322   :  { %1654 = vmatprep.subr.mxu0 %v3072_v57  ;;  %1445 = vmatmul.mubr.f32.gmra.mxu0 %v4492_v59  ;;  %v1882_v57 = vld [vmem:[%s5209_s9 + $0x98] sm:$0xff]  ;;  %v1897_v38 = vld [vmem:[%s5209_s9 + $0x110] sm:$0xff] }
 0x323   :  { %1644 = vmatmul.mubr.f32.gmra.mxu1 %v1564_v61  ;;  %1655 = vmatpush1.msra.mxu0 %v3071_v58  ;;  %v3149_v58 = vld [vmem:[%s5209_s9 + $0x1c0] sm:$0xff]  ;;  %v1880_v61 = vld [vmem:[%s5209_s9 + $0x88] sm:$0xff] }
 0x324   :  { %1656 = vmatprep.subr.mxu0 %v3070_v60  ;;  %3127 = vmatprep.mubr.msk.f32.mxu0 %vm74_vm0, %v1363_v46  ;;  %v3155_v46 = vld [vmem:[%s5209_s9 + $0x1f0] sm:$0xff]  ;;  %v3148_v60 = vld [vmem:[%s5209_s9 + $0x1b8] sm:$0xff] }
 0x325   :  { %1657 = vmatpush1.msra.mxu0 %v3069_v62  ;;  %1982 = vmatprep.subr.mxu1 %v3158_v40  ;;  %v3147_v62 = vld [vmem:[%s5209_s9 + $0x1b0] sm:$0xff]  ;;  %v1896_v40 = vld [vmem:[%s5209_s9 + $0x108] sm:$0xff] }
 0x326   :  { %1658 = vmatprep.subr.mxu0 %v3068_v63  ;;  %1983 = vmatpush1.msra.mxu1 %v3157_v42  ;;  %v1879_v63 = vld [vmem:[%s5209_s9 + $0x80] sm:$0xff] }
 0x327   :  { %1659 = vmatpush1.msra.mxu0 %v3067_v1  ;;  %1984 = vmatprep.subr.mxu1 %v3156_v44  ;;  %v3146_v1 = vld [vmem:[%s5209_s9 + $0x1a8] sm:$0xff]  ;;  %v1895_v42 = vld [vmem:[%s5209_s9 + $0x100] sm:$0xff] }
 0x328   :  { %1660 = vmatprep.subr.mxu0 %v3066_v0  ;;  %1985 = vmatpush1.msra.mxu1 %v3155_v46  ;;  %v1878_v0 = vld [vmem:[%s5209_s9 + $0x78] sm:$0xff]  ;;  %v3161_v44 = vld [vmem:[%s5209_s9 + $0x220] sm:$0xff] }
 0x329   :  { %1661 = vmatpush1.msra.mxu0 %v3065_v2  ;;  %1986 = vmatprep.subr.mxu1 %v3154_v48  ;;  %v3145_v2 = vld [vmem:[%s5209_s9 + $0x1a0] sm:$0xff] }
 0x32a   :  { %1662 = vmatprep.subr.mxu0 %v3064_v3  ;;  %1987 = vmatpush1.msra.mxu1 %v3153_v50  ;;  %v1877_v3 = vld [vmem:[%s5209_s9 + $0x70] sm:$0xff]  ;;  %v1300_v46 = vld [vmem:[%s5208_s8] sm:$0x3] }
 0x32b   :  { %1663 = vmatpush1.msra.mxu0 %v3063_v4  ;;  %1988 = vmatprep.subr.mxu1 %v3152_v52  ;;  %v3144_v4 = vld [vmem:[%s5209_s9 + $0x198] sm:$0xff]  ;;  %v4850_v48 = vrot.slane %v1300_v46, %v4055_v23 }
 0x32c   :  { %1664 = vmatprep.subr.mxu0 %v3062_v5  ;;  %1989 = vmatpush1.msra.mxu1 %v3151_v54  ;;  %v1876_v5 = vld [vmem:[%s5209_s9 + $0x68] sm:$0xff] }
 0x32d   :  { %1665 = vmatpush1.msra.mxu0 %v3061_v7  ;;  %1990 = vmatprep.subr.mxu1 %v3150_v56  ;;  %v3143_v7 = vld [vmem:[%s5209_s9 + $0x190] sm:$0xff] }
 0x32e   :  { %1666 = vmatprep.subr.mxu0 %v3060_v8  ;;  %1991 = vmatpush1.msra.mxu1 %v3149_v58  ;;  %v1875_v8 = vld [vmem:[%s5209_s9 + $0x60] sm:$0xff] }
 0x32f   :  { %1667 = vmatpush1.msra.mxu0 %v3059_v9  ;;  %1992 = vmatprep.subr.mxu1 %v3148_v60  ;;  %v3142_v9 = vld [vmem:[%s5209_s9 + $0x188] sm:$0xff] }
 0x330   :  { %1668 = vmatprep.subr.mxu0 %v3058_v11  ;;  %1993 = vmatpush1.msra.mxu1 %v3147_v62  ;;  %v1874_v11 = vld [vmem:[%s5209_s9 + $0x58] sm:$0xff] }
 0x331   :  { %1669 = vmatpush1.msra.mxu0 %v3057_v12  ;;  %1994 = vmatprep.subr.mxu1 %v3146_v1  ;;  %v3141_v12 = vld [vmem:[%s5209_s9 + $0x180] sm:$0xff] }
 0x332   :  { %1670 = vmatprep.subr.mxu0 %v3056_v13  ;;  %1995 = vmatpush1.msra.mxu1 %v3145_v2  ;;  %v1873_v13 = vld [vmem:[%s5209_s9 + $0x50] sm:$0xff] }
 0x333   :  { %1671 = vmatpush1.msra.mxu0 %v3055_v14  ;;  %1996 = vmatprep.subr.mxu1 %v3144_v4  ;;  %v3140_v14 = vld [vmem:[%s5209_s9 + $0x178] sm:$0xff] }
 0x334   :  { %1672 = vmatprep.subr.mxu0 %v3054_v15  ;;  %1997 = vmatpush1.msra.mxu1 %v3143_v7  ;;  %v1872_v15 = vld [vmem:[%s5209_s9 + $0x48] sm:$0xff] }
 0x335   :  { %1673 = vmatpush1.msra.mxu0 %v3053_v6  ;;  %1998 = vmatprep.subr.mxu1 %v3142_v9  ;;  %v3139_v6 = vld [vmem:[%s5209_s9 + $0x170] sm:$0xff] }
 0x336   :  { %1674 = vmatprep.subr.mxu0 %v3052_v16  ;;  %1999 = vmatpush1.msra.mxu1 %v3141_v12  ;;  %v1871_v16 = vld [vmem:[%s5209_s9 + $0x40] sm:$0xff] }
 0x337   :  { %1675 = vmatpush1.msra.mxu0 %v3051_v17  ;;  %2000 = vmatprep.subr.mxu1 %v3140_v14  ;;  %v3138_v17 = vld [vmem:[%s5209_s9 + $0x168] sm:$0xff] }
 0x338   :  { %1676 = vmatprep.subr.mxu0 %v3050_v10  ;;  %2001 = vmatpush1.msra.mxu1 %v3139_v6  ;;  %v1870_v10 = vld [vmem:[%s5209_s9 + $0x38] sm:$0xff] }
 0x339   :  { %1677 = vmatpush1.msra.mxu0 %v3049_v18  ;;  %2002 = vmatprep.subr.mxu1 %v3138_v17  ;;  %v3137_v18 = vld [vmem:[%s5209_s9 + $0x160] sm:$0xff] }
 0x33a   :  { %1678 = vmatprep.subr.mxu0 %v3048_v19  ;;  %v1869_v19 = vld [vmem:[%s5209_s9 + $0x30] sm:$0xff]  ;;  %2003 = vmatpush1.msra.mxu1 %v3137_v18 }
 0x33b   :  { %1679 = vmatpush1.msra.mxu0 %v3047_v20  ;;  %v3136_v20 = vld [vmem:[%s5209_s9 + $0x158] sm:$0xff] }
 0x33c   :  { %1680 = vmatprep.subr.mxu0 %v3046_v22  ;;  %v1868_v22 = vld [vmem:[%s5209_s9 + $0x28] sm:$0xff]  ;;  %2004 = vmatprep.subr.mxu1 %v3136_v20 }
 0x33d   :  { %1681 = vmatpush1.msra.mxu0 %v3045_v24  ;;  %v3135_v24 = vld [vmem:[%s5209_s9 + $0x150] sm:$0xff] }
 0x33e   :  { %1706 = vmatprep.subr.mxu0 %v3084_v25  ;;  %v1867_v25 = vld [vmem:[%s5209_s9 + $0x20] sm:$0xff]  ;;  %2005 = vmatpush1.msra.mxu1 %v3135_v24 }
 0x33f   :  { %1707 = vmatpush2.msra.mxu0 %v3083_v26  ;;  %v3134_v26 = vld [vmem:[%s5209_s9 + $0x148] sm:$0xff] }
 0x340   :  { %1708 = vmatprep.subr.mxu0 %v3082_v27  ;;  %v1866_v27 = vld [vmem:[%s5209_s9 + $0x18] sm:$0xff]  ;;  %2006 = vmatprep.subr.mxu1 %v3134_v26 }
 0x341   :  { %1709 = vmatpush2.msra.mxu0 %v3081_v28  ;;  %v3133_v28 = vld [vmem:[%s5209_s9 + $0x140] sm:$0xff] }
 0x342   :  { %1710 = vmatprep.subr.mxu0 %v3080_v29  ;;  %v1865_v29 = vld [vmem:[%s5209_s9 + $0x10] sm:$0xff]  ;;  %2007 = vmatpush1.msra.mxu1 %v3133_v28 }
 0x343   :  { %1711 = vmatpush2.msra.mxu0 %v3079_v30  ;;  %v3132_v30 = vld [vmem:[%s5209_s9 + $0x138] sm:$0xff] }
 0x344   :  { %1712 = vmatprep.subr.mxu0 %v3078_v31  ;;  %v1864_v31 = vld [vmem:[%s5209_s9 + $0x8] sm:$0xff]  ;;  %2008 = vmatprep.subr.mxu1 %v3132_v30 }
 0x345   :  { %1713 = vmatpush2.msra.mxu0 %v3077_v32  ;;  %v3131_v32 = vld [vmem:[%s5209_s9 + $0x130] sm:$0xff] }
 0x346   :  { %1715 = vmatmul.mubr.f32.vlgmr.msra.gmra.mxu0 %v4468_v49  ;;  %2078 = vmatprep.subr.mxu0 %v1894_v34  ;;  %v1886_v49 = vld [vmem:[%s5209_s9 + $0xb8] sm:$0xff]  ;;  %v1863_v34 = vld [vmem:[%s5209_s9] sm:$0xff] }
 0x347   :  { %3128 = vmatprep.mubr.msk.f32.mxu0 %vm74_vm0, %v4476_v53  ;;  %2079 = vmatpush1.msra.mxu0 %v1893_v35  ;;  %v1884_v53 = vld [vmem:[%s5209_s9 + $0xa8] sm:$0xff]  ;;  %vm1786_vm0 = vcmask 130054  }
 0x348   :  { %2080 = vmatprep.subr.mxu0 %v1892_v37  ;;  %v3130_v35 = vld [vmem:[%s5209_s9 + $0x128] sm:$0xff]  ;;  %2009 = vmatpush1.msra.mxu1 %v3131_v32  ;;  %v3129_v37 = vld [vmem:[%s5209_s9 + $0x120] sm:$0xff] }
 0x349   :  { %2081 = vmatpush1.msra.mxu0 %v1891_v39  ;;  %2010 = vmatprep.subr.mxu1 %v3130_v35  ;;  %v3164_v39 = vld [vmem:[%s5209_s9 + $0x238] sm:$0xff] }
 0x34a   :  { %1721 = vmatmul.mubr.f32.gmra.mxu0 %v4492_v59  ;;  %2082 = vmatprep.subr.mxu0 %v1890_v41  ;;  %v1881_v59 = vld [vmem:[%s5209_s9 + $0x90] sm:$0xff] }
 0x34b   :  { %2083 = vmatpush1.msra.mxu0 %v1889_v43  ;;  %v3163_v41 = vld [vmem:[%s5209_s9 + $0x230] sm:$0xff]  ;;  %2011 = vmatpush1.msra.mxu1 %v3129_v37  ;;  %v3162_v43 = vld [vmem:[%s5209_s9 + $0x228] sm:$0xff] }
 0x34c   :  { %2084 = vmatprep.subr.mxu0 %v1888_v45  ;;  %2040 = vmatprep.subr.mxu1 %v3164_v39  ;;  %v3204_v45 = vld [vmem:[%s5209_s9 + $0x338] sm:$0xff] }
 0x34d   :  { %2085 = vmatpush1.msra.mxu0 %v1887_v47  ;;  %2041 = vmatpush2.msra.mxu1 %v3163_v41  ;;  %v4847_v47 = vrot.slane %v1300_v46, %v4050_v21 }
 0x34e   :  { %2086 = vmatprep.subr.mxu0 %v1886_v49  ;;  %2042 = vmatprep.subr.mxu1 %v3162_v43 }
 0x34f   :  { %2087 = vmatpush1.msra.mxu0 %v1885_v51  ;;  %2043 = vmatpush2.msra.mxu1 %v3161_v44 }
 0x350   :  { %2088 = vmatprep.subr.mxu0 %v1884_v53  ;;  %2242 = vmatprep.subr.mxu1 %v3204_v45 }
 0x351   :  { %2089 = vmatpush1.msra.mxu0 %v1883_v55 }
 0x352   :  { %2090 = vmatprep.subr.mxu0 %v1882_v57 }
 0x353   :  { %2091 = vmatpush1.msra.mxu0 %v1881_v59 }
 0x354   :  { %2092 = vmatprep.subr.mxu0 %v1880_v61 }
 0x355   :  { %2093 = vmatpush1.msra.mxu0 %v1879_v63 }
 0x356   :  { %2094 = vmatprep.subr.mxu0 %v1878_v0 }
 0x357   :  { %2095 = vmatpush1.msra.mxu0 %v1877_v3 }
 0x358   :  { %2096 = vmatprep.subr.mxu0 %v1876_v5 }
 0x359   :  { %2097 = vmatpush1.msra.mxu0 %v1875_v8 }
 0x35a   :  { %2098 = vmatprep.subr.mxu0 %v1874_v11 }
 0x35b   :  { %2099 = vmatpush1.msra.mxu0 %v1873_v13 }
 0x35c   :  { %2100 = vmatprep.subr.mxu0 %v1872_v15 }
 0x35d   :  { %2101 = vmatpush1.msra.mxu0 %v1871_v16 }
 0x35e   :  { %2102 = vmatprep.subr.mxu0 %v1870_v10 }
 0x35f   :  { %2103 = vmatpush1.msra.mxu0 %v1869_v19 }
 0x360   :  { %2104 = vmatprep.subr.mxu0 %v1868_v22 }
 0x361   :  { %2105 = vmatpush1.msra.mxu0 %v1867_v25 }
 0x362   :  { %2106 = vmatprep.subr.mxu0 %v1866_v27 }
 0x363   :  { %2107 = vmatpush1.msra.mxu0 %v1865_v29 }
 0x364   :  { %2108 = vmatprep.subr.mxu0 %v1864_v31 }
 0x365   :  { %2109 = vmatpush1.msra.mxu0 %v1863_v34 }
 0x366   :  { %2138 = vmatprep.subr.mxu0 %v1898_v36 }
 0x367   :  { %2139 = vmatpush2.msra.mxu0 %v1897_v38 }
 0x368   :  { %2140 = vmatprep.subr.mxu0 %v1896_v40 }
 0x369   :  { %2141 = vmatpush2.msra.mxu0 %v1895_v42 }
 0x36a   :  { %2531 = vmatprep.subr.mxu0 %v4603_v33 }
 0x3de   :  { %v1440_v49 = vpop.f32.mrf.mxu0  ;;  %v1639_v27 = vpop.f32.mrf.mxu1 }
 0x3df   :  { %v1441_v50 = vadd.f32 %v1440_v49, %v4847_v47 }
 0x3e0   :  { %v1442_v51 = vpop.f32.mrf.mxu0  ;;  %v1641_v28 = vpop.f32.mrf.mxu1 }
 0x3e1   :  { %v1455_v52 = vmul.f32 0.70710677, %v1441_v50  ;;  %v1443_v53 = vadd.f32 %v1442_v51, %v4850_v48  ;;  %v1451_v62 = vmul.f32 0.5, %v1441_v50 }
 0x3e2   :  { %v1446_v54 = vpop.f32.mrf.mxu0 }
 0x3e3   :  { %3319 = verf.f32 %v1455_v52  ;;  %v1456_v55 = vmul.f32 0.70710677, %v1443_v53  ;;  %v1447_v56 = vadd.f32 %v1446_v54, %v4847_v47  ;;  %v1452_v2 = vmul.f32 0.5, %v1443_v53  ;;  %v1645_v32 = vpop.f32.mrf.mxu1 }
 0x3e4   :  { %v1448_v57 = vpop.f32.mrf.mxu0 }
 0x3e5   :  { %3321 = verf.f32 %v1456_v55  ;;  %v1457_v58 = vmul.f32 0.70710677, %v1447_v56  ;;  %v1449_v59 = vadd.f32 %v1448_v57, %v4850_v48  ;;  %v1453_v12 = vmul.f32 0.5, %v1447_v56  ;;  %v1647_v41 = vpop.f32.mrf.mxu1 }
 0x3e7   :  { %3323 = verf.f32 %v1457_v58  ;;  %v1458_v60 = vmul.f32 0.70710677, %v1449_v59  ;;  %v1454_v14 = vmul.f32 0.5, %v1449_v59 }
 0x3e9   :  { %3325 = verf.f32 %v1458_v60 }
 0x3f0   :  { %v3320_v61 = vpop.eup %3319 }
 0x3f1   :  { %v1463_v63 = vadd.f32 1.0, %v3320_v61 }
 0x3f2   :  { %v3322_v1 = vpop.eup %3321 }
 0x3f3   :  { %v1467_v0 = vmul.f32 %v1463_v63, %v1451_v62  ;;  %v1464_v3 = vadd.f32 1.0, %v3322_v1 }
 0x3f4   :  { %v3324_v4 = vpop.eup %3323 }
 0x3f5   :  { %v1765_v5 = vrot.slane %v1467_v0, 6  ;;  %v1781_v7 = vrot.slane %v1467_v0, 4  ;;  %v1795_v8 = vrot.slane %v1467_v0, 2  ;;  %1803 = vst [vmem:[#allocation5 + $0x10] sm:$0xc0] %v1467_v0  ;;  %v1468_v9 = vmul.f32 %v1464_v3, %v1452_v2 }
 0x3f6   :  { %v3326_v11 = vpop.eup %3325  ;;  %v1465_v13 = vadd.f32 1.0, %v3324_v4 }
 0x3f7   :  { %1769 = vst [vmem:[#allocation5] sm:$0xc] %v1765_v5  ;;  %1785 = vst [vmem:[#allocation5] sm:$0xc0] %v1781_v7  ;;  %v1766_v15 = vrot.slane %v1468_v9, 6  ;;  %v1782_v6 = vrot.slane %v1468_v9, 4 }
 0x3f8   :  { %1799 = vst [vmem:[#allocation5 + $0x10] sm:$0xc] %v1795_v8  ;;  %v1796_v16 = vrot.slane %v1468_v9, 2  ;;  %1804 = vst.msk [vmem:[#allocation5 + $0x18] sm:$0xc0] %vm1786_vm0, %v1468_v9  ;;  %v1466_v17 = vadd.f32 1.0, %v3326_v11  ;;  %v1469_v10 = vmul.f32 %v1465_v13, %v1453_v12 }
 0x3f9   :  { %1771 = vst.msk [vmem:[#allocation5 + $0x8] sm:$0xc] %vm1770_vm1, %v1766_v15 }
 0x3fa   :  { %1787 = vst.msk [vmem:[#allocation5 + $0x8] sm:$0xc0] %vm1786_vm0, %v1782_v6  ;;  %v1470_v18 = vmul.f32 %v1466_v17, %v1454_v14  ;;  %v1813_v19 = vrot.slane %v1469_v10, 6  ;;  %v1827_v20 = vrot.slane %v1469_v10, 4  ;;  %v1839_v22 = vrot.slane %v1469_v10, 2 }
 0x3fb   :  { %1800 = vst.msk [vmem:[#allocation5 + $0x18] sm:$0xc] %vm1770_vm1, %v1796_v16  ;;  %1847 = vst [vmem:[#allocation5 + $0x30] sm:$0xc0] %v1469_v10 }
 0x3fc   :  { %v1814_v24 = vrot.slane %v1470_v18, 6  ;;  %v1828_v25 = vrot.slane %v1470_v18, 4  ;;  %v1840_v26 = vrot.slane %v1470_v18, 2  ;;  %1848 = vst.msk [vmem:[#allocation5 + $0x38] sm:$0xc0] %vm1786_vm0, %v1470_v18 }
 0x3fd   :  { %1817 = vst [vmem:[#allocation5 + $0x20] sm:$0xc] %v1813_v19  ;;  %1831 = vst [vmem:[#allocation5 + $0x20] sm:$0xc0] %v1827_v20 }
 0x3fe   :  { %1843 = vst [vmem:[#allocation5 + $0x30] sm:$0xc] %v1839_v22  ;;  %1818 = vst.msk [vmem:[#allocation5 + $0x28] sm:$0xc] %vm1770_vm1, %v1814_v24 }
 0x3ff   :  { %1832 = vst.msk [vmem:[#allocation5 + $0x28] sm:$0xc0] %vm1786_vm0, %v1828_v25  ;;  %v3203_v25 = vld [vmem:[%s5209_s9 + $0x330] sm:$0xff] }
 0x400   :  { %1844 = vst.msk [vmem:[#allocation5 + $0x38] sm:$0xc] %vm1770_vm1, %v1840_v26 }
 0x406   :  { %v1716_v29 = vpop.f32.mrf.mxu0 }
 0x407   :  { %v1717_v30 = vadd.f32 %v1716_v29, %v1639_v27 }
 0x408   :  { %v1718_v31 = vpop.f32.mrf.mxu0 }
 0x409   :  { %v1727_v34 = vadd.f32 %v1717_v30, %v4847_v47  ;;  %v1719_v35 = vadd.f32 %v1718_v31, %v1641_v28  ;;  %v3202_v28 = vld [vmem:[%s5209_s9 + $0x328] sm:$0xff]  ;;  %v3201_v30 = vld [vmem:[%s5209_s9 + $0x320] sm:$0xff] }
 0x40a   :  { %v1722_v36 = vpop.f32.mrf.mxu0 }
 0x40b   :  { %v1735_v37 = vmul.f32 0.70710677, %v1727_v34  ;;  %v1728_v38 = vadd.f32 %v1719_v35, %v4850_v48  ;;  %v1723_v39 = vadd.f32 %v1722_v36, %v1645_v32  ;;  %v1731_v51 = vmul.f32 0.5, %v1727_v34  ;;  %v3200_v35 = vld [vmem:[%s5209_s9 + $0x318] sm:$0xff] }
 0x40c   :  { %v1724_v40 = vpop.f32.mrf.mxu0 }
 0x40d   :  { %3327 = verf.f32 %v1735_v37  ;;  %v1736_v42 = vmul.f32 0.70710677, %v1728_v38  ;;  %v1729_v43 = vadd.f32 %v1723_v39, %v4847_v47  ;;  %v1725_v44 = vadd.f32 %v1724_v40, %v1647_v41  ;;  %v3199_v40 = vld [vmem:[%s5209_s9 + $0x310] sm:$0xff] }
 0x40e   :  { %v1732_v55 = vmul.f32 0.5, %v1728_v38 }
 0x40f   :  { %3329 = verf.f32 %v1736_v42  ;;  %v1737_v45 = vmul.f32 0.70710677, %v1729_v43  ;;  %v1730_v46 = vadd.f32 %v1725_v44, %v4850_v48  ;;  %v1733_v61 = vmul.f32 0.5, %v1729_v43  ;;  %v3198_v42 = vld [vmem:[%s5209_s9 + $0x308] sm:$0xff] }
 0x411   :  { %3331 = verf.f32 %v1737_v45  ;;  %v1738_v49 = vmul.f32 0.70710677, %v1730_v46  ;;  %v1734_v3 = vmul.f32 0.5, %v1730_v46  ;;  %v3197_v45 = vld [vmem:[%s5209_s9 + $0x300] sm:$0xff] }
 0x413   :  { %3333 = verf.f32 %v1738_v49 }
 0x41a   :  { %v3328_v50 = vpop.eup %3327 }
 0x41b   :  { %v1743_v52 = vadd.f32 1.0, %v3328_v50  ;;  %v3196_v50 = vld [vmem:[%s5209_s9 + $0x2f8] sm:$0xff] }
 0x41c   :  { %v3330_v53 = vpop.eup %3329 }
 0x41d   :  { %v1747_v54 = vmul.f32 %v1743_v52, %v1731_v51  ;;  %v1744_v56 = vadd.f32 1.0, %v3330_v53  ;;  %v3195_v52 = vld [vmem:[%s5209_s9 + $0x2f0] sm:$0xff] }
 0x41e   :  { %v3332_v57 = vpop.eup %3331 }
 0x41f   :  { %v1774_v58 = vrot.slane %v1747_v54, 4  ;;  %v1788_v59 = vrot.slane %v1747_v54, 2  ;;  %1801 = vst [vmem:[#allocation5 + $0x10] sm:$0x30] %v1747_v54  ;;  %v1805_v47 = vrot.slane %v1747_v54, 6  ;;  %v1748_v60 = vmul.f32 %v1744_v56, %v1732_v55  ;;  %v3194_v54 = vld [vmem:[%s5209_s9 + $0x2e8] sm:$0xff] }
 0x420   :  { %v1745_v48 = vadd.f32 1.0, %v3332_v57  ;;  %v3334_v62 = vpop.eup %3333 }
 0x421   :  { %1778 = vst [vmem:[#allocation5] sm:$0x30] %v1774_v58  ;;  %1792 = vst [vmem:[#allocation5 + $0x10] sm:$0x3] %v1788_v59  ;;  %v1775_v63 = vrot.slane %v1748_v60, 4  ;;  %v1789_v1 = vrot.slane %v1748_v60, 2 }
 0x422   :  { %1809 = vst [vmem:[#allocation5 + $0x20] sm:$0x3] %v1805_v47  ;;  %1802 = vst.msk [vmem:[#allocation5 + $0x18] sm:$0x30] %vm1779_vm2, %v1748_v60  ;;  %v1806_v0 = vrot.slane %v1748_v60, 6  ;;  %v1749_v2 = vmul.f32 %v1745_v48, %v1733_v61  ;;  %v1746_v4 = vadd.f32 1.0, %v3334_v62 }
 0x423   :  { %1780 = vst.msk [vmem:[#allocation5 + $0x8] sm:$0x30] %vm1779_vm2, %v1775_v63  ;;  %v3193_v58 = vld [vmem:[%s5209_s9 + $0x2e0] sm:$0xff]  ;;  %v3192_v47 = vld [vmem:[%s5209_s9 + $0x2d8] sm:$0xff]  ;;  %v3191_v60 = vld [vmem:[%s5209_s9 + $0x2d0] sm:$0xff] }
 0x424   :  { %1794 = vst.msk [vmem:[#allocation5 + $0x18] sm:$0x3] %vm1793_vm3, %v1789_v1  ;;  %1810 = vst.msk [vmem:[#allocation5 + $0x28] sm:$0x3] %vm1793_vm3, %v1806_v0  ;;  %v1821_v5 = vrot.slane %v1749_v2, 4  ;;  %v1833_v7 = vrot.slane %v1749_v2, 2  ;;  %v1750_v9 = vmul.f32 %v1746_v4, %v1734_v3 }
 0x425   :  { %1845 = vst [vmem:[#allocation5 + $0x30] sm:$0x30] %v1749_v2  ;;  %v1849_v8 = vrot.slane %v1749_v2, 6  ;;  %v3190_v48 = vld [vmem:[%s5209_s9 + $0x2c8] sm:$0xff]  ;;  %v3189_v63 = vld [vmem:[%s5209_s9 + $0x2c0] sm:$0xff]  ;;  %v3188_v1 = vld [vmem:[%s5209_s9 + $0x2b8] sm:$0xff] }
 0x426   :  { %1825 = vst [vmem:[#allocation5 + $0x20] sm:$0x30] %v1821_v5  ;;  %1837 = vst [vmem:[#allocation5 + $0x30] sm:$0x3] %v1833_v7  ;;  %v1822_v11 = vrot.slane %v1750_v9, 4  ;;  %v1834_v12 = vrot.slane %v1750_v9, 2 }
 0x427   :  { %1853 = vst [vmem:[#allocation5 + $0x40] sm:$0x3] %v1849_v8  ;;  %1846 = vst.msk [vmem:[#allocation5 + $0x38] sm:$0x30] %vm1779_vm2, %v1750_v9  ;;  %v1850_v13 = vrot.slane %v1750_v9, 6  ;;  %v3187_v0 = vld [vmem:[%s5209_s9 + $0x2b0] sm:$0xff] }
 0x428   :  { %1826 = vst.msk [vmem:[#allocation5 + $0x28] sm:$0x30] %vm1779_vm2, %v1822_v11  ;;  %v4876_v14 = vld [vmem:[#allocation5 + $0x10] sm:$0xff]  ;;  %v1899_v15 = vld [vmem:[#allocation5] sm:$0xfc]  ;;  %v3186_v2 = vld [vmem:[%s5209_s9 + $0x2a8] sm:$0xff] }
 0x429   :  { %1838 = vst.msk [vmem:[#allocation5 + $0x38] sm:$0x3] %vm1793_vm3, %v1834_v12  ;;  %1854 = vst.msk [vmem:[#allocation5 + $0x48] sm:$0x3] %vm1793_vm3, %v1850_v13  ;;  %v1950_v10 = vrot.slane %v1899_v15, 2  ;;  %v1951_v18 = vrot.slane %v4876_v14, 2 }
 0x42a   :  { %v1856_v6 = vld [vmem:[#allocation5 + $0x8] sm:$0xff]  ;;  %v1855_v19 = vld [vmem:[#allocation5] sm:$0xff]  ;;  %v3185_v3 = vld [vmem:[%s5209_s9 + $0x2a0] sm:$0xff] }
 0x42b   :  { %v4878_v16 = vld [vmem:[#allocation5 + $0x18] sm:$0xff]  ;;  %v1900_v17 = vld [vmem:[#allocation5 + $0x8] sm:$0xfc]  ;;  %3169 = vmatprep.mubr.msk.f32.mxu0 %vm1752_vm14, %v1856_v6  ;;  %v1952_v27 = vsel %vm901_vm10, %v1950_v10, %v1951_v18  ;;  %v3183_v5 = vld [vmem:[%s5209_s9 + $0x290] sm:$0xff] }
 0x42c   :  { %v1954_v20 = vrot.slane %v4878_v16, 2  ;;  %v1953_v22 = vrot.slane %v1900_v17, 2  ;;  %2143 = vmatmul.mubr.f32.vlgmr.msra.gmra.mxu0 %v1855_v19  ;;  %v2168_v51 = vld [vmem:[#allocation5 + $0x8] sm:$0xf0]  ;;  %v2216_v56 = vrot.slane %v4878_v16, 4  ;;  %v3182_v7 = vld [vmem:[%s5209_s9 + $0x288] sm:$0xff] }
 0x42d   :  { %3170 = vmatprep.mubr.msk.f32.mxu0 %vm1752_vm14, %v4878_v16  ;;  %v4889_v26 = vld [vmem:[#allocation5 + $0x20] sm:$0xff]  ;;  %v4910_v37 = vld [vmem:[#allocation5 + $0x30] sm:$0xff]  ;;  %v2215_v59 = vrot.slane %v2168_v51, 4  ;;  %v3184_v4 = vld [vmem:[%s5209_s9 + $0x298] sm:$0xff] }
 0x42e   :  { %v1955_v24 = vsel %vm901_vm10, %v1953_v22, %v1954_v20  ;;  %v1956_v31 = vrot.slane %v4889_v26, 2  ;;  %v1960_v43 = vrot.slane %v4910_v37, 2  ;;  %v1901_v49 = vld [vmem:[#allocation5 + $0x40] sm:$0x3]  ;;  %v3181_v8 = vld [vmem:[%s5209_s9 + $0x280] sm:$0xff]  ;;  %v3180_v9 = vld [vmem:[%s5209_s9 + $0x278] sm:$0xff] }
 0x42f   :  { %3165 = vmatprep.mubr.msk.f32.mxu1 %vm1752_vm14, %v1955_v24  ;;  %v4896_v29 = vld [vmem:[#allocation5 + $0x28] sm:$0xff]  ;;  %v1964_v55 = vrot.slane %v1901_v49, 2  ;;  %v2217_v62 = vsel %vm1126_vm11, %v2215_v59, %v2216_v56  ;;  %v3179_v11 = vld [vmem:[%s5209_s9 + $0x270] sm:$0xff]  ;;  %v3178_v12 = vld [vmem:[%s5209_s9 + $0x268] sm:$0xff] }
 0x430   :  { %2045 = vmatmul.mubr.f32.vlgmr.msra.gmra.mxu1 %v1952_v27  ;;  %v4902_v32 = vld [vmem:[#allocation5 + $0x38] sm:$0xff]  ;;  %2149 = vmatmul.mubr.f32.gmra.mxu0 %v4876_v14  ;;  %v1958_v34 = vrot.slane %v4896_v29, 2  ;;  %v1902_v38 = vld [vmem:[#allocation5 + $0x48] sm:$0x3]  ;;  %v1957_v41 = vsel %vm901_vm10, %v1951_v18, %v1956_v31  ;;  %v1961_v53 = vsel %vm901_vm10, %v1956_v31, %v1960_v43  ;;  %v3177_v13 = vld [vmem:[%s5209_s9 + $0x260] sm:$0xff]  ;;  %v2220_v27 = vrot.slane %v4896_v29, 4 }
 0x431   :  { %2243 = vmatpush1.msra.mxu1 %v3203_v25  ;;  %v1962_v36 = vrot.slane %v4902_v32, 2  ;;  %3171 = vmatprep.mubr.msk.f32.mxu0 %vm1752_vm14, %v4896_v29  ;;  %v1966_v46 = vrot.slane %v1902_v38, 2  ;;  %v1965_v61 = vsel %vm901_vm10, %v1960_v43, %v1964_v55  ;;  %v3176_v15 = vld [vmem:[%s5209_s9 + $0x258] sm:$0xff]  ;;  %v3175_v6 = vld [vmem:[%s5209_s9 + $0x250] sm:$0xff]  ;;  %v3174_v17 = vld [vmem:[%s5209_s9 + $0x248] sm:$0xff]  ;;  %v2213_v25 = vrot.slane %v4876_v14, 4 }
 0x432   :  { %2244 = vmatprep.subr.mxu1 %v3202_v28  ;;  %v1959_v39 = vsel %vm901_vm10, %v1954_v20, %v1958_v34  ;;  %v3173_v10 = vld [vmem:[%s5209_s9 + $0x240] sm:$0xff]  ;;  %v2167_v18 = vld [vmem:[#allocation5] sm:$0xf0]  ;;  %v3208_v19 = vld [vmem:[%s5209_s9 + $0x358] sm:$0xff]  ;;  %v2218_v31 = vrot.slane %v4889_v26, 4  ;;  %v2224_v14 = vrot.slane %v4902_v32, 4 }
 0x433   :  { %2245 = vmatpush1.msra.mxu1 %v3201_v30  ;;  %3166 = vmatprep.mubr.msk.f32.mxu1 %vm1752_vm14, %v1959_v39  ;;  %v1963_v44 = vsel %vm901_vm10, %v1958_v34, %v1962_v36  ;;  %v1967_v57 = vsel %vm901_vm10, %v1962_v36, %v1966_v46  ;;  %v3207_v20 = vld [vmem:[%s5209_s9 + $0x350] sm:$0xff]  ;;  %v3206_v22 = vld [vmem:[%s5209_s9 + $0x348] sm:$0xff]  ;;  %v2212_v24 = vrot.slane %v2167_v18, 4  ;;  %v3205_v28 = vld [vmem:[%s5209_s9 + $0x340] sm:$0xff]  ;;  %v2221_v34 = vsel %vm1126_vm11, %v2216_v56, %v2220_v27 }
 0x434   :  { %2246 = vmatprep.subr.mxu1 %v3200_v35  ;;  %2051 = vmatmul.mubr.f32.gmra.mxu1 %v1957_v41  ;;  %v2170_v29 = vld [vmem:[#allocation5 + $0x48] sm:$0xf]  ;;  %v2219_v35 = vsel %vm1126_vm11, %v2213_v25, %v2218_v31  ;;  %v2222_v36 = vrot.slane %v4910_v37, 4  ;;  %v2225_v38 = vsel %vm1126_vm11, %v2220_v27, %v2224_v14  ;;  %v2169_v39 = vld [vmem:[#allocation5 + $0x40] sm:$0xf]  ;;  %v2481_v43 = vld [vmem:[#allocation7 + $0x70] sm:$0xff] }
 0x435   :  { %2155 = vmatmul.mubr.f32.gmra.mxu0 %v4889_v26  ;;  %2247 = vmatpush1.msra.mxu1 %v3199_v40  ;;  %v2214_v30 = vsel %vm1126_vm11, %v2212_v24, %v2213_v25  ;;  %v2228_v26 = vrot.slane %v2170_v29, 4  ;;  %v2226_v40 = vrot.slane %v2169_v39, 4  ;;  %v2653_v46 = vld [vmem:[#allocation7 + $0x188] sm:$0xff]  ;;  %v2479_v49 = vld [vmem:[#allocation7 + $0x60] sm:$0xff]  ;;  %v2478_v51 = vld [vmem:[#allocation7 + $0x58] sm:$0xff] }
 0x436   :  { %3167 = vmatprep.mubr.msk.f32.mxu1 %vm1752_vm14, %v1963_v44  ;;  %2248 = vmatprep.subr.mxu1 %v3198_v42  ;;  %v2223_v16 = vsel %vm1126_vm11, %v2218_v31, %v2222_v36  ;;  %v2482_v42 = vld [vmem:[#allocation7 + $0x78] sm:$0xff]  ;;  %v2654_v44 = vld [vmem:[#allocation7 + $0x190] sm:$0xff]  ;;  %v2476_v55 = vld [vmem:[#allocation7 + $0x48] sm:$0xff] }
 0x437   :  { %3172 = vmatprep.mubr.msk.f32.mxu0 %vm1752_vm14, %v4902_v32  ;;  %2249 = vmatpush1.msra.mxu1 %v3197_v45  ;;  %v2229_v32 = vsel %vm1126_vm11, %v2224_v14, %v2228_v26  ;;  %v2227_v41 = vsel %vm1126_vm11, %v2222_v36, %v2226_v40  ;;  %v2480_v45 = vld [vmem:[#allocation7 + $0x68] sm:$0xff]  ;;  %v2474_v59 = vld [vmem:[#allocation7 + $0x38] sm:$0xff] }
 0x438   :  { %2250 = vmatprep.subr.mxu1 %v3196_v50  ;;  %2057 = vmatmul.mubr.f32.gmra.mxu1 %v1961_v53  ;;  %v2652_v50 = vld [vmem:[#allocation7 + $0x180] sm:$0xff]  ;;  %v2477_v53 = vld [vmem:[#allocation7 + $0x50] sm:$0xff]  ;;  %v2649_v56 = vld [vmem:[#allocation7 + $0x168] sm:$0xff] }
 0x439   :  { %2251 = vmatpush1.msra.mxu1 %v3195_v52  ;;  %3168 = vmatprep.mubr.msk.f32.mxu1 %vm1752_vm14, %v1967_v57  ;;  %v2651_v52 = vld [vmem:[#allocation7 + $0x178] sm:$0xff]  ;;  %v2475_v57 = vld [vmem:[#allocation7 + $0x40] sm:$0xff] }
 0x43a   :  { %2161 = vmatmul.mubr.f32.gmra.mxu0 %v4910_v37  ;;  %2252 = vmatprep.subr.mxu1 %v3194_v54  ;;  %v2655_v37 = vld [vmem:[#allocation7 + $0x198] sm:$0xff]  ;;  %v2650_v54 = vld [vmem:[#allocation7 + $0x170] sm:$0xff] }
 0x43b   :  { %2253 = vmatpush1.msra.mxu1 %v3193_v58  ;;  %2532 = vmatpush1.msra.mxu0 %v2482_v42  ;;  %v2648_v58 = vld [vmem:[#allocation7 + $0x160] sm:$0xff] }
 0x43c   :  { %2254 = vmatprep.subr.mxu1 %v3192_v47  ;;  %2063 = vmatmul.mubr.f32.gmra.mxu1 %v1965_v61  ;;  %v2647_v47 = vld [vmem:[#allocation7 + $0x158] sm:$0xff]  ;;  %v2646_v61 = vld [vmem:[#allocation7 + $0x150] sm:$0xff] }
 0x43d   :  { %2255 = vmatpush1.msra.mxu1 %v3191_v60  ;;  %3209 = vmatprep.mubr.msk.f32.mxu1 %vm1752_vm14, %v2217_v62  ;;  %v2473_v60 = vld [vmem:[#allocation7 + $0x30] sm:$0xff]  ;;  %v2645_v62 = vld [vmem:[#allocation7 + $0x148] sm:$0xff] }
 0x43e   :  { %2256 = vmatprep.subr.mxu1 %v3190_v48  ;;  %2533 = vmatprep.subr.mxu0 %v4603_v33  ;;  %v2472_v48 = vld [vmem:[#allocation7 + $0x28] sm:$0xff] }
 0x43f   :  { %2257 = vmatpush1.msra.mxu1 %v3189_v63  ;;  %2534 = vmatpush1.msra.mxu0 %v2481_v43  ;;  %v2471_v63 = vld [vmem:[#allocation7 + $0x20] sm:$0xff] }
 0x440   :  { %2258 = vmatprep.subr.mxu1 %v3188_v1  ;;  %2535 = vmatprep.subr.mxu0 %v4603_v33  ;;  %v2644_v1 = vld [vmem:[#allocation7 + $0x140] sm:$0xff] }
 0x441   :  { %2259 = vmatpush1.msra.mxu1 %v3187_v0  ;;  %2536 = vmatpush1.msra.mxu0 %v2480_v45  ;;  %v2470_v0 = vld [vmem:[#allocation7 + $0x18] sm:$0xff] }
 0x442   :  { %2260 = vmatprep.subr.mxu1 %v3186_v2  ;;  %2537 = vmatprep.subr.mxu0 %v4603_v33  ;;  %v5067_v2 = vld [vmem:[#allocation6] sm:$0xff] }
 0x443   :  { %2261 = vmatpush1.msra.mxu1 %v3185_v3  ;;  %2538 = vmatpush1.msra.mxu0 %v2479_v49  ;;  %v2643_v3 = vld [vmem:[#allocation7 + $0x138] sm:$0xff] }
 0x444   :  { %2262 = vmatprep.subr.mxu1 %v3184_v4  ;;  %2539 = vmatprep.subr.mxu0 %v4603_v33  ;;  %v2469_v4 = vld [vmem:[#allocation7 + $0x10] sm:$0xff] }
 0x445   :  { %2263 = vmatpush1.msra.mxu1 %v3183_v5  ;;  %2540 = vmatpush1.msra.mxu0 %v2478_v51  ;;  %v2642_v5 = vld [vmem:[#allocation7 + $0x130] sm:$0xff] }
 0x446   :  { %2264 = vmatprep.subr.mxu1 %v3182_v7  ;;  %2541 = vmatprep.subr.mxu0 %v4603_v33  ;;  %v2641_v7 = vld [vmem:[#allocation7 + $0x128] sm:$0xff] }
 0x447   :  { %2265 = vmatpush1.msra.mxu1 %v3181_v8  ;;  %2542 = vmatpush1.msra.mxu0 %v2477_v53  ;;  %v2467_v8 = vld [vmem:[#allocation7] sm:$0xff] }
 0x448   :  { %2266 = vmatprep.subr.mxu1 %v3180_v9  ;;  %2543 = vmatprep.subr.mxu0 %v4603_v33  ;;  %v2640_v9 = vld [vmem:[#allocation7 + $0x120] sm:$0xff] }
 0x449   :  { %2267 = vmatpush1.msra.mxu1 %v3179_v11  ;;  %2544 = vmatpush1.msra.mxu0 %v2476_v55  ;;  %v2484_v11 = vld [vmem:[#allocation7 + $0x88] sm:$0xff] }
 0x44a   :  { %2268 = vmatprep.subr.mxu1 %v3178_v12  ;;  %2545 = vmatprep.subr.mxu0 %v4603_v33  ;;  %v2657_v12 = vld [vmem:[#allocation7 + $0x1a8] sm:$0xff] }
 0x44b   :  { %2269 = vmatpush1.msra.mxu1 %v3177_v13  ;;  %2546 = vmatpush1.msra.mxu0 %v2475_v57  ;;  %v2483_v13 = vld [vmem:[#allocation7 + $0x80] sm:$0xff] }
 0x44c   :  { %2270 = vmatprep.subr.mxu1 %v3176_v15  ;;  %2547 = vmatprep.subr.mxu0 %v4603_v33  ;;  %v2656_v15 = vld [vmem:[#allocation7 + $0x1a0] sm:$0xff] }
 0x44d   :  { %2271 = vmatpush1.msra.mxu1 %v3175_v6  ;;  %2548 = vmatpush1.msra.mxu0 %v2474_v59 }
 0x44e   :  { %2272 = vmatprep.subr.mxu1 %v3174_v17  ;;  %2549 = vmatprep.subr.mxu0 %v4603_v33 }
 0x44f   :  { %2273 = vmatpush1.msra.mxu1 %v3173_v10  ;;  %2550 = vmatpush1.msra.mxu0 %v2473_v60 }
 0x450   :  { %2302 = vmatprep.subr.mxu1 %v3208_v19  ;;  %2551 = vmatprep.subr.mxu0 %v4603_v33 }
 0x451   :  { %2303 = vmatpush2.msra.mxu1 %v3207_v20  ;;  %2552 = vmatpush1.msra.mxu0 %v2472_v48 }
 0x452   :  { %2304 = vmatprep.subr.mxu1 %v3206_v22  ;;  %2553 = vmatprep.subr.mxu0 %v4603_v33 }
 0x453   :  { %2305 = vmatpush2.msra.mxu1 %v3205_v28  ;;  %2554 = vmatpush1.msra.mxu0 %v2471_v63  ;;  %v2339_v28 = vld [vmem:[%s5210_s10] sm:$0x3] }
 0x454   :  { %2307 = vmatmul.mubr.f32.vlgmr.msra.gmra.mxu1 %v2214_v30  ;;  %2692 = vmatprep.subr.mxu1 %v4603_v33  ;;  %v2344_v14 = vrot.slane %v2339_v28, %v4050_v21  ;;  %v2348_v26 = vrot.slane %v2339_v28, %v4055_v23 }
 0x455   :  { %3210 = vmatprep.mubr.msk.f32.mxu1 %vm1752_vm14, %v2221_v34  ;;  %2693 = vmatpush1.msra.mxu1 %v2655_v37 }
 0x456   :  { %2694 = vmatprep.subr.mxu1 %v4603_v33  ;;  %2555 = vmatprep.subr.mxu0 %v4603_v33 }
 0x457   :  { %2695 = vmatpush1.msra.mxu1 %v2654_v44  ;;  %2556 = vmatpush1.msra.mxu0 %v2470_v0 }
 0x458   :  { %2313 = vmatmul.mubr.f32.gmra.mxu1 %v2219_v35  ;;  %2696 = vmatprep.subr.mxu1 %v4603_v33 }
 0x459   :  { %3211 = vmatprep.mubr.msk.f32.mxu1 %vm1752_vm14, %v2225_v38  ;;  %2697 = vmatpush1.msra.mxu1 %v2653_v46 }
 0x45a   :  { %2698 = vmatprep.subr.mxu1 %v4603_v33  ;;  %2557 = vmatprep.subr.mxu0 %v5067_v2 }
 0x45b   :  { %2699 = vmatpush1.msra.mxu1 %v2652_v50  ;;  %2558 = vmatpush1.msra.mxu0 %v2469_v4 }
 0x45c   :  { %2319 = vmatmul.mubr.f32.gmra.mxu1 %v2223_v16  ;;  %2700 = vmatprep.subr.mxu1 %v4603_v33 }
 0x45d   :  { %3212 = vmatprep.mubr.msk.f32.mxu1 %vm1752_vm14, %v2229_v32  ;;  %2701 = vmatpush1.msra.mxu1 %v2651_v52 }
 0x45e   :  { %2702 = vmatprep.subr.mxu1 %v4603_v33  ;;  %2559 = vmatprep.subr.mxu0 %v5067_v2 }
 0x45f   :  { %2703 = vmatpush1.msra.mxu1 %v2650_v54 }
 0x460   :  { %2325 = vmatmul.mubr.f32.gmra.mxu1 %v2227_v41  ;;  %2704 = vmatprep.subr.mxu1 %v4603_v33 }
 0x461   :  { %2705 = vmatpush1.msra.mxu1 %v2649_v56 }
 0x462   :  { %2706 = vmatprep.subr.mxu1 %v4603_v33 }
 0x463   :  { %2707 = vmatpush1.msra.mxu1 %v2648_v58 }
 0x464   :  { %2708 = vmatprep.subr.mxu1 %v4603_v33 }
 0x465   :  { %2709 = vmatpush1.msra.mxu1 %v2647_v47 }
 0x466   :  { %2710 = vmatprep.subr.mxu1 %v4603_v33 }
 0x467   :  { %2711 = vmatpush1.msra.mxu1 %v2646_v61 }
 0x468   :  { %2712 = vmatprep.subr.mxu1 %v4603_v33 }
 0x469   :  { %2713 = vmatpush1.msra.mxu1 %v2645_v62 }
 0x46a   :  { %2714 = vmatprep.subr.mxu1 %v4603_v33  ;;  %v2468_v33 = vld [vmem:[#allocation7 + $0x8] sm:$0xff] }
 0x46b   :  { %2715 = vmatpush1.msra.mxu1 %v2644_v1  ;;  %2560 = vmatpush1.msra.mxu0 %v2468_v33 }
 0x46c   :  { %2716 = vmatprep.subr.mxu1 %v5067_v2  ;;  %2561 = vmatprep.subr.mxu0 %v5067_v2 }
 0x46d   :  { %2717 = vmatpush1.msra.mxu1 %v2643_v3  ;;  %2562 = vmatpush1.msra.mxu0 %v2467_v8 }
 0x46e   :  { %2718 = vmatprep.subr.mxu1 %v5067_v2  ;;  %2591 = vmatprep.subr.mxu0 %v5067_v2 }
 0x46f   :  { %2719 = vmatpush1.msra.mxu1 %v2642_v5  ;;  %2592 = vmatpush2.msra.mxu0 %v2484_v11 }
 0x470   :  { %2720 = vmatprep.subr.mxu1 %v5067_v2  ;;  %2593 = vmatprep.subr.mxu0 %v5067_v2 }
 0x471   :  { %2721 = vmatpush1.msra.mxu1 %v2641_v7  ;;  %2594 = vmatpush2.msra.mxu0 %v2483_v13 }
 0x472   :  { %2722 = vmatprep.subr.mxu1 %v5067_v2  ;;  %2777 = vmatprep.subr.mxu0 %v5067_v2 }
 0x473   :  { %2723 = vmatpush1.msra.mxu1 %v2640_v9 }
 0x474   :  { %2752 = vmatprep.subr.mxu1 %v5067_v2 }
 0x475   :  { %2753 = vmatpush2.msra.mxu1 %v2657_v12 }
 0x476   :  { %2754 = vmatprep.subr.mxu1 %v5067_v2 }
 0x477   :  { %2755 = vmatpush2.msra.mxu1 %v2656_v15 }
 0x4ec   :  { %v2144_v19 = vpop.f32.mrf.mxu0 }
 0x4ee   :  { %v2146_v22 = vpop.f32.mrf.mxu0 }
 0x4f0   :  { %v2046_v6 = vpop.f32.mrf.mxu1  ;;  %v2150_v25 = vpop.f32.mrf.mxu0 }
 0x4f1   :  { %v2145_v34 = vadd.f32 %v2144_v19, %v2046_v6 }
 0x4f2   :  { %v2048_v17 = vpop.f32.mrf.mxu1  ;;  %v2152_v30 = vpop.f32.mrf.mxu0 }
 0x4f3   :  { %v2147_v35 = vadd.f32 %v2146_v22, %v2048_v17 }
 0x4f4   :  { %v2052_v10 = vpop.f32.mrf.mxu1 }
 0x4f5   :  { %v2156_v36 = vpop.f32.mrf.mxu0  ;;  %v2151_v16 = vadd.f32 %v2150_v25, %v2052_v10 }
 0x4f6   :  { %v2054_v18 = vpop.f32.mrf.mxu1 }
 0x4f7   :  { %v2158_v42 = vpop.f32.mrf.mxu0  ;;  %v2153_v45 = vadd.f32 %v2152_v30, %v2054_v18 }
 0x4f8   :  { %v2058_v20 = vpop.f32.mrf.mxu1 }
 0x4f9   :  { %v2157_v49 = vadd.f32 %v2156_v36, %v2058_v20 }
 0x4fa   :  { %v2060_v24 = vpop.f32.mrf.mxu1  ;;  %v2162_v53 = vpop.f32.mrf.mxu0 }
 0x4fb   :  { %v2159_v54 = vadd.f32 %v2158_v42, %v2060_v24 }
 0x4fc   :  { %v2064_v27 = vpop.f32.mrf.mxu1  ;;  %v2164_v48 = vpop.f32.mrf.mxu0 }
 0x4fd   :  { %v2163_v58 = vadd.f32 %v2162_v53, %v2064_v27 }
 0x4fe   :  { %v2066_v31 = vpop.f32.mrf.mxu1 }
 0x4ff   :  { %v2165_v0 = vadd.f32 %v2164_v48, %v2066_v31 }
 0x514   :  { %v2308_v29 = vpop.f32.mrf.mxu1 }
 0x515   :  { %v2331_v38 = vadd.f32 %v2308_v29, %v2145_v34 }
 0x516   :  { %v2310_v39 = vpop.f32.mrf.mxu1 }
 0x517   :  { %v2351_v40 = vadd.f32 %v2344_v14, %v2331_v38  ;;  %v2332_v32 = vadd.f32 %v2310_v39, %v2147_v35 }
 0x518   :  { %v2314_v41 = vpop.f32.mrf.mxu1 }
 0x519   :  { %v2367_v37 = vmul.f32 0.70710677, %v2351_v40  ;;  %v2352_v43 = vadd.f32 %v2348_v26, %v2332_v32  ;;  %v2333_v44 = vadd.f32 %v2314_v41, %v2151_v16  ;;  %v2359_v12 = vmul.f32 0.5, %v2351_v40 }
 0x51a   :  { %v2316_v46 = vpop.f32.mrf.mxu1 }
 0x51b   :  { %3335 = verf.f32 %v2367_v37  ;;  %v2368_v21 = vmul.f32 0.70710677, %v2352_v43  ;;  %v2353_v50 = vadd.f32 %v2344_v14, %v2333_v44  ;;  %v2334_v51 = vadd.f32 %v2316_v46, %v2153_v45 }
 0x51c   :  { %v2320_v52 = vpop.f32.mrf.mxu1  ;;  %v2360_v17 = vmul.f32 0.5, %v2352_v43 }
 0x51d   :  { %3337 = verf.f32 %v2368_v21  ;;  %v2369_v23 = vmul.f32 0.70710677, %v2353_v50  ;;  %v2335_v55 = vadd.f32 %v2320_v52, %v2157_v49  ;;  %v2354_v56 = vadd.f32 %v2348_v26, %v2334_v51 }
 0x51e   :  { %v2322_v57 = vpop.f32.mrf.mxu1  ;;  %v2361_v22 = vmul.f32 0.5, %v2353_v50 }
 0x51f   :  { %3339 = verf.f32 %v2369_v23  ;;  %v2355_v59 = vadd.f32 %v2344_v14, %v2335_v55  ;;  %v2336_v47 = vadd.f32 %v2322_v57, %v2159_v54  ;;  %v2370_v60 = vmul.f32 0.70710677, %v2354_v56 }
 0x520   :  { %v2326_v61 = vpop.f32.mrf.mxu1  ;;  %v2362_v31 = vmul.f32 0.5, %v2354_v56 }
 0x521   :  { %v2371_v62 = vmul.f32 0.70710677, %v2355_v59  ;;  %v2356_v63 = vadd.f32 %v2348_v26, %v2336_v47  ;;  %v2337_v1 = vadd.f32 %v2326_v61, %v2163_v58  ;;  %3341 = verf.f32 %v2370_v60 }
 0x522   :  { %v2328_v3 = vpop.f32.mrf.mxu1  ;;  %v2363_v29 = vmul.f32 0.5, %v2355_v59 }
 0x523   :  { %3343 = verf.f32 %v2371_v62  ;;  %v2372_v4 = vmul.f32 0.70710677, %v2356_v63  ;;  %v2357_v5 = vadd.f32 %v2344_v14, %v2337_v1  ;;  %v2338_v33 = vadd.f32 %v2328_v3, %v2165_v0 }
 0x524   :  { %v2364_v16 = vmul.f32 0.5, %v2356_v63 }
 0x525   :  { %3345 = verf.f32 %v2372_v4  ;;  %v2373_v7 = vmul.f32 0.70710677, %v2357_v5  ;;  %v2358_v8 = vadd.f32 %v2348_v26, %v2338_v33  ;;  %v2365_v43 = vmul.f32 0.5, %v2357_v5 }
 0x527   :  { %3347 = verf.f32 %v2373_v7  ;;  %v2374_v11 = vmul.f32 0.70710677, %v2358_v8  ;;  %v2366_v51 = vmul.f32 0.5, %v2358_v8 }
 0x528   :  { %v3336_v9 = vpop.eup %3335 }
 0x529   :  { %v2383_v13 = vadd.f32 1.0, %v3336_v9  ;;  %3349 = verf.f32 %v2374_v11  ;;  %v2636_v9 = vld [vmem:[#allocation7 + $0x108] sm:$0xff] }
 0x52a   :  { %v3338_v15 = vpop.eup %3337 }
 0x52b   :  { %v2391_v6 = vmul.f32 %v2383_v13, %v2359_v12  ;;  %v2384_v10 = vadd.f32 1.0, %v3338_v15 }
 0x52c   :  { %v3340_v18 = vpop.eup %3339 }
 0x52d   :  { %v2417_v19 = vrot.slane %v2391_v6, 6  ;;  %v2392_v20 = vmul.f32 %v2384_v10, %v2360_v17  ;;  %v2385_v24 = vadd.f32 1.0, %v3340_v18  ;;  %v2635_v17 = vld [vmem:[#allocation7 + $0x100] sm:$0xff] }
 0x52e   :  { %v3342_v25 = vpop.eup %3341 }
 0x52f   :  { %2441 = vst [vmem:[#allocation6] sm:$0xfc] %v2417_v19  ;;  %v2418_v27 = vrot.slane %v2392_v20, 6  ;;  %v2393_v28 = vmul.f32 %v2385_v24, %v2361_v22  ;;  %v2386_v34 = vadd.f32 1.0, %v3342_v25  ;;  %v2634_v20 = vld [vmem:[#allocation7 + $0xf8] sm:$0xff] }
 0x530   :  { %v3344_v30 = vpop.eup %3343 }
 0x531   :  { %2443 = vst.msk [vmem:[#allocation6 + $0x8] sm:$0xfc] %vm2442_vm4, %v2418_v27  ;;  %v2419_v14 = vrot.slane %v2393_v28, 6  ;;  %v2387_v35 = vadd.f32 1.0, %v3344_v30  ;;  %v2394_v38 = vmul.f32 %v2386_v34, %v2362_v31  ;;  %v2633_v31 = vld [vmem:[#allocation7 + $0xf0] sm:$0xff] }
 0x532   :  { %v3346_v36 = vpop.eup %3345 }
 0x533   :  { %v5087_v26 = vsel %vm1270_vm13, %v2417_v19, %v2419_v14  ;;  %v2395_v39 = vmul.f32 %v2387_v35, %v2363_v29  ;;  %v2388_v40 = vadd.f32 1.0, %v3346_v36  ;;  %v2421_v41 = vrot.slane %v2394_v38, 6 }
 0x534   :  { %v3348_v32 = vpop.eup %3347  ;;  %v2502_v62 = vrot.slane %v5087_v26, 2  ;;  %v2663_v5 = vrot.slane %v5087_v26, 4 }
 0x535   :  { %v2423_v42 = vrot.slane %v2395_v39, 6  ;;  %v2396_v37 = vmul.f32 %v2388_v40, %v2364_v16  ;;  %v2389_v44 = vadd.f32 1.0, %v3348_v32  ;;  %v2422_v45 = vsel %vm1270_vm13, %v2418_v27, %v2421_v41  ;;  %v2632_v40 = vld [vmem:[#allocation7 + $0xe8] sm:$0xff] }
 0x536   :  { %v3350_v46 = vpop.eup %3349  ;;  %2445 = vst.msk [vmem:[#allocation6 + $0x18] sm:$0xff] %vm1752_vm14, %v2422_v45  ;;  %v2452_v55 = vld [vmem:[#allocation6] sm:$0xfc] }
 0x537   :  { %v5092_v49 = vsel %vm1270_vm13, %v2419_v14, %v2423_v42  ;;  %v2425_v21 = vrot.slane %v2396_v37, 6  ;;  %v2397_v50 = vmul.f32 %v2389_v44, %v2365_v43  ;;  %v2390_v52 = vadd.f32 1.0, %v3350_v46  ;;  %v2462_v57 = vld [vmem:[#allocation6] sm:$0xf0]  ;;  %v2631_v43 = vld [vmem:[#allocation7 + $0xe0] sm:$0xff]  ;;  %v2630_v46 = vld [vmem:[#allocation7 + $0xd8] sm:$0xff] }
 0x538   :  { %v2453_v59 = vld [vmem:[#allocation6 + $0x8] sm:$0xfc]  ;;  %v2501_v60 = vrot.slane %v2452_v55, 2  ;;  %v2662_v63 = vrot.slane %v2462_v57, 4  ;;  %v2507_v6 = vrot.slane %v5092_v49, 2  ;;  %v2668_v10 = vrot.slane %v5092_v49, 4 }
 0x539   :  { %v2426_v53 = vsel %vm1270_vm13, %v2421_v41, %v2425_v21  ;;  %v2427_v54 = vrot.slane %v2397_v50, 6  ;;  %v2398_v23 = vmul.f32 %v2390_v52, %v2366_v51  ;;  %v2463_v47 = vld [vmem:[#allocation6 + $0x8] sm:$0xf0]  ;;  %v2504_v1 = vrot.slane %v2453_v59, 2  ;;  %v2629_v50 = vld [vmem:[#allocation7 + $0xd0] sm:$0xff]  ;;  %v2628_v51 = vld [vmem:[#allocation7 + $0xc8] sm:$0xff] }
 0x53a   :  { %2447 = vst.msk [vmem:[#allocation6 + $0x28] sm:$0xff] %vm1752_vm14, %v2426_v53  ;;  %v2665_v3 = vrot.slane %v2463_v47, 4  ;;  %v5109_v8 = vsel %vm901_vm10, %v2501_v60, %v2502_v62  ;;  %v2664_v12 = vsel %vm1126_vm11, %v2662_v63, %v2663_v5  ;;  %v5127_v24 = vsel %vm901_vm10, %v2502_v62, %v2507_v6  ;;  %v2627_v52 = vld [vmem:[#allocation7 + $0xc0] sm:$0xff]  ;;  %v2626_v53 = vld [vmem:[#allocation7 + $0xb8] sm:$0xff]  ;;  %v2621_v57 = vld [vmem:[#allocation7 + $0x90] sm:$0xff] }
 0x53b   :  { %v5097_v56 = vsel %vm1270_vm13, %v2423_v42, %v2427_v54  ;;  %2450 = vst [vmem:[#allocation6 + $0x40] sm:$0x3] %v2427_v54  ;;  %v2429_v58 = vrot.slane %v2398_v23, 6  ;;  %v2669_v30 = vsel %vm1126_vm11, %v2663_v5, %v2668_v10  ;;  %v2625_v54 = vld [vmem:[#allocation7 + $0xb0] sm:$0xff]  ;;  %v2624_v23 = vld [vmem:[#allocation7 + $0xa8] sm:$0xff]  ;;  %v2623_v55 = vld [vmem:[#allocation7 + $0xa0] sm:$0xff] }
 0x53c   :  { %v2511_v27 = vrot.slane %v5097_v56, 2  ;;  %v2672_v29 = vrot.slane %v5097_v56, 4  ;;  %v2622_v56 = vld [vmem:[#allocation7 + $0x98] sm:$0xff]  ;;  %v2637_v59 = vld [vmem:[#allocation7 + $0x110] sm:$0xff] }
 0x53d   :  { %v2430_v61 = vsel %vm1270_vm13, %v2425_v21, %v2429_v58  ;;  %2451 = vst.msk [vmem:[#allocation6 + $0x48] sm:$0x3] %vm1793_vm3, %v2429_v58  ;;  %v2455_v48 = vld [vmem:[#allocation6 + $0x18] sm:$0xff]  ;;  %v2638_v58 = vld [vmem:[#allocation7 + $0x118] sm:$0xff]  ;;  %v3213_v47 = vld [vmem:[%s5212_s12] ss:$0 sm:$0xff] }
 0x53e   :  { %2449 = vst.msk [vmem:[#allocation6 + $0x38] sm:$0xff] %vm1752_vm14, %v2430_v61  ;;  %v2505_v0 = vrot.slane %v2455_v48, 2  ;;  %v2666_v4 = vrot.slane %v2455_v48, 4  ;;  %v2512_v32 = vsel %vm901_vm10, %v2507_v6, %v2511_v27  ;;  %v2673_v41 = vsel %vm1126_vm11, %v2668_v10, %v2672_v29 }
 0x540   :  { %v5105_v33 = vsel %vm901_vm10, %v2504_v1, %v2505_v0  ;;  %v2667_v7 = vsel %vm1126_vm11, %v2665_v3, %v2666_v4 }
 0x541   :  { %v2457_v11 = vld [vmem:[#allocation6 + $0x28] sm:$0xff]  ;;  %3214 = vmatprep.mubr.msk.f32.mxu0 %vm1752_vm14, %v5105_v33  ;;  %3218 = vmatprep.mubr.msk.f32.mxu1 %vm1752_vm14, %v2667_v7 }
 0x542   :  { %v2509_v13 = vrot.slane %v2457_v11, 2  ;;  %v2670_v15 = vrot.slane %v2457_v11, 4  ;;  %2596 = vmatmul.mubr.f32.vlgmr.msra.gmra.mxu0 %v5109_v8  ;;  %2757 = vmatmul.mubr.f32.vlgmr.msra.gmra.mxu1 %v2664_v12  ;;  %v2460_v36 = vld [vmem:[#allocation6 + $0x40] sm:$0x3] }
 0x543   :  { %2778 = vmatpush1.msra.mxu0 %v2636_v9  ;;  %v2464_v16 = vld [vmem:[#allocation6 + $0x40] sm:$0xf]  ;;  %v2515_v42 = vrot.slane %v2460_v36, 2 }
 0x544   :  { %v5119_v18 = vsel %vm901_vm10, %v2505_v0, %v2509_v13  ;;  %v2671_v19 = vsel %vm1126_vm11, %v2666_v4, %v2670_v15  ;;  %2779 = vmatprep.subr.mxu0 %v5067_v2  ;;  %v2461_v22 = vld [vmem:[#allocation6 + $0x48] sm:$0x3]  ;;  %v2676_v44 = vrot.slane %v2464_v16, 4 }
 0x545   :  { %3215 = vmatprep.mubr.msk.f32.mxu0 %vm1752_vm14, %v5119_v18  ;;  %2780 = vmatpush1.msra.mxu0 %v2635_v17  ;;  %v2459_v25 = vld [vmem:[#allocation6 + $0x38] sm:$0xff]  ;;  %v2465_v28 = vld [vmem:[#allocation6 + $0x48] sm:$0xf]  ;;  %v2517_v35 = vrot.slane %v2461_v22, 2  ;;  %v2516_v49 = vsel %vm901_vm10, %v2511_v27, %v2515_v42 }
 0x546   :  { %3219 = vmatprep.mubr.msk.f32.mxu1 %vm1752_vm14, %v2671_v19  ;;  %2781 = vmatprep.subr.mxu0 %v5067_v2  ;;  %v2513_v34 = vrot.slane %v2459_v25, 2  ;;  %v2674_v14 = vrot.slane %v2459_v25, 4  ;;  %v2678_v39 = vrot.slane %v2465_v28, 4  ;;  %v2677_v21 = vsel %vm1126_vm11, %v2672_v29, %v2676_v44 }
 0x547   :  { %2601 = vmatmul.mubr.f32.gmra.mxu0 %v5127_v24  ;;  %2762 = vmatmul.mubr.f32.gmra.mxu1 %v2669_v30 }
 0x548   :  { %2782 = vmatpush1.msra.mxu0 %v2634_v20  ;;  %v5136_v38 = vsel %vm901_vm10, %v2509_v13, %v2513_v34  ;;  %v2675_v26 = vsel %vm1126_vm11, %v2670_v15, %v2674_v14  ;;  %v2518_v37 = vsel %vm901_vm10, %v2513_v34, %v2517_v35  ;;  %v2679_v45 = vsel %vm1126_vm11, %v2674_v14, %v2678_v39 }
 0x549   :  { %2783 = vmatprep.subr.mxu0 %v5067_v2  ;;  %3216 = vmatprep.mubr.msk.f32.mxu0 %vm1752_vm14, %v5136_v38 }
 0x54a   :  { %2784 = vmatpush1.msra.mxu0 %v2633_v31  ;;  %3220 = vmatprep.mubr.msk.f32.mxu1 %vm1752_vm14, %v2675_v26 }
 0x54b   :  { %2785 = vmatprep.subr.mxu0 %v5067_v2  ;;  %2606 = vmatmul.mubr.f32.gmra.mxu0 %v2512_v32 }
 0x54c   :  { %2767 = vmatmul.mubr.f32.gmra.mxu1 %v2673_v41  ;;  %2786 = vmatpush1.msra.mxu0 %v2632_v40 }
 0x54d   :  { %3217 = vmatprep.mubr.msk.f32.mxu0 %vm1752_vm14, %v2518_v37  ;;  %3221 = vmatprep.mubr.msk.f32.mxu1 %vm1752_vm14, %v2679_v45 }
 0x54e   :  { %2787 = vmatprep.subr.mxu0 %v5067_v2 }
 0x54f   :  { %2788 = vmatpush1.msra.mxu0 %v2631_v43 }
 0x550   :  { %2789 = vmatprep.subr.mxu0 %v5067_v2  ;;  %2611 = vmatmul.mubr.f32.gmra.mxu0 %v2516_v49 }
 0x551   :  { %2772 = vmatmul.mubr.f32.gmra.mxu1 %v2677_v21  ;;  %2790 = vmatpush1.msra.mxu0 %v2630_v46 }
 0x552   :  { %2791 = vmatprep.subr.mxu0 %v5067_v2  ;;  %3222 = vmatprep.mubr.msk.f32.mxu0 %vm1752_vm14, %v5105_v33 }
 0x553   :  { %2792 = vmatpush1.msra.mxu0 %v2629_v50 }
 0x554   :  { %2793 = vmatprep.subr.mxu0 %v5067_v2 }
 0x555   :  { %2794 = vmatpush1.msra.mxu0 %v2628_v51 }
 0x556   :  { %2795 = vmatprep.subr.mxu0 %v5067_v2 }
 0x557   :  { %2796 = vmatpush1.msra.mxu0 %v2627_v52 }
 0x558   :  { %2797 = vmatprep.subr.mxu0 %v5067_v2 }
 0x559   :  { %2798 = vmatpush1.msra.mxu0 %v2626_v53 }
 0x55a   :  { %2799 = vmatprep.subr.mxu0 %v5067_v2 }
 0x55b   :  { %2800 = vmatpush1.msra.mxu0 %v2625_v54 }
 0x55c   :  { %2801 = vmatprep.subr.mxu0 %v5067_v2 }
 0x55d   :  { %2802 = vmatpush1.msra.mxu0 %v2624_v23 }
 0x55e   :  { %2803 = vmatprep.subr.mxu0 %v5067_v2 }
 0x55f   :  { %2804 = vmatpush1.msra.mxu0 %v2623_v55 }
 0x560   :  { %2805 = vmatprep.subr.mxu0 %v5067_v2 }
 0x561   :  { %2806 = vmatpush1.msra.mxu0 %v2622_v56 }
 0x562   :  { %2807 = vmatprep.subr.mxu0 %v5067_v2 }
 0x563   :  { %2808 = vmatpush1.msra.mxu0 %v2621_v57 }
 0x564   :  { %2837 = vmatprep.subr.mxu0 %v5067_v2 }
 0x565   :  { %2838 = vmatpush2.msra.mxu0 %v2638_v58 }
 0x566   :  { %2839 = vmatprep.subr.mxu0 %v5067_v2 }
 0x567   :  { %2840 = vmatpush2.msra.mxu0 %v2637_v59 }
 0x568   :  { %2842 = vmatmul.mubr.f32.vlgmr.msra.gmra.mxu0 %v5109_v8 }
 0x569   :  { %3223 = vmatprep.mubr.msk.f32.mxu0 %vm1752_vm14, %v5119_v18 }
 0x56c   :  { %2847 = vmatmul.mubr.f32.gmra.mxu0 %v5127_v24 }
 0x56d   :  { %3224 = vmatprep.mubr.msk.f32.mxu0 %vm1752_vm14, %v5136_v38 }
 0x570   :  { %2852 = vmatmul.mubr.f32.gmra.mxu0 %v2512_v32 }
 0x571   :  { %3225 = vmatprep.mubr.msk.f32.mxu0 %vm1752_vm14, %v2518_v37 }
 0x574   :  { %2857 = vmatmul.mubr.f32.gmra.mxu0 %v2516_v49 }
 0x602   :  { %v2597_v2 = vpop.f32.mrf.mxu0  ;;  %v2758_v60 = vpop.f32.mrf.mxu1 }
 0x603   :  { %v2598_v61 = vadd.f32 %v3213_v47, %v2597_v2 }
 0x604   :  { %v2599_v48 = vpop.f32.mrf.mxu0  ;;  %v2760_v62 = vpop.f32.mrf.mxu1 }
 0x605   :  { %3351 = vtanh.f32 %v2598_v61 }
 0x607   :  { %v2602_v63 = vpop.f32.mrf.mxu0  ;;  %v2763_v0 = vpop.f32.mrf.mxu1 }
 0x608   :  { %v2603_v1 = vadd.f32 %v3213_v47, %v2602_v63 }
 0x609   :  { %v2604_v3 = vpop.f32.mrf.mxu0  ;;  %v2765_v4 = vpop.f32.mrf.mxu1 }
 0x60a   :  { %3353 = vtanh.f32 %v2603_v1 }
 0x60b   :  { %v2607_v5 = vpop.f32.mrf.mxu0 }
 0x60c   :  { %v2768_v33 = vpop.f32.mrf.mxu1  ;;  %v2608_v7 = vadd.f32 %v3213_v47, %v2607_v5 }
 0x60d   :  { %v2609_v8 = vpop.f32.mrf.mxu0 }
 0x60e   :  { %v2770_v9 = vpop.f32.mrf.mxu1  ;;  %3355 = vtanh.f32 %v2608_v7 }
 0x610   :  { %v2612_v11 = vpop.f32.mrf.mxu0 }
 0x611   :  { %v2613_v12 = vadd.f32 %v3213_v47, %v2612_v11  ;;  %v2773_v13 = vpop.f32.mrf.mxu1 }
 0x612   :  { %v2614_v15 = vpop.f32.mrf.mxu0  ;;  %v3352_v6 = vpop.eup %3351 }
 0x613   :  { %3357 = vtanh.f32 %v2613_v12  ;;  %v2775_v17 = vpop.f32.mrf.mxu1  ;;  %2870 = vst [vmem:[%s5213_s13] sm:$0xff] %v3352_v6 }
 0x617   :  { %v3354_v10 = vpop.eup %3353 }
 0x618   :  { %2871 = vst [vmem:[%s5213_s13 + $0x8] sm:$0xff] %v3354_v10 }
 0x61b   :  { %v3356_v18 = vpop.eup %3355 }
 0x61c   :  { %2872 = vst [vmem:[%s5213_s13 + $0x10] sm:$0xff] %v3356_v18 }
 0x620   :  { %v3358_v19 = vpop.eup %3357 }
 0x621   :  { %2873 = vst [vmem:[%s5213_s13 + $0x18] sm:$0xff] %v3358_v19 }
 0x628   :  { %v2843_v20 = vpop.f32.mrf.mxu0 }
 0x629   :  { %v2844_v22 = vadd.f32 %v2843_v20, %v2758_v60 }
 0x62a   :  { %v2845_v24 = vpop.f32.mrf.mxu0 }
 0x62b   :  { %v2862_v25 = vadd.f32 %v3213_v47, %v2844_v22 }
 0x62c   :  { %v2848_v27 = vpop.f32.mrf.mxu0 }
 0x62d   :  { %3359 = vtanh.f32 %v2862_v25  ;;  %v2849_v28 = vadd.f32 %v2848_v27, %v2763_v0 }
 0x62e   :  { %v2850_v30 = vpop.f32.mrf.mxu0 }
 0x62f   :  { %v2863_v31 = vadd.f32 %v3213_v47, %v2849_v28 }
 0x630   :  { %v2853_v34 = vpop.f32.mrf.mxu0 }
 0x631   :  { %3361 = vtanh.f32 %v2863_v31  ;;  %v2854_v14 = vadd.f32 %v2853_v34, %v2768_v33 }
 0x632   :  { %v2855_v29 = vpop.f32.mrf.mxu0 }
 0x633   :  { %v2864_v35 = vadd.f32 %v3213_v47, %v2854_v14 }
 0x634   :  { %v2858_v36 = vpop.f32.mrf.mxu0 }
 0x635   :  { %3363 = vtanh.f32 %v2864_v35  ;;  %v2859_v38 = vadd.f32 %v2858_v36, %v2773_v13 }
 0x636   :  { %v2860_v26 = vpop.f32.mrf.mxu0 }
 0x637   :  { %v2865_v39 = vadd.f32 %v3213_v47, %v2859_v38 }
 0x639   :  { %3365 = vtanh.f32 %v2865_v39 }
 0x63a   :  { %v3360_v16 = vpop.eup %3359 }
 0x63b   :  { %2874 = vst [vmem:[%s5213_s13 + $0x20] sm:$0xff] %v3360_v16 }
 0x63e   :  { %v3362_v40 = vpop.eup %3361 }
 0x63f   :  { %2875 = vst [vmem:[%s5213_s13 + $0x28] sm:$0xff] %v3362_v40 }
 0x642   :  { %v3364_v32 = vpop.eup %3363 }
 0x643   :  { %2876 = vst [vmem:[%s5213_s13 + $0x30] sm:$0xff] %v3364_v32 }
 0x646   :  { %v3366_v41 = vpop.eup %3365 }
 0x647   :  { %2877 = vst [vmem:[%s5213_s13 + $0x38] sm:$0xff] %v3366_v41 }
 0x648   :  { %2882 = vsyncpa [#allocation8], 1 }

</bundles_post_ra>
